<compile_context>
chip_gen: v7x
topology: tpu7x:2x2x1
jax: 0.10.0
libtpu: 0.0.40
codegen_flags: <defaults>
</compile_context>

<pallas_src>
import functools

import jax
import jax.numpy as jnp
import numpy as np
from jax.experimental import pallas as pl
from jax.experimental.pallas import tpu as pltpu


def _round_up(a, b):
    return ((a + b - 1) // b) * b


def _harmonic_kernel(x_ref, s_ref, o_ref):
    # x_ref: (tm, D) f32   s_ref: (D, D*N) f32   o_ref: (tm, 2*D*N)
    dn = s_ref.shape[1]
    # One MXU matmul replaces the broadcast+reshape: column d*N+n of S holds
    # omega0 * 2**n in row d, so emb[:, d*N + n] == x[:, d] * freqs[n].
    emb = jnp.dot(
        x_ref[...],
        s_ref[...],
        preferred_element_type=jnp.float32,
        precision=jax.lax.Precision.HIGHEST,
    )
    # Two lane-dense slice stores; no in-kernel concatenate copy.
    o_ref[:, :dn] = jnp.sin(emb).astype(o_ref.dtype)
    o_ref[:, dn:] = jnp.cos(emb).astype(o_ref.dtype)


def _build_scale_matrix(d, n, omega0):
    # freqs matches torch exactly: f32(omega0) * 2**n (power-of-two scaling exact).
    freqs = (omega0 * (2.0 ** np.arange(n, dtype=np.float64))).astype(np.float32)
    s = np.zeros((d, d * n), dtype=np.float32)
    for i in range(d):
        s[i, i * n:(i + 1) * n] = freqs
    return s


@functools.partial(
    jax.jit, static_argnames=("n_harmonic_functions", "omega0", "block_rows")
)
def harmonic_embedding(x, n_harmonic_functions=60, omega0=0.1, block_rows=None):
    orig_shape = x.shape
    d = orig_shape[-1]
    n = n_harmonic_functions
    dn = d * n
    out_width = 2 * dn

    m = int(np.prod(orig_shape[:-1]))
    x2 = x.reshape(m, d).astype(jnp.float32)

    # ---- row-tile size: 512 rows by default, capped so the double-buffered
    # output tile stays around 4 MiB (safe on v7x's 64 MiB VMEM and under the
    # default scoped VMEM limit on every chip).
    if block_rows is None:
        budget = 4 * 1024 * 1024                      # per output buffer
        tm = min(512, max(8, (budget // (out_width * 4)) // 8 * 8))
    else:
        tm = max(8, _round_up(block_rows, 8))
    tm = min(tm, _round_up(m, 8))
    m_pad = _round_up(m, tm)
    if m_pad != m:
        x2 = jnp.pad(x2, ((0, m_pad - m), (0, 0)))

    s = jnp.asarray(_build_scale_matrix(d, n, omega0))

    out = pl.pallas_call(
        _harmonic_kernel,
        out_shape=jax.ShapeDtypeStruct((m_pad, out_width), jnp.float32),
        grid_spec=pltpu.PrefetchScalarGridSpec(
            num_scalar_prefetch=0,
            grid=(m_pad // tm,),
            in_specs=[
                pl.BlockSpec((tm, d), lambda i: (i, 0)),   # row tile of x
                pl.BlockSpec((d, dn), lambda i: (0, 0)),   # constant scale matrix
            ],
            out_specs=pl.BlockSpec((tm, out_width), lambda i: (i, 0)),
        ),
        compiler_params=pltpu.CompilerParams(
            dimension_semantics=("parallel",),             # megacore sharding on v7x
            vmem_limit_bytes=32 * 1024 * 1024,
        ),
    )(x2, s)

    if m_pad != m:
        out = out[:m]
    return out.reshape(*orig_shape[:-1], out_width)


def _reference(x, n, omega0):
    freqs = jnp.asarray(
        (omega0 * (2.0 ** np.arange(n, dtype=np.float64))).astype(np.float32)
    )
    x = x.astype(jnp.float32)
    embed = (x[..., None] * freqs).reshape(*x.shape[:-1], -1)
    return jnp.concatenate([jnp.sin(embed), jnp.cos(embed)], axis=-1)


if __name__ == "__main__":
    key = jax.random.PRNGKey(0)
    # Small, module-consistent shapes: (batch=2, views=4, points=16, feat=16).
    x = jax.random.uniform(key, (2, 4, 16, 16), jnp.float32, minval=-1.0, maxval=1.0)

    # --- config 1: N=16 harmonics (all arguments small enough that f32 sin/cos
    # is well conditioned, so compare tightly against the reference).
    n_h = 16
    out = jax.block_until_ready(harmonic_embedding(x, n_harmonic_functions=n_h, omega0=0.1))
    ref = _reference(x, n_h, 0.1)
    assert out.shape == (2, 4, 16, 2 * 16 * n_h), out.shape
    np.testing.assert_allclose(np.asarray(out), np.asarray(ref), atol=1e-2, rtol=0)

    # --- config 2: module defaults (N=60). The highest harmonics have arguments
    # ~1e16 where f32 sin/cos is ill conditioned (the reference itself is
    # numerically meaningless there), so only low-frequency columns are compared.
    n_h = 60
    out = jax.block_until_ready(harmonic_embedding(x, n_harmonic_functions=n_h, omega0=0.1))
    ref = _reference(x, n_h, 0.1)
    assert out.shape == (2, 4, 16, 2 * 16 * n_h), out.shape
    d = x.shape[-1]
    dn = d * n_h
    n_ok = 10
    cols = np.concatenate([np.arange(k * n_h, k * n_h + n_ok) for k in range(d)])
    cols = np.concatenate([cols, dn + cols])
    np.testing.assert_allclose(
        np.asarray(out)[..., cols], np.asarray(ref)[..., cols], atol=1e-3, rtol=0
    )

    print("KERNEL_OK")
</pallas_src>

<mosaic_0001>
module attributes {stable_mosaic.version = 11 : i64} {
  func.func @_harmonic_kernel(%arg0: i32, %arg1: memref<128x16xf32, #tpu.memory_space<vmem>>, %arg2: memref<16x256xf32, #tpu.memory_space<vmem>>, %arg3: memref<128x512xf32, #tpu.memory_space<vmem>>) attributes {dimension_semantics = [#tpu.dimension_semantics<parallel>], iteration_bounds = array<i64: 1>, scalar_prefetch = 0 : i64, scratch_operands = 0 : i64, tpu.core_type = #tpu.core_type<tc>, window_params = [{transform_indices = @transform_0, window_bounds = array<i64: 128, 16>}, {pipeline_mode = #tpu.pipeline_mode<synchronous>, transform_indices = @transform_1, window_bounds = array<i64: 16, 256>}, {transform_indices = @transform_2, window_bounds = array<i64: 128, 512>}]} {
    %c0 = arith.constant 0 : index
    %c0_0 = arith.constant 0 : index
    %0 = vector.load %arg1[%c0, %c0_0] : memref<128x16xf32, #tpu.memory_space<vmem>>, vector<128x16xf32>
    %c0_1 = arith.constant 0 : index
    %c0_2 = arith.constant 0 : index
    %1 = vector.load %arg2[%c0_1, %c0_2] : memref<16x256xf32, #tpu.memory_space<vmem>>, vector<16x256xf32>
    %cst = arith.constant dense<0.000000e+00> : vector<128x256xf32>
    %2 = tpu.matmul %0, %1, %cst {dimension_numbers = #tpu.dot_dimension_numbers<[1], [0], [0], [1], [0, 0, 1, 1], [], []>, precision = #tpu.contract_precision<fp32>} : vector<128x16xf32>, vector<16x256xf32>, vector<128x256xf32> -> vector<128x256xf32>
    %3 = math.sin %2 : vector<128x256xf32>
    %c0_3 = arith.constant 0 : index
    %c0_4 = arith.constant 0 : index
    %4 = vector.load %arg3[%c0_3, %c0_4] : memref<128x512xf32, #tpu.memory_space<vmem>>, vector<128x256xf32>
    tpu.vector_store %arg3[%c0_3, %c0_4], %3 {strides = array<i32>} : memref<128x512xf32, #tpu.memory_space<vmem>>, vector<128x256xf32>,
    %5 = math.cos %2 : vector<128x256xf32>
    %c0_5 = arith.constant 0 : index
    %c256 = arith.constant 256 : index
    %6 = vector.load %arg3[%c0_5, %c256] : memref<128x512xf32, #tpu.memory_space<vmem>>, vector<128x256xf32>
    tpu.vector_store %arg3[%c0_5, %c256], %5 {strides = array<i32>} : memref<128x512xf32, #tpu.memory_space<vmem>>, vector<128x256xf32>,
    return
  }
  func.func @transform_0(%arg0: i32) -> (i32, i32) {
    %c0_i32 = arith.constant 0 : i32
    %c0_i32_0 = arith.constant 0 : i32
    return %arg0, %c0_i32 : i32, i32
  }
  func.func @transform_1(%arg0: i32) -> (i32, i32) {
    %c0_i32 = arith.constant 0 : i32
    %c0_i32_0 = arith.constant 0 : i32
    %c0_i32_1 = arith.constant 0 : i32
    return %c0_i32, %c0_i32_0 : i32, i32
  }
  func.func @transform_2(%arg0: i32) -> (i32, i32) {
    %c0_i32 = arith.constant 0 : i32
    %c0_i32_0 = arith.constant 0 : i32
    return %arg0, %c0_i32 : i32, i32
  }
}

</mosaic_0001>

<bundles_post_ra>
// kernel: harmonic_embedding.1
= control target key start
LH: loop header
LB: loop body
LE: loop exit
PB: predicated region body
PF: predicated region fallthrough
CT: control target
= control target key end

     0   :  { %7 = vsyncpa [#allocation3], 0  ;;  %s12459_s0 = inlined_call_operand.hbm [shape: f32[128,16], index: 0, kind: input, shape index: {}]   ;;  %s12460_s1 = inlined_call_operand.hbm [shape: f32[16,256], index: 1, kind: input, shape index: {}]   ;;  %s12461_s2 = inlined_call_operand.hbm [shape: f32[128,512], index: 2, kind: output, shape index: {}]  }
   0x1   :  { %8 = vsyncpa [#allocation6], 0 }
   0x2   :  { %9 = vsyncpa [#allocation4], 0  ;;  %s8825_s9 = smov [#allocation2]   ;;  %s8753_s13 = scalar_lea.hbm %s12459_s0, 2048 }
   0x3   :  { %s15_s10 = sshll.u32 %s8825_s9, 4  ;;  %p8754_p0 = scmp.ne.s32.totalorder %s12459_s0, %s8753_s13  ;;  %s16_s10 = int_to_ptr.vmem [resolvable:$true] %s15_s10 }
   0x4   :  { %p8757_p1 = scmp.lt.u32.totalorder %s8753_s13, %s12459_s0 }
   0x6   :  { %p8759_p2 = pnand %p8757_p1, %p8754_p0 }
   0x8   :  { %8762 = shalt.err (!%p8759_p2)
}
   0x9   :  { %s8763_s18 = scalar_lea.vmem %s16_s10, 2048  ;;  %p8768_p4 = scmp.lt.s32.totalorder %s16_s10, %s16_s10 }
   0xa   :  { %p8764_p3 = scmp.ne.s32.totalorder %s16_s10, %s8763_s18  ;;  %p8769_p5 = scmp.lt.s32.totalorder %s8763_s18, %s8763_s18 }
   0xc   :  { %p8770_p6 = por %p8769_p5, %p8768_p4 }
   0xe   :  { %p8771_p7 = pnand %p8770_p6, %p8764_p3 }
  0x10   :  { %8774 = shalt.err (!%p8771_p7)
}
  0x11   :  { %s8826_s19 = smov 128   ;;  %s8827_s20 = smov 8  }
  0x12   :  { %21 = dma.hbm_to_vmem [thread:$0]  %s12459_s0, 2048, %s16_s10, [#allocation3], %s8826_s19, %s8826_s19, %s8827_s20  }
  0x13   :  { %s8828_s23 = smov [#allocation5]   ;;  %s8775_s27 = scalar_lea.hbm %s12460_s1, 512 }
  0x14   :  { %s27_s24 = sshll.u32 %s8828_s23, 4  ;;  %p8776_p8 = scmp.ne.s32.totalorder %s12460_s1, %s8775_s27  ;;  %s28_s24 = int_to_ptr.vmem [resolvable:$true] %s27_s24 }
  0x15   :  { %p8779_p9 = scmp.lt.u32.totalorder %s8775_s27, %s12460_s1 }
  0x17   :  { %p8781_p10 = pnand %p8779_p9, %p8776_p8 }
  0x19   :  { %8784 = shalt.err (!%p8781_p10)
}
  0x1a   :  { %s8785_s4 = scalar_lea.vmem %s28_s24, 512  ;;  %p8790_p12 = scmp.lt.s32.totalorder %s28_s24, %s28_s24 }
  0x1b   :  { %p8786_p11 = scmp.ne.s32.totalorder %s28_s24, %s8785_s4  ;;  %p8791_p13 = scmp.lt.s32.totalorder %s8785_s4, %s8785_s4 }
  0x1d   :  { %p8792_p0 = por %p8791_p13, %p8790_p12 }
  0x1f   :  { %p8793_p1 = pnand %p8792_p0, %p8786_p11 }
  0x21   :  { %8796 = shalt.err (!%p8793_p1)
}
  0x22   :  { %s8829_s0 = smov 256   ;;  %s8830_s5 = smov 16  }
  0x23   :  { %33 = dma.hbm_to_vmem [thread:$0]  %s12460_s1, 512, %s28_s24, [#allocation6], %s8829_s0, %s8829_s0, %s8830_s5  }
  0x24   :  { %8819 = dma.done.wait [#allocation3], 2048  }
  0x25   :  { %8820 = vsyncadd [#allocation3], 4294965248 }
  0x26   :  { %8821 = dma.done.wait [#allocation6], 512  }
  0x27   :  { %8822 = vsyncadd [#allocation6], 4294966784  ;;  %v8831_v0 = vmov 0.0   ;;  %vm60_vm0 = vcmask 130048   ;;  %v57_v1 = vld [vmem:[#allocation5 + $0x8] sm:$0xff]  ;;  %v59_v2 = vld [vmem:[#allocation5 + $0x18] sm:$0xff] }
  0x28   :  { %820 = vmatprep.mubr.f32.mxu0 %v8831_v0  ;;  %177 = vmatprep.mubr.f32.mxu1 %v8831_v0  ;;  %v56_v3 = vld [vmem:[#allocation5] sm:$0xff]  ;;  %v109_v4 = vand.u32 4294901760, %v57_v1  ;;  %v113_v5 = vand.u32 4294901760, %v59_v2  ;;  %v58_v6 = vld [vmem:[#allocation5 + $0x10] sm:$0xff]  ;;  %v41_v9 = vld [vmem:[#allocation2 + $0x8] sm:$0xff]  ;;  %s8838_s1 = smov [#allocation7]  }
  0x29   :  { %v111_v7 = vand.u32 4294901760, %v56_v3  ;;  %v40_v8 = vld [vmem:[#allocation2] sm:$0xff]  ;;  %v115_v10 = vand.u32 4294901760, %v58_v6  ;;  %v65_v12 = vsel %vm60_vm0, %v41_v9, 0  ;;  %v42_v13 = vld [vmem:[#allocation2 + $0x10] sm:$0xff]  ;;  %v43_v34 = vld [vmem:[#allocation2 + $0x18] sm:$0xff] }
  0x2a   :  { %v62_v11 = vsel %vm60_vm0, %v40_v8, 0  ;;  %v8297_v14 = vpack.c.bf16 %v113_v5, %v109_v4  ;;  %v8884_v15 = vsub.f32 %v57_v1, %v109_v4  ;;  %v8886_v16 = vsub.f32 %v59_v2, %v113_v5  ;;  %v44_v39 = vld [vmem:[#allocation2 + $0x20] sm:$0xff]  ;;  %v45_v48 = vld [vmem:[#allocation2 + $0x28] sm:$0xff]  ;;  %v46_v53 = vld [vmem:[#allocation2 + $0x30] sm:$0xff]  ;;  %s8028_s8 = sshll.u32 %s8838_s1, 4  ;;  %s8029_s8 = int_to_ptr.vmem [resolvable:$true] %s8028_s8 }
  0x2b   :  { %v8888_v17 = vsub.f32 %v56_v3, %v111_v7  ;;  %v8890_v18 = vpack.c.bf16 %v115_v10, %v111_v7  ;;  %v8892_v19 = vsub.f32 %v58_v6, %v115_v10  ;;  %v8894_v20 = vand.u32 4294901760, %v62_v11  ;;  %v47_v1 = vld [vmem:[#allocation2 + $0x38] sm:$0xff]  ;;  %v48_v9 = vld [vmem:[#allocation2 + $0x40] sm:$0xff]  ;;  %s8797_s9 = scalar_lea.vmem %s8029_s8, 8192  ;;  %p8802_p3 = scmp.lt.s32.totalorder %s8029_s8, %s8029_s8 }
  0x2c   :  { %v8896_v21 = vand.u32 4294901760, %v65_v12  ;;  %8310 = vmatprep.subr.bf16.mxu0 %v8297_v14  ;;  %8298 = vmatprep.subr.bf16.mxu1 %v8297_v14  ;;  %v356_v22 = vand.u32 4294901760, %v8884_v15  ;;  %v368_v23 = vand.u32 4294901760, %v8886_v16  ;;  %v68_v25 = vsel %vm60_vm0, %v42_v13, 0  ;;  %p8798_p2 = scmp.ne.s32.totalorder %s8029_s8, %s8797_s9  ;;  %p8803_p4 = scmp.lt.s32.totalorder %s8797_s9, %s8797_s9 }
  0x2d   :  { %v362_v24 = vand.u32 4294901760, %v8888_v17  ;;  %8312 = vmatpush1.bf16.msra.mxu0 %v8890_v18  ;;  %8300 = vmatpush1.bf16.msra.mxu1 %v8890_v18  ;;  %v8905_v26 = vsub.f32 %v62_v11, %v8894_v20  ;;  %v374_v28 = vand.u32 4294901760, %v8892_v19  ;;  %v8911_v29 = vand.u32 4294901760, %v68_v25 }
  0x2e   :  { %v8908_v27 = vsub.f32 %v65_v12, %v8896_v21  ;;  %v357_v30 = vsub.f32 %v8884_v15, %v356_v22  ;;  %v369_v31 = vsub.f32 %v8886_v16, %v368_v23  ;;  %v8313_v32 = vpack.c.bf16 %v368_v23, %v356_v22  ;;  %v49_v23 = vld [vmem:[#allocation2 + $0x48] sm:$0xff]  ;;  %p8804_p5 = por %p8803_p4, %p8802_p3 }
  0x2f   :  { %v363_v33 = vsub.f32 %v8888_v17, %v362_v24  ;;  %v180_v35 = vand.u32 4294901760, %v8905_v26  ;;  %v375_v37 = vsub.f32 %v8892_v19, %v374_v28  ;;  %v8315_v38 = vpack.c.bf16 %v374_v28, %v362_v24 }
  0x30   :  { %v191_v36 = vand.u32 4294901760, %v8908_v27  ;;  %v358_v40 = vand.u32 4294901760, %v357_v30  ;;  %v370_v41 = vand.u32 4294901760, %v369_v31  ;;  %8314 = vmatprep.subr.bf16.mxu0 %v8313_v32  ;;  %v8920_v43 = vsub.f32 %v68_v25, %v8911_v29  ;;  %v50_v32 = vld [vmem:[#allocation2 + $0x50] sm:$0xff]  ;;  %p8805_p6 = pnand %p8804_p5, %p8798_p2 }
  0x31   :  { %v364_v42 = vand.u32 4294901760, %v363_v33  ;;  %824 = vmatmul.mubr.f32.vlgmr.msra.gmra.mrb[0].mxu0 %v180_v35  ;;  %v181_v44 = vsub.f32 %v8905_v26, %v180_v35  ;;  %v376_v45 = vand.u32 4294901760, %v375_v37  ;;  %v71_v47 = vsel %vm60_vm0, %v43_v34, 0 }
  0x32   :  { %v192_v46 = vsub.f32 %v8908_v27, %v191_v36  ;;  %829 = vmatprep.mubr.f32.mxu0 %v8831_v0  ;;  %v8301_v49 = vpack.c.bf16 %v370_v41, %v358_v40  ;;  %8316 = vmatpush1.bf16.msra.mxu0 %v8315_v38  ;;  %v202_v50 = vand.u32 4294901760, %v8920_v43  ;;  %v8927_v51 = vand.u32 4294901760, %v71_v47 }
  0x33   :  { %v74_v52 = vsel %vm60_vm0, %v44_v39, 0  ;;  %v182_v54 = vand.u32 4294901760, %v181_v44  ;;  %v8303_v55 = vpack.c.bf16 %v376_v45, %v364_v42  ;;  %8318 = vmatprep.subr.bf16.mxu0 %v8297_v14  ;;  %v77_v59 = vsel %vm60_vm0, %v45_v48, 0  ;;  %v52_v48 = vld [vmem:[#allocation2 + $0x60] sm:$0xff] }
  0x34   :  { %v8930_v56 = vand.u32 4294901760, %v74_v52  ;;  %8302 = vmatprep.subr.bf16.mxu1 %v8301_v49  ;;  %v193_v57 = vand.u32 4294901760, %v192_v46  ;;  %v8933_v58 = vsub.f32 %v71_v47, %v8927_v51  ;;  %v203_v60 = vsub.f32 %v8920_v43, %v202_v50 }
  0x35   :  { %183 = vmatmul.mubr.f32.vlgmr.msra.gmra.mrb[0].mxu1 %v182_v54  ;;  %833 = vmatmul.mubr.f32.gmra.mrb[2].mxu0 %v191_v36  ;;  %v8940_v62 = vand.u32 4294901760, %v77_v59  ;;  %v80_v63 = vsel %vm60_vm0, %v46_v53, 0  ;;  %v83_v4 = vsel %vm60_vm0, %v47_v1, 0  ;;  %v86_v11 = vsel %vm60_vm0, %v48_v9, 0 }
  0x36   :  { %v8938_v61 = vsub.f32 %v74_v52, %v8930_v56  ;;  %8304 = vmatpush1.bf16.msra.mxu1 %v8303_v55  ;;  %188 = vmatprep.mubr.f32.mxu1 %v8831_v0  ;;  %v213_v2 = vand.u32 4294901760, %v8933_v58  ;;  %v8946_v3 = vand.u32 4294901760, %v80_v63  ;;  %v204_v5 = vand.u32 4294901760, %v203_v60 }
  0x37   :  { %838 = vmatprep.mubr.f32.mxu0 %v8831_v0  ;;  %v8952_v8 = vsub.f32 %v77_v59, %v8940_v62  ;;  %v8956_v10 = vand.u32 4294901760, %v83_v4  ;;  %v8966_v24 = vand.u32 4294901760, %v86_v11  ;;  %v89_v33 = vsel %vm60_vm0, %v49_v23, 0 }
  0x38   :  { %v214_v6 = vsub.f32 %v8933_v58, %v213_v2  ;;  %v224_v7 = vand.u32 4294901760, %v8938_v61  ;;  %v8962_v22 = vsub.f32 %v80_v63, %v8946_v3  ;;  %v8305_v34 = vpack.c.bf16 %v8886_v16, %v8884_v15  ;;  %v51_v15 = vld [vmem:[#allocation2 + $0x58] sm:$0xff] }
  0x39   :  { %194 = vmatmul.mubr.f32.gmra.mrb[2].mxu1 %v193_v57  ;;  %842 = vmatmul.mubr.f32.gmra.mrb[4].mxu0 %v202_v50  ;;  %v235_v14 = vand.u32 4294901760, %v8952_v8  ;;  %v8971_v31 = vsub.f32 %v83_v4, %v8956_v10  ;;  %v8979_v35 = vsub.f32 %v86_v11, %v8966_v24  ;;  %v92_v36 = vsel %vm60_vm0, %v50_v32, 0  ;;  %v53_v57 = vld [vmem:[#allocation2 + $0x68] sm:$0xff] }
  0x3a   :  { %199 = vmatprep.mubr.f32.mxu1 %v8831_v0  ;;  %847 = vmatprep.mubr.f32.mxu0 %v8831_v0  ;;  %v215_v12 = vand.u32 4294901760, %v214_v6  ;;  %v225_v13 = vsub.f32 %v8938_v61, %v224_v7  ;;  %v246_v30 = vand.u32 4294901760, %v8962_v22  ;;  %v8307_v37 = vpack.c.bf16 %v8892_v19, %v8888_v17 }
  0x3b   :  { %v236_v28 = vsub.f32 %v8952_v8, %v235_v14  ;;  %v257_v40 = vand.u32 4294901760, %v8971_v31  ;;  %v8986_v41 = vand.u32 4294901760, %v89_v33  ;;  %8306 = vmatprep.subr.bf16.mxu1 %v8305_v34  ;;  %v268_v16 = vand.u32 4294901760, %v8979_v35 }
  0x3c   :  { %v226_v25 = vand.u32 4294901760, %v225_v13  ;;  %v247_v39 = vsub.f32 %v8962_v22, %v246_v30  ;;  %v8991_v42 = vand.u32 4294901760, %v92_v36  ;;  %v95_v47 = vsel %vm60_vm0, %v51_v15, 0 }
  0x3d   :  { %205 = vmatmul.mubr.f32.gmra.mrb[4].mxu1 %v204_v5  ;;  %851 = vmatmul.mubr.f32.gmra.mrb[6].mxu0 %v213_v2  ;;  %v237_v38 = vand.u32 4294901760, %v236_v28  ;;  %v258_v45 = vsub.f32 %v8971_v31, %v257_v40  ;;  %v8995_v46 = vsub.f32 %v89_v33, %v8986_v41  ;;  %v269_v49 = vsub.f32 %v8979_v35, %v268_v16  ;;  %v54_v5 = vld [vmem:[#allocation2 + $0x70] sm:$0xff] }
  0x3e   :  { %210 = vmatprep.mubr.f32.mxu1 %v8831_v0  ;;  %856 = vmatprep.mubr.f32.mxu0 %v8831_v0  ;;  %v248_v44 = vand.u32 4294901760, %v247_v39  ;;  %v9002_v50 = vsub.f32 %v92_v36, %v8991_v42  ;;  %v9005_v54 = vand.u32 4294901760, %v95_v47  ;;  %v98_v55 = vsel %vm60_vm0, %v52_v48, 0 }
  0x3f   :  { %v259_v52 = vand.u32 4294901760, %v258_v45  ;;  %v279_v53 = vand.u32 4294901760, %v8995_v46  ;;  %v270_v59 = vand.u32 4294901760, %v269_v49  ;;  %v9015_v2 = vand.u32 4294901760, %v98_v55 }
  0x40   :  { %v290_v60 = vand.u32 4294901760, %v9002_v50  ;;  %v9013_v1 = vsub.f32 %v95_v47, %v9005_v54  ;;  %v101_v4 = vsel %vm60_vm0, %v53_v57, 0  ;;  %v104_v13 = vsel %vm60_vm0, %v54_v5, 0 }
  0x41   :  { %216 = vmatmul.mubr.f32.gmra.mrb[6].mxu1 %v215_v12  ;;  %860 = vmatmul.mubr.f32.gmra.mrb[8].mxu0 %v224_v7  ;;  %v280_v63 = vsub.f32 %v8995_v46, %v279_v53  ;;  %v9021_v7 = vand.u32 4294901760, %v101_v4  ;;  %v9025_v12 = vsub.f32 %v98_v55, %v9015_v2  ;;  %v9030_v23 = vand.u32 4294901760, %v104_v13 }
  0x42   :  { %221 = vmatprep.mubr.f32.mxu1 %v8831_v0  ;;  %865 = vmatprep.mubr.f32.mxu0 %v8831_v0  ;;  %v291_v6 = vsub.f32 %v9002_v50, %v290_v60  ;;  %v301_v11 = vand.u32 4294901760, %v9013_v1 }
  0x43   :  { %v281_v9 = vand.u32 4294901760, %v280_v63  ;;  %v312_v32 = vand.u32 4294901760, %v9025_v12  ;;  %v9036_v33 = vsub.f32 %v101_v4, %v9021_v7 }
  0x44   :  { %v292_v28 = vand.u32 4294901760, %v291_v6 }
  0x45   :  { %227 = vmatmul.mubr.f32.gmra.mrb[8].mxu1 %v226_v25  ;;  %869 = vmatmul.mubr.f32.gmra.mrb[10].mxu0 %v235_v14  ;;  %v55_v14 = vld [vmem:[#allocation2 + $0x78] sm:$0xff]  ;;  %v323_v39 = vand.u32 4294901760, %v9036_v33 }
  0x46   :  { %232 = vmatprep.mubr.f32.mxu1 %v8831_v0  ;;  %874 = vmatprep.mubr.f32.mxu0 %v8831_v0  ;;  %v107_v25 = vsel %vm60_vm0, %v55_v14, 0 }
  0x47   :  { %v9040_v34 = vand.u32 4294901760, %v107_v25 }
  0x49   :  { %238 = vmatmul.mubr.f32.gmra.mrb[10].mxu1 %v237_v38  ;;  %878 = vmatmul.mubr.f32.gmra.mrb[12].mxu0 %v246_v30  ;;  %v302_v30 = vsub.f32 %v9013_v1, %v301_v11  ;;  %v313_v38 = vsub.f32 %v9025_v12, %v312_v32  ;;  %v9052_v45 = vsub.f32 %v107_v25, %v9040_v34 }
  0x4a   :  { %243 = vmatprep.mubr.f32.mxu1 %v8831_v0  ;;  %883 = vmatprep.mubr.f32.mxu0 %v8831_v0 }
  0x4b   :  { %v303_v36 = vand.u32 4294901760, %v302_v30  ;;  %v314_v15 = vand.u32 4294901760, %v313_v38  ;;  %v345_v49 = vand.u32 4294901760, %v9052_v45  ;;  %v8834_v38 = vmov 2131351028  }
  0x4d   :  { %249 = vmatmul.mubr.f32.gmra.mrb[12].mxu1 %v248_v44  ;;  %887 = vmatmul.mubr.f32.gmra.mrb[14].mxu0 %v257_v40  ;;  %v9045_v40 = vsub.f32 %v104_v13, %v9030_v23 }
  0x4e   :  { %254 = vmatprep.mubr.f32.mxu1 %v8831_v0  ;;  %892 = vmatprep.mubr.f32.mxu0 %v8831_v0 }
  0x4f   :  { %v334_v44 = vand.u32 4294901760, %v9045_v40 }
  0x51   :  { %260 = vmatmul.mubr.f32.gmra.mrb[14].mxu1 %v259_v52  ;;  %896 = vmatmul.mubr.f32.gmra.mrb[16].mxu0 %v268_v16  ;;  %v324_v16 = vsub.f32 %v9036_v33, %v323_v39  ;;  %v335_v48 = vsub.f32 %v9045_v40, %v334_v44 }
  0x52   :  { %265 = vmatprep.mubr.f32.mxu1 %v8831_v0  ;;  %901 = vmatprep.mubr.f32.mxu0 %v8831_v0 }
  0x53   :  { %v325_v47 = vand.u32 4294901760, %v324_v16  ;;  %v336_v52 = vand.u32 4294901760, %v335_v48  ;;  %v8836_v16 = vmov 920167782  }
  0x55   :  { %271 = vmatmul.mubr.f32.gmra.mrb[16].mxu1 %v270_v59  ;;  %905 = vmatmul.mubr.f32.gmra.mrb[18].mxu0 %v279_v53  ;;  %v346_v53 = vsub.f32 %v9052_v45, %v345_v49 }
  0x56   :  { %276 = vmatprep.mubr.f32.mxu1 %v8831_v0  ;;  %910 = vmatprep.mubr.f32.mxu0 %v8831_v0 }
  0x57   :  { %v347_v55 = vand.u32 4294901760, %v346_v53  ;;  %v8837_v53 = vmov 1326507024  }
  0x59   :  { %282 = vmatmul.mubr.f32.gmra.mrb[18].mxu1 %v281_v9  ;;  %914 = vmatmul.mubr.f32.gmra.mrb[20].mxu0 %v290_v60 }
  0x5a   :  { %287 = vmatprep.mubr.f32.mxu1 %v8831_v0  ;;  %919 = vmatprep.mubr.f32.mxu0 %v8831_v0 }
  0x5d   :  { %293 = vmatmul.mubr.f32.gmra.mrb[20].mxu1 %v292_v28  ;;  %923 = vmatmul.mubr.f32.gmra.mrb[22].mxu0 %v301_v11  ;;  %v8832_v28 = vmov 683565275  }
  0x5e   :  { %298 = vmatprep.mubr.f32.mxu1 %v8831_v0  ;;  %928 = vmatprep.mubr.f32.mxu0 %v8831_v0 }
  0x61   :  { %304 = vmatmul.mubr.f32.gmra.mrb[22].mxu1 %v303_v36  ;;  %932 = vmatmul.mubr.f32.gmra.mrb[24].mxu0 %v312_v32 }
  0x62   :  { %309 = vmatprep.mubr.f32.mxu1 %v8831_v0  ;;  %937 = vmatprep.mubr.f32.mxu0 %v8831_v0 }
  0x65   :  { %315 = vmatmul.mubr.f32.gmra.mrb[24].mxu1 %v314_v15  ;;  %941 = vmatmul.mubr.f32.gmra.mrb[26].mxu0 %v323_v39 }
  0x66   :  { %320 = vmatprep.mubr.f32.mxu1 %v8831_v0  ;;  %946 = vmatprep.mubr.f32.mxu0 %v8831_v0 }
  0x69   :  { %326 = vmatmul.mubr.f32.gmra.mrb[26].mxu1 %v325_v47  ;;  %950 = vmatmul.mubr.f32.gmra.mrb[28].mxu0 %v334_v44 }
  0x6a   :  { %331 = vmatprep.mubr.f32.mxu1 %v8831_v0  ;;  %955 = vmatprep.mubr.f32.mxu0 %v8831_v0 }
  0x6d   :  { %337 = vmatmul.mubr.f32.gmra.mrb[28].mxu1 %v336_v52  ;;  %959 = vmatmul.mubr.f32.gmra.mrb[30].mxu0 %v345_v49 }
  0x6e   :  { %342 = vmatprep.mubr.f32.mxu1 %v8831_v0  ;;  %1041 = vmatprep.mubr.f32.mxu0 %v8831_v0 }
  0x71   :  { %348 = vmatmul.mubr.f32.gmra.mrb[30].mxu1 %v347_v55  ;;  %1043 = vmatmul.mubr.f32.vlgmr.msra.gmra.mrb[0].mxu0 %v8894_v20 }
  0x72   :  { %438 = vmatprep.mubr.f32.mxu1 %v8831_v0  ;;  %1048 = vmatprep.mubr.f32.mxu0 %v8831_v0 }
  0x73   :  { %8320 = vmatpush1.bf16.msra.mxu0 %v8890_v18 }
  0x75   :  { %440 = vmatmul.mubr.f32.vlgmr.msra.gmra.mrb[0].mxu1 %v8894_v20  ;;  %1050 = vmatmul.mubr.f32.gmra.mrb[2].mxu0 %v8896_v21 }
  0x76   :  { %8308 = vmatpush1.bf16.msra.mxu1 %v8307_v37  ;;  %445 = vmatprep.mubr.f32.mxu1 %v8831_v0 }
  0x77   :  { %1055 = vmatprep.mubr.f32.mxu0 %v8831_v0 }
  0x79   :  { %447 = vmatmul.mubr.f32.gmra.mrb[2].mxu1 %v8896_v21  ;;  %1057 = vmatmul.mubr.f32.gmra.mrb[4].mxu0 %v8911_v29 }
  0x7a   :  { %452 = vmatprep.mubr.f32.mxu1 %v8831_v0  ;;  %1062 = vmatprep.mubr.f32.mxu0 %v8831_v0 }
  0x7d   :  { %454 = vmatmul.mubr.f32.gmra.mrb[4].mxu1 %v8911_v29  ;;  %1064 = vmatmul.mubr.f32.gmra.mrb[6].mxu0 %v8927_v51 }
  0x7e   :  { %459 = vmatprep.mubr.f32.mxu1 %v8831_v0  ;;  %1069 = vmatprep.mubr.f32.mxu0 %v8831_v0 }
  0x81   :  { %461 = vmatmul.mubr.f32.gmra.mrb[6].mxu1 %v8927_v51  ;;  %1071 = vmatmul.mubr.f32.gmra.mrb[8].mxu0 %v8930_v56 }
  0x82   :  { %466 = vmatprep.mubr.f32.mxu1 %v8831_v0  ;;  %1076 = vmatprep.mubr.f32.mxu0 %v8831_v0 }
  0x85   :  { %468 = vmatmul.mubr.f32.gmra.mrb[8].mxu1 %v8930_v56  ;;  %1078 = vmatmul.mubr.f32.gmra.mrb[10].mxu0 %v8940_v62 }
  0x86   :  { %473 = vmatprep.mubr.f32.mxu1 %v8831_v0  ;;  %1083 = vmatprep.mubr.f32.mxu0 %v8831_v0 }
  0x89   :  { %475 = vmatmul.mubr.f32.gmra.mrb[10].mxu1 %v8940_v62  ;;  %1085 = vmatmul.mubr.f32.gmra.mrb[12].mxu0 %v8946_v3 }
  0x8a   :  { %480 = vmatprep.mubr.f32.mxu1 %v8831_v0  ;;  %1090 = vmatprep.mubr.f32.mxu0 %v8831_v0 }
  0x8d   :  { %482 = vmatmul.mubr.f32.gmra.mrb[12].mxu1 %v8946_v3  ;;  %1092 = vmatmul.mubr.f32.gmra.mrb[14].mxu0 %v8956_v10 }
  0x8e   :  { %487 = vmatprep.mubr.f32.mxu1 %v8831_v0  ;;  %1097 = vmatprep.mubr.f32.mxu0 %v8831_v0 }
  0x91   :  { %489 = vmatmul.mubr.f32.gmra.mrb[14].mxu1 %v8956_v10  ;;  %1099 = vmatmul.mubr.f32.gmra.mrb[16].mxu0 %v8966_v24 }
  0x92   :  { %494 = vmatprep.mubr.f32.mxu1 %v8831_v0  ;;  %1104 = vmatprep.mubr.f32.mxu0 %v8831_v0 }
  0x95   :  { %496 = vmatmul.mubr.f32.gmra.mrb[16].mxu1 %v8966_v24  ;;  %1106 = vmatmul.mubr.f32.gmra.mrb[18].mxu0 %v8986_v41 }
  0x96   :  { %501 = vmatprep.mubr.f32.mxu1 %v8831_v0  ;;  %1111 = vmatprep.mubr.f32.mxu0 %v8831_v0 }
  0x99   :  { %503 = vmatmul.mubr.f32.gmra.mrb[18].mxu1 %v8986_v41  ;;  %1113 = vmatmul.mubr.f32.gmra.mrb[20].mxu0 %v8991_v42 }
  0x9a   :  { %508 = vmatprep.mubr.f32.mxu1 %v8831_v0  ;;  %1118 = vmatprep.mubr.f32.mxu0 %v8831_v0 }
  0x9d   :  { %510 = vmatmul.mubr.f32.gmra.mrb[20].mxu1 %v8991_v42  ;;  %1120 = vmatmul.mubr.f32.gmra.mrb[22].mxu0 %v9005_v54 }
  0x9e   :  { %515 = vmatprep.mubr.f32.mxu1 %v8831_v0  ;;  %1125 = vmatprep.mubr.f32.mxu0 %v8831_v0 }
  0xa1   :  { %517 = vmatmul.mubr.f32.gmra.mrb[22].mxu1 %v9005_v54  ;;  %1127 = vmatmul.mubr.f32.gmra.mrb[24].mxu0 %v9015_v2 }
  0xa2   :  { %522 = vmatprep.mubr.f32.mxu1 %v8831_v0  ;;  %1132 = vmatprep.mubr.f32.mxu0 %v8831_v0 }
  0xa5   :  { %524 = vmatmul.mubr.f32.gmra.mrb[24].mxu1 %v9015_v2  ;;  %1134 = vmatmul.mubr.f32.gmra.mrb[26].mxu0 %v9021_v7 }
  0xa6   :  { %529 = vmatprep.mubr.f32.mxu1 %v8831_v0  ;;  %1139 = vmatprep.mubr.f32.mxu0 %v8831_v0 }
  0xa9   :  { %531 = vmatmul.mubr.f32.gmra.mrb[26].mxu1 %v9021_v7  ;;  %1141 = vmatmul.mubr.f32.gmra.mrb[28].mxu0 %v9030_v23 }
  0xaa   :  { %536 = vmatprep.mubr.f32.mxu1 %v8831_v0  ;;  %1146 = vmatprep.mubr.f32.mxu0 %v8831_v0 }
  0xad   :  { %538 = vmatmul.mubr.f32.gmra.mrb[28].mxu1 %v9030_v23  ;;  %1148 = vmatmul.mubr.f32.gmra.mrb[30].mxu0 %v9040_v34 }
  0xae   :  { %543 = vmatprep.mubr.f32.mxu1 %v8831_v0  ;;  %1222 = vmatprep.mubr.f32.mxu0 %v8831_v0 }
  0xb1   :  { %545 = vmatmul.mubr.f32.gmra.mrb[30].mxu1 %v9040_v34  ;;  %1224 = vmatmul.mubr.f32.vlgmr.msra.gmra.mrb[0].mxu0 %v8894_v20 }
  0xb2   :  { %623 = vmatprep.mubr.f32.mxu1 %v8831_v0  ;;  %1229 = vmatprep.mubr.f32.mxu0 %v8831_v0 }
  0xb5   :  { %626 = vmatmul.mubr.f32.vlgmr.msra.gmra.mrb[0].mxu1 %v8905_v26  ;;  %1231 = vmatmul.mubr.f32.gmra.mrb[2].mxu0 %v8896_v21 }
  0xb6   :  { %631 = vmatprep.mubr.f32.mxu1 %v8831_v0  ;;  %1236 = vmatprep.mubr.f32.mxu0 %v8831_v0 }
  0xb9   :  { %634 = vmatmul.mubr.f32.gmra.mrb[2].mxu1 %v8908_v27  ;;  %1238 = vmatmul.mubr.f32.gmra.mrb[4].mxu0 %v8911_v29 }
  0xba   :  { %639 = vmatprep.mubr.f32.mxu1 %v8831_v0  ;;  %1243 = vmatprep.mubr.f32.mxu0 %v8831_v0 }
  0xbd   :  { %642 = vmatmul.mubr.f32.gmra.mrb[4].mxu1 %v8920_v43  ;;  %1245 = vmatmul.mubr.f32.gmra.mrb[6].mxu0 %v8927_v51 }
  0xbe   :  { %647 = vmatprep.mubr.f32.mxu1 %v8831_v0  ;;  %1250 = vmatprep.mubr.f32.mxu0 %v8831_v0 }
  0xc1   :  { %650 = vmatmul.mubr.f32.gmra.mrb[6].mxu1 %v8933_v58  ;;  %1252 = vmatmul.mubr.f32.gmra.mrb[8].mxu0 %v8930_v56 }
  0xc2   :  { %655 = vmatprep.mubr.f32.mxu1 %v8831_v0  ;;  %1257 = vmatprep.mubr.f32.mxu0 %v8831_v0 }
  0xc5   :  { %658 = vmatmul.mubr.f32.gmra.mrb[8].mxu1 %v8938_v61  ;;  %1259 = vmatmul.mubr.f32.gmra.mrb[10].mxu0 %v8940_v62 }
  0xc6   :  { %663 = vmatprep.mubr.f32.mxu1 %v8831_v0  ;;  %1264 = vmatprep.mubr.f32.mxu0 %v8831_v0 }
  0xc9   :  { %666 = vmatmul.mubr.f32.gmra.mrb[10].mxu1 %v8952_v8  ;;  %1266 = vmatmul.mubr.f32.gmra.mrb[12].mxu0 %v8946_v3 }
  0xca   :  { %671 = vmatprep.mubr.f32.mxu1 %v8831_v0  ;;  %1271 = vmatprep.mubr.f32.mxu0 %v8831_v0 }
  0xcd   :  { %674 = vmatmul.mubr.f32.gmra.mrb[12].mxu1 %v8962_v22  ;;  %1273 = vmatmul.mubr.f32.gmra.mrb[14].mxu0 %v8956_v10 }
  0xce   :  { %679 = vmatprep.mubr.f32.mxu1 %v8831_v0  ;;  %1278 = vmatprep.mubr.f32.mxu0 %v8831_v0 }
  0xd1   :  { %682 = vmatmul.mubr.f32.gmra.mrb[14].mxu1 %v8971_v31  ;;  %1280 = vmatmul.mubr.f32.gmra.mrb[16].mxu0 %v8966_v24 }
  0xd2   :  { %687 = vmatprep.mubr.f32.mxu1 %v8831_v0  ;;  %1285 = vmatprep.mubr.f32.mxu0 %v8831_v0 }
  0xd5   :  { %690 = vmatmul.mubr.f32.gmra.mrb[16].mxu1 %v8979_v35  ;;  %1287 = vmatmul.mubr.f32.gmra.mrb[18].mxu0 %v8986_v41 }
  0xd6   :  { %695 = vmatprep.mubr.f32.mxu1 %v8831_v0  ;;  %1292 = vmatprep.mubr.f32.mxu0 %v8831_v0 }
  0xd9   :  { %698 = vmatmul.mubr.f32.gmra.mrb[18].mxu1 %v8995_v46  ;;  %1294 = vmatmul.mubr.f32.gmra.mrb[20].mxu0 %v8991_v42 }
  0xda   :  { %703 = vmatprep.mubr.f32.mxu1 %v8831_v0  ;;  %1299 = vmatprep.mubr.f32.mxu0 %v8831_v0 }
  0xdd   :  { %706 = vmatmul.mubr.f32.gmra.mrb[20].mxu1 %v9002_v50  ;;  %1301 = vmatmul.mubr.f32.gmra.mrb[22].mxu0 %v9005_v54 }
  0xde   :  { %711 = vmatprep.mubr.f32.mxu1 %v8831_v0  ;;  %1306 = vmatprep.mubr.f32.mxu0 %v8831_v0 }
  0xe1   :  { %714 = vmatmul.mubr.f32.gmra.mrb[22].mxu1 %v9013_v1  ;;  %1308 = vmatmul.mubr.f32.gmra.mrb[24].mxu0 %v9015_v2 }
  0xe2   :  { %719 = vmatprep.mubr.f32.mxu1 %v8831_v0  ;;  %1313 = vmatprep.mubr.f32.mxu0 %v8831_v0 }
  0xe5   :  { %722 = vmatmul.mubr.f32.gmra.mrb[24].mxu1 %v9025_v12  ;;  %1315 = vmatmul.mubr.f32.gmra.mrb[26].mxu0 %v9021_v7 }
  0xe6   :  { %727 = vmatprep.mubr.f32.mxu1 %v8831_v0  ;;  %1320 = vmatprep.mubr.f32.mxu0 %v8831_v0 }
  0xe9   :  { %730 = vmatmul.mubr.f32.gmra.mrb[26].mxu1 %v9036_v33  ;;  %1322 = vmatmul.mubr.f32.gmra.mrb[28].mxu0 %v9030_v23 }
  0xea   :  { %735 = vmatprep.mubr.f32.mxu1 %v8831_v0  ;;  %1327 = vmatprep.mubr.f32.mxu0 %v8831_v0 }
  0xed   :  { %738 = vmatmul.mubr.f32.gmra.mrb[28].mxu1 %v9045_v40  ;;  %1329 = vmatmul.mubr.f32.gmra.mrb[30].mxu0 %v9040_v34  ;;  %v8833_v34 = vmov 2475754826   ;;  %v8835_v40 = vmov 2102212464  }
  0xee   :  { %743 = vmatprep.mubr.f32.mxu1 %v8831_v0 }
  0xf1   :  { %746 = vmatmul.mubr.f32.gmra.mrb[30].mxu1 %v9052_v45 }
 0x184   :  { %v1225_v17 = vpop.f32.mrb[0].mxu0 }
 0x185   :  { %v1227_v18 = vpop.f32.mrb[1].mxu0 }
 0x188   :  { %v627_v19 = vpop.f32.mrb[0].mxu1  ;;  %v1232_v20 = vpop.f32.mrb[2].mxu0 }
 0x189   :  { %v9196_v21 = vadd.f32 %v1225_v17, %v627_v19  ;;  %v629_v26 = vpop.f32.mrb[1].mxu1  ;;  %v1234_v27 = vpop.f32.mrb[3].mxu0 }
 0x18a   :  { %v9198_v29 = vadd.f32 %v1227_v18, %v629_v26 }
 0x18b   :  { %v1335_v43 = vand.u32 2147483647, %v9196_v21  ;;  %v1338_v51 = vand.u32 2139095040, %v9196_v21  ;;  %vm1337_vm14 = vcmp.lt.s32.totalorder %v9196_v21, 0 }
 0x18c   :  { %v1439_v56 = vand.u32 2147483647, %v9198_v29  ;;  %v1442_v0 = vand.u32 2139095040, %v9198_v29  ;;  %v635_v58 = vpop.f32.mrb[2].mxu1  ;;  %v9204_v61 = vpop.f32.mrb[4].mxu0 }
 0x18d   :  { %v1339_v62 = vshrl.u32 %v1338_v51, 23  ;;  %v9206_v3 = vadd.f32 %v1232_v20, %v635_v58  ;;  %v637_v8 = vpop.f32.mrb[3].mxu1  ;;  %v1342_v10 = vand.u32 8388607, %v1335_v43  ;;  %v9214_v35 = vpop.f32.mrb[5].mxu0 }
 0x18e   :  { %v1443_v22 = vshrl.u32 %v1442_v0, 23  ;;  %v1446_v24 = vand.u32 8388607, %v1439_v56  ;;  %v9212_v31 = vadd.f32 %v1234_v27, %v637_v8  ;;  %vm9318_vm15 = vcmp.le.f32.partialorder %v1335_v43, 0.7853982 }
 0x18f   :  { %v8041_v37 = vadd.s32 4294967169, %v1339_v62  ;;  %v1546_v42 = vand.u32 2139095040, %v9206_v3  ;;  %v1343_v57 = vor.u32 8388608, %v1342_v10  ;;  %v1543_v23 = vand.u32 2147483647, %v9206_v3 }
 0x190   :  { %v8045_v41 = vadd.s32 4294967169, %v1443_v22  ;;  %v9217_v46 = vpop.f32.mrb[4].mxu1  ;;  %v9219_v50 = vpop.f32.mrb[6].mxu0  ;;  %v1447_v59 = vor.u32 8388608, %v1446_v24 }
 0x191   :  { %v1345_v54 = vadd.s32 1, %v8041_v37  ;;  %v1547_v63 = vshrl.u32 %v1546_v42, 23  ;;  %v9221_v1 = vpop.f32.mrb[5].mxu1  ;;  %v9223_v2 = vpop.f32.mrb[7].mxu0  ;;  %v9227_v12 = vshll.u32 %v1343_v57, 8 }
 0x192   :  { %v1449_v60 = vadd.s32 1, %v8045_v41  ;;  %v9231_v14 = vshll.u32 %v1447_v59, 8 }
 0x193   :  { %vm1346_vm1 = vcmp.gt.s32.totalorder %v1345_v54, 0  ;;  %v8049_v5 = vadd.s32 4294967169, %v1547_v63 }
 0x194   :  { %v1347_v4 = vsel %vm1346_vm1, %v1345_v54, 0  ;;  %vm1450_vm2 = vcmp.gt.s32.totalorder %v1449_v60, 0  ;;  %v9225_v6 = vpop.f32.mrb[6].mxu1  ;;  %vm1441_vm1 = vcmp.lt.s32.totalorder %v9198_v29, 0 }
 0x195   :  { %v1348_v7 = vshrl.u32 %v1347_v4, 5  ;;  %v1349_v9 = vand.u32 31, %v1347_v4  ;;  %v1451_v11 = vsel %vm1450_vm2, %v1449_v60, 0  ;;  %v9235_v33 = vadd.s32 1, %v8049_v5  ;;  %v9250_v8 = vpop.f32.mrb[7].mxu1 }
 0x196   :  { %v9229_v13 = vshrl.u32 %v1451_v11, 5  ;;  %v1453_v32 = vand.u32 31, %v1451_v11 }
 0x197   :  { %v1350_v25 = vsub.s32 32, %v1349_v9  ;;  %v1352_v30 = vshll.u32 %v8832_v28, %v1349_v9  ;;  %v1355_v36 = vshll.u32 %v8833_v34, %v1349_v9  ;;  %v1358_v39 = vshll.u32 %v8834_v38, %v1349_v9 }
 0x198   :  { %v1361_v15 = vshll.u32 %v8835_v40, %v1349_v9  ;;  %v1364_v44 = vshll.u32 %v8836_v16, %v1349_v9  ;;  %vm1367_vm3 = vcmp.lt.s32.totalorder %v1348_v7, 1  ;;  %vm1368_vm4 = vcmp.lt.s32.totalorder %v1348_v7, 2 }
 0x199   :  { %v1353_v45 = vshrl.u32 %v8833_v34, %v1350_v25  ;;  %v1356_v47 = vshrl.u32 %v8834_v38, %v1350_v25  ;;  %v1359_v48 = vshrl.u32 %v8835_v40, %v1350_v25  ;;  %v1351_v49 = vshrl.u32 %v8832_v28, %v1350_v25 }
 0x19a   :  { %v1362_v52 = vshrl.u32 %v8836_v16, %v1350_v25  ;;  %v1365_v55 = vshrl.u32 %v8837_v53, %v1350_v25  ;;  %v1454_v20 = vsub.s32 32, %v1453_v32  ;;  %vm1369_vm5 = vcmp.lt.s32.totalorder %v1348_v7, 3 }
 0x19b   :  { %v1354_v17 = vor.u32 %v1353_v45, %v1352_v30  ;;  %v1357_v18 = vor.u32 %v1356_v47, %v1355_v36  ;;  %v1360_v19 = vor.u32 %v1359_v48, %v1358_v39  ;;  %vm1370_vm6 = vcmp.lt.s32.totalorder %v1348_v7, 4 }
 0x19c   :  { %v1363_v26 = vor.u32 %v1362_v52, %v1361_v15  ;;  %v1366_v27 = vor.u32 %v1365_v55, %v1364_v44  ;;  %v1456_v37 = vshll.u32 %v8832_v28, %v1453_v32  ;;  %v1457_v54 = vshrl.u32 %v8833_v34, %v1454_v20 }
 0x19d   :  { %v1371_v51 = vsel %vm1367_vm3, %v1351_v49, %v1354_v17  ;;  %v1372_v0 = vsel %vm1370_vm6, %v1360_v19, 2102212464  ;;  %v1375_v58 = vsel %vm1367_vm3, %v1354_v17, %v1357_v18  ;;  %v1379_v62 = vsel %vm1367_vm3, %v1357_v18, %v1360_v19 }
 0x19e   :  { %v1373_v10 = vsel %vm1369_vm5, %v1357_v18, %v1372_v0  ;;  %v1376_v22 = vsel %vm1370_vm6, %v1363_v26, 920167782  ;;  %v1380_v24 = vsel %vm1370_vm6, %v1366_v27, 1326507024  ;;  %v1459_v57 = vshll.u32 %v8833_v34, %v1453_v32 }
 0x19f   :  { %v1377_v41 = vsel %vm1369_vm5, %v1360_v19, %v1376_v22  ;;  %v1381_v42 = vsel %vm1369_vm5, %v1363_v26, %v1380_v24  ;;  %v1374_v59 = vsel %vm1368_vm4, %v1371_v51, %v1373_v10  ;;  %v1460_v4 = vshrl.u32 %v8834_v38, %v1454_v20 }
 0x1a0   :  { %v1378_v60 = vsel %vm1368_vm4, %v1375_v58, %v1377_v41  ;;  %v1382_v63 = vsel %vm1368_vm4, %v1379_v62, %v1381_v42  ;;  %v1458_v30 = vor.u32 %v1457_v54, %v1456_v37  ;;  %v1462_v39 = vshll.u32 %v8834_v38, %v1453_v32 }
 0x1a1   :  { %v9260_v5 = vmul.u32.u64.low %v9227_v12, %v1382_v63  ;;  %v9261_v9 = vmul.u32.u64.high %v9227_v12, %v1382_v63, %v9260_v5  ;;  %v9264_v11 = vmul.u32.u64.low %v9227_v12, %v1378_v60  ;;  %v9265_v25 = vmul.u32.u64.high %v9227_v12, %v1378_v60, %v9264_v11 }
 0x1a2   :  { %v1461_v36 = vor.u32 %v1460_v4, %v1459_v57  ;;  %v1463_v15 = vshrl.u32 %v8835_v40, %v1454_v20  ;;  %v1455_v7 = vshrl.u32 %v8832_v28, %v1454_v20  ;;  %v1465_v44 = vshll.u32 %v8835_v40, %v1453_v32 }
 0x1a3   :  { %v1466_v45 = vshrl.u32 %v8836_v16, %v1454_v20  ;;  %v1469_v47 = vshrl.u32 %v8837_v53, %v1454_v20  ;;  %v1390_v48 = vmul.u32 %v9227_v12, %v1374_v59  ;;  %v1468_v52 = vshll.u32 %v8836_v16, %v1453_v32 }
 0x1a4   :  { %v1464_v49 = vor.u32 %v1463_v15, %v1462_v39  ;;  %vm1471_vm7 = vcmp.lt.s32.totalorder %v9229_v13, 1  ;;  %vm1392_vm8 = vc.u32 %v9261_v9, %v9264_v11  ;;  %v1393_v55 = vadd.s32 1, %v9265_v25 }
 0x1a5   :  { %v1467_v17 = vor.u32 %v1466_v45, %v1465_v44  ;;  %vm1472_vm9 = vcmp.lt.s32.totalorder %v9229_v13, 2  ;;  %v1470_v18 = vor.u32 %v1469_v47, %v1468_v52  ;;  %vm1473_vm10 = vcmp.lt.s32.totalorder %v9229_v13, 3 }
 0x1a6   :  { %vm1474_vm11 = vcmp.lt.s32.totalorder %v9229_v13, 4  ;;  %v1479_v19 = vsel %vm1471_vm7, %v1458_v30, %v1461_v36  ;;  %v1394_v12 = vsel %vm1392_vm8, %v1393_v55, %v9265_v25  ;;  %v1483_v26 = vsel %vm1471_vm7, %v1461_v36, %v1464_v49  ;;  %v9325_v55 = vpop.f32.mrb[8].mxu0 }
 0x1a7   :  { %v1476_v20 = vsel %vm1474_vm11, %v1464_v49, 2102212464  ;;  %v1480_v32 = vsel %vm1474_vm11, %v1467_v17, 920167782  ;;  %v1395_v27 = vadd.s32 %v1394_v12, %v1390_v48  ;;  %v1475_v51 = vsel %vm1471_vm7, %v1455_v7, %v1458_v30 }
 0x1a8   :  { %v1481_v0 = vsel %vm1473_vm10, %v1464_v49, %v1480_v32  ;;  %v1484_v58 = vsel %vm1474_vm11, %v1470_v18, 1326507024  ;;  %v1477_v62 = vsel %vm1473_vm10, %v1461_v36, %v1476_v20  ;;  %vm1554_vm12 = vcmp.gt.s32.totalorder %v9235_v33, 0  ;;  %v9333_v20 = vpop.f32.mrb[9].mxu0 }
 0x1a9   :  { %v1482_v10 = vsel %vm1472_vm9, %v1479_v19, %v1481_v0  ;;  %v1485_v22 = vsel %vm1473_vm10, %v1467_v17, %v1484_v58  ;;  %v1396_v24 = vadd.s32 536870912, %v1395_v27  ;;  %v1478_v60 = vsel %vm1472_vm9, %v1475_v51, %v1477_v62  ;;  %v9344_v58 = vpop.f32.mrb[8].mxu1 }
 0x1aa   :  { %v1486_v37 = vsel %vm1472_vm9, %v1483_v26, %v1485_v22  ;;  %v9290_v41 = vmul.u32.u64.low %v9231_v14, %v1482_v10  ;;  %v9291_v42 = vmul.u32.u64.high %v9231_v14, %v1482_v10, %v9290_v41  ;;  %v1555_v63 = vsel %vm1554_vm12, %v9235_v33, 0 }
 0x1ab   :  { %v9294_v54 = vmul.u32.u64.low %v9231_v14, %v1486_v37  ;;  %v9295_v57 = vmul.u32.u64.high %v9231_v14, %v1486_v37, %v9294_v54  ;;  %v1397_v59 = vshrl.u32 %v1396_v24, 30  ;;  %v9302_v4 = vadd.f32 %v9204_v61, %v9217_v46 }
 0x1ac   :  { %v9306_v5 = vadd.f32 %v9214_v35, %v9221_v1  ;;  %v1497_v30 = vadd.s32 1, %v9291_v42  ;;  %v1550_v36 = vand.u32 8388607, %v1543_v23  ;;  %v1494_v39 = vmul.u32 %v9231_v14, %v1478_v60 }
 0x1ad   :  { %v1398_v25 = vshll.u32 %v1397_v59, 30  ;;  %vm1496_vm13 = vc.u32 %v9295_v57, %v9290_v41  ;;  %v1650_v13 = vand.u32 2139095040, %v9212_v31  ;;  %v1557_v46 = vand.u32 31, %v1555_v63 }
 0x1ae   :  { %v1498_v61 = vsel %vm1496_vm13, %v1497_v30, %v9291_v42  ;;  %v1551_v35 = vor.u32 8388608, %v1550_v36  ;;  %v1421_v1 = vsub.s32 4, %v1397_v59  ;;  %v1647_v52 = vand.u32 2147483647, %v9212_v31 }
 0x1af   :  { %v1399_v33 = vsub.s32 %v1395_v27, %v1398_v25  ;;  %v1499_v15 = vadd.s32 %v1498_v61, %v1494_v39  ;;  %v1651_v45 = vshrl.u32 %v1650_v13, 23  ;;  %v1558_v48 = vsub.s32 32, %v1557_v46 }
 0x1b0   :  { %v1391_v17 = vadd.s32 %v9264_v11, %v9261_v9  ;;  %v9329_v19 = vshrl.u32 %v1555_v63, 5  ;;  %v9331_v12 = vshll.u32 %v1551_v35, 8  ;;  %v1422_v43 = vsel %vm1337_vm14, %v1421_v1, %v1397_v59 }
 0x1b1   :  { %v1401_v7 = vsub.s32 0, %v1399_v33  ;;  %v1500_v44 = vadd.s32 536870912, %v1499_v15  ;;  %v9338_v32 = vadd.s32 %v9290_v41, %v9295_v57  ;;  %v8053_v27 = vadd.s32 4294967169, %v1651_v45 }
 0x1b2   :  { %v1560_v0 = vshll.u32 %v8832_v28, %v1557_v46  ;;  %v1561_v9 = vshrl.u32 %v8833_v34, %v1558_v48  ;;  %v1563_v11 = vshll.u32 %v8833_v34, %v1557_v46  ;;  %v1564_v10 = vshrl.u32 %v8834_v38, %v1558_v48 }
 0x1b3   :  { %v8042_v47 = vmin.u32 %v1401_v7, %v1399_v33  ;;  %v9322_v49 = vshrl.u32 %v1500_v44, 30  ;;  %v1567_v22 = vshrl.u32 %v8835_v40, %v1558_v48  ;;  %v1570_v24 = vshrl.u32 %v8836_v16, %v1558_v48 }
 0x1b4   :  { %v9353_v37 = vsel %vm9318_vm15, 0, %v1422_v43  ;;  %v1559_v41 = vshrl.u32 %v8832_v28, %v1558_v48  ;;  %v1573_v42 = vshrl.u32 %v8837_v53, %v1558_v48  ;;  %v1566_v59 = vshll.u32 %v8834_v38, %v1557_v46 }
 0x1b5   :  { %v1403_v18 = vclz %v8042_v47  ;;  %v1502_v26 = vshll.u32 %v9322_v49, 30  ;;  %v1569_v60 = vshll.u32 %v8835_v40, %v1557_v46  ;;  %v1562_v30 = vor.u32 %v1561_v9, %v1560_v0 }
 0x1b6   :  { %v1572_v36 = vshll.u32 %v8836_v16, %v1557_v46  ;;  %v1565_v13 = vor.u32 %v1564_v10, %v1563_v11  ;;  %v1568_v61 = vor.u32 %v1567_v22, %v1566_v59  ;;  %v1525_v47 = vsub.s32 4, %v9322_v49 }
 0x1b7   :  { %v8043_v51 = vadd.s32 4294967294, %v1403_v18  ;;  %v9346_v62 = vsub.s32 %v1499_v15, %v1502_v26  ;;  %v1571_v15 = vor.u32 %v1570_v24, %v1569_v60  ;;  %vm1575_vm2 = vcmp.lt.s32.totalorder %v9329_v19, 1 }
 0x1b8   :  { %v1574_v44 = vor.u32 %v1573_v42, %v1572_v36  ;;  %vm1576_vm3 = vcmp.lt.s32.totalorder %v9329_v19, 2  ;;  %vm1577_vm4 = vcmp.lt.s32.totalorder %v9329_v19, 3  ;;  %vm1578_vm5 = vcmp.lt.s32.totalorder %v9329_v19, 4 }
 0x1b9   :  { %vm8044_vm0 = vcmp.lt.s32.totalorder %v8043_v51, 0  ;;  %v1505_v57 = vsub.s32 0, %v9346_v62  ;;  %v1587_v43 = vsel %vm1575_vm2, %v1565_v13, %v1568_v61  ;;  %vm9374_vm6 = vcmp.le.f32.partialorder %v1439_v56, 0.7853982 }
 0x1ba   :  { %v1406_v54 = vsel %vm8044_vm0, 0, %v8043_v51  ;;  %v1580_v0 = vsel %vm1578_vm5, %v1568_v61, 2102212464  ;;  %v1588_v11 = vsel %vm1578_vm5, %v1574_v44, 1326507024  ;;  %v1579_v22 = vsel %vm1575_vm2, %v1559_v41, %v1562_v30 }
 0x1bb   :  { %v1407_v63 = vsub.s32 32, %v1406_v54  ;;  %v1411_v25 = vsub.s32 4294967266, %v1406_v54  ;;  %v8046_v39 = vmin.u32 %v1505_v57, %v9346_v62  ;;  %v1408_v7 = vshll.u32 %v1399_v33, %v1406_v54 }
 0x1bc   :  { %v1583_v33 = vsel %vm1575_vm2, %v1562_v30, %v1565_v13  ;;  %v1589_v24 = vsel %vm1577_vm4, %v1571_v15, %v1588_v11  ;;  %v1428_v44 = vadd.s32 3, %v9353_v37  ;;  %vm1427_vm0 = vweird.f32 %v9196_v21 }
 0x1bd   :  { %v1409_v35 = vshrl.u32 %v1391_v17, %v1407_v63  ;;  %v1412_v1 = vadd.s32 127, %v1411_v25  ;;  %v1507_v45 = vclz %v8046_v39  ;;  %v1584_v17 = vsel %vm1578_vm5, %v1571_v15, 920167782 }
 0x1be   :  { %v1585_v9 = vsel %vm1577_vm4, %v1568_v61, %v1584_v17  ;;  %v1590_v57 = vsel %vm1576_vm3, %v1587_v43, %v1589_v24  ;;  %v1581_v63 = vsel %vm1577_vm4, %v1565_v13, %v1580_v0  ;;  %v1657_v25 = vadd.s32 1, %v8053_v27 }
 0x1bf   :  { %v1410_v48 = vor.u32 %v1409_v35, %v1408_v7  ;;  %v1413_v46 = vshll.u32 %v1412_v1, 23  ;;  %v8047_v18 = vadd.s32 4294967294, %v1507_v45  ;;  %v1586_v56 = vsel %vm1576_vm3, %v1583_v33, %v1585_v9 }
 0x1c0   :  { %v9392_v30 = vmul.u32.u64.low %v9331_v12, %v1590_v57  ;;  %v9393_v39 = vmul.u32.u64.high %v9331_v12, %v1590_v57, %v9392_v30  ;;  %v9397_v7 = vmul.u32.u64.low %v9331_v12, %v1586_v56  ;;  %v9398_v35 = vmul.u32.u64.high %v9331_v12, %v1586_v56, %v9397_v7 }
 0x1c1   :  { %v1414_v26 = vor.u32 4788187, %v1413_v46  ;;  %v1417_v10 = vcvt.s32.f32 %v1410_v48  ;;  %vm8048_vm7 = vcmp.lt.s32.totalorder %v8047_v18, 0  ;;  %v1526_v27 = vsel %vm1441_vm1, %v1525_v47, %v9322_v49 }
 0x1c2   :  { %v1510_v54 = vsel %vm8048_vm7, 0, %v8047_v18  ;;  %vm1658_vm8 = vcmp.gt.s32.totalorder %v1657_v25, 0  ;;  %v1582_v45 = vsel %vm1576_vm3, %v1579_v22, %v1581_v63  ;;  %v9410_v46 = vand.u32 3, %v9353_v37 }
 0x1c3   :  { %v1415_v42 = vand.u32 2147483647, %v1414_v26  ;;  %v1511_v59 = vsub.s32 32, %v1510_v54  ;;  %v1515_v60 = vsub.s32 4294967266, %v1510_v54  ;;  %v1512_v41 = vshll.u32 %v9346_v62, %v1510_v54 }
 0x1c4   :  { %vm1600_vm9 = vc.u32 %v9393_v39, %v9397_v7  ;;  %v1654_v18 = vand.u32 8388607, %v1647_v52  ;;  %v1528_v19 = vsel %vm9374_vm6, 0, %v1526_v27  ;;  %v1601_v33 = vadd.s32 1, %v9398_v35 }
 0x1c5   :  { %v1418_v36 = vmul.f32 %v1417_v10, %v1415_v42  ;;  %v1513_v61 = vshrl.u32 %v9338_v32, %v1511_v59  ;;  %v1516_v15 = vadd.s32 127, %v1515_v60  ;;  %v1659_v32 = vsel %vm1658_vm8, %v1657_v25, 0 }
 0x1c6   :  { %v9422_v17 = vand.u32 3, %v1428_v44  ;;  %v1598_v37 = vmul.u32 %v9331_v12, %v1582_v45  ;;  %v1661_v43 = vand.u32 31, %v1659_v32  ;;  %v1602_v9 = vsel %vm1600_vm9, %v1601_v33, %v9398_v35 }
 0x1c7   :  { %v1419_v1 = vxor.u32 2147483648, %v1418_v36  ;;  %v1514_v62 = vor.u32 %v1513_v61, %v1512_v41  ;;  %v1517_v13 = vshll.u32 %v1516_v15, 23  ;;  %v1532_v11 = vadd.s32 3, %v1528_v19 }
 0x1c8   :  { %v1603_v14 = vadd.s32 %v1602_v9, %v1598_v37  ;;  %v1655_v10 = vor.u32 8388608, %v1654_v18  ;;  %v1662_v22 = vsub.s32 32, %v1661_v43  ;;  %v9426_v42 = vand.u32 3, %v1528_v19 }
 0x1c9   :  { %v1420_v48 = vsel %vm1337_vm14, %v1419_v1, %v1418_v36  ;;  %v1518_v47 = vor.u32 4788187, %v1517_v13  ;;  %v1521_v0 = vcvt.s32.f32 %v1514_v62  ;;  %v9428_v54 = vshrl.u32 %v1659_v32, 5 }
 0x1ca   :  { %v1423_v49 = vsel %vm9318_vm15, %v9196_v21, %v1420_v48  ;;  %v1664_v56 = vshll.u32 %v8832_v28, %v1661_v43  ;;  %vm1434_vm10 = vcmp.eq.s32.totalorder %v9422_v17, 2  ;;  %vm4793_vm11 = vcmp.eq.s32.totalorder %v9410_v46, 2  ;;  %v9458_v48 = vpop.f32.mrb[9].mxu1 }
 0x1cb   :  { %8625 = vcosq.f32 %v1423_v49  ;;  %v1519_v26 = vand.u32 2147483647, %v1518_v47  ;;  %v1604_v12 = vadd.s32 536870912, %v1603_v14  ;;  %v1665_v57 = vshrl.u32 %v8833_v34, %v1662_v22 }
 0x1cc   :  { %8627 = vsinq.f32 %v1423_v49  ;;  %v1668_v59 = vshrl.u32 %v8834_v38, %v1662_v22  ;;  %v1670_v60 = vshll.u32 %v8834_v38, %v1661_v43  ;;  %vm1431_vm12 = vcmp.eq.s32.totalorder %v9422_v17, 0 }
 0x1cd   :  { %v1522_v24 = vmul.f32 %v1521_v0, %v1519_v26  ;;  %vm4790_vm13 = vcmp.eq.s32.totalorder %v9410_v46, 0  ;;  %v1671_v25 = vshrl.u32 %v8835_v40, %v1662_v22  ;;  %v1673_v36 = vshll.u32 %v8835_v40, %v1661_v43 }
 0x1ce   :  { %v1674_v41 = vshrl.u32 %v8836_v16, %v1662_v22  ;;  %vm1430_vm14 = vcmp.lt.s32.totalorder %v9422_v17, 2  ;;  %vm4789_vm15 = vcmp.lt.s32.totalorder %v9410_v46, 2  ;;  %v9443_v30 = vand.u32 3, %v1532_v11 }
 0x1cf   :  { %v1523_v63 = vxor.u32 2147483648, %v1522_v24  ;;  %v9445_v61 = vshrl.u32 %v1604_v12, 30  ;;  %v1667_v15 = vshll.u32 %v8833_v34, %v1661_v43  ;;  %v9448_v35 = vshll.u32 %v1655_v10, 8 }
 0x1d0   :  { %v1666_v44 = vor.u32 %v1665_v57, %v1664_v56  ;;  %v1672_v27 = vor.u32 %v1671_v25, %v1670_v60  ;;  %v1675_v62 = vor.u32 %v1674_v41, %v1673_v36  ;;  %vm1682_vm2 = vcmp.lt.s32.totalorder %v9428_v54, 4 }
 0x1d1   :  { %v1524_v1 = vsel %vm1441_vm1, %v1523_v63, %v1522_v24  ;;  %v1606_v45 = vshll.u32 %v9445_v61, 30  ;;  %v1669_v32 = vor.u32 %v1668_v59, %v1667_v15  ;;  %v1677_v18 = vshrl.u32 %v8837_v53, %v1662_v22 }
 0x1d2   :  { %v1527_v13 = vsel %vm9374_vm6, %v9198_v29, %v1524_v1  ;;  %vm1679_vm3 = vcmp.lt.s32.totalorder %v9428_v54, 1  ;;  %v1688_v49 = vsel %vm1682_vm2, %v1675_v62, 920167782  ;;  %vm1680_vm1 = vcmp.lt.s32.totalorder %v9428_v54, 2 }
 0x1d3   :  { %8629 = vcosq.f32 %v1527_v13  ;;  %v9464_v19 = vsub.s32 %v1603_v14, %v1606_v45  ;;  %vm1681_vm4 = vcmp.lt.s32.totalorder %v9428_v54, 3  ;;  %v1663_v37 = vshrl.u32 %v8832_v28, %v1662_v22 }
 0x1d4   :  { %8631 = vsinq.f32 %v1527_v13  ;;  %v1676_v26 = vshll.u32 %v8836_v16, %v1661_v43  ;;  %v1684_v0 = vsel %vm1682_vm2, %v1672_v27, 2102212464  ;;  %vm1545_vm5 = vcmp.lt.s32.totalorder %v9206_v3, 0 }
 0x1d5   :  { %v8626_v47 = vpop.eup %8625  ;;  %v1609_v11 = vsub.s32 0, %v9464_v19  ;;  %v1687_v14 = vsel %vm1679_vm3, %v1666_v44, %v1669_v32  ;;  %v1689_v10 = vsel %vm1681_vm4, %v1672_v27, %v1688_v49  ;;  %vm4896_vm6 = vcmp.eq.s32.totalorder %v9426_v42, 2 }
 0x1d6   :  { %v8628_v51 = vpop.eup %8627  ;;  %v1435_v33 = vxor.u32 2147483648, %v8626_v47  ;;  %v1678_v22 = vor.u32 %v1677_v18, %v1676_v26  ;;  %v1683_v56 = vsel %vm1679_vm3, %v1663_v37, %v1666_v44  ;;  %vm4893_vm7 = vcmp.eq.s32.totalorder %v9426_v42, 0 }
 0x1d7   :  { %v1432_v9 = vxor.u32 2147483648, %v8628_v51  ;;  %v8050_v59 = vmin.u32 %v1609_v11, %v9464_v19  ;;  %v1685_v60 = vsel %vm1681_vm4, %v1669_v32, %v1684_v0  ;;  %vm1534_vm8 = vcmp.lt.s32.totalorder %v9443_v30, 2 }
 0x1d8   :  { %v1436_v24 = vsel %vm1434_vm10, %v1435_v33, %v8628_v51  ;;  %v4795_v43 = vsel %vm4793_vm11, %v1435_v33, %v8628_v51  ;;  %vm4892_vm9 = vcmp.lt.s32.totalorder %v9426_v42, 2  ;;  %v1690_v36 = vsel %vm1680_vm1, %v1687_v14, %v1689_v10 }
 0x1d9   :  { %v1433_v12 = vsel %vm1431_vm12, %v8626_v47, %v1432_v9  ;;  %v4792_v57 = vsel %vm4790_vm13, %v8626_v47, %v1432_v9  ;;  %v1754_v41 = vand.u32 2139095040, %v9302_v4  ;;  %vm1531_vm10 = vweird.f32 %v9198_v29 }
 0x1da   :  { %v1437_v63 = vsel %vm1430_vm14, %v1433_v12, %v1436_v24  ;;  %v4796_v25 = vsel %vm4789_vm15, %v4792_v57, %v4795_v43  ;;  %v1611_v17 = vclz %v8050_v59  ;;  %v1691_v46 = vsel %vm1679_vm3, %v1669_v32, %v1672_v27 }
 0x1db   :  { %v1438_v15 = vsel %vm1427_vm0, nan, %v1437_v63  ;;  %v4797_v1 = vsel %vm1427_vm0, nan, %v4796_v25  ;;  %vm1535_vm11 = vcmp.eq.s32.totalorder %v9443_v30, 0  ;;  %v1629_v44 = vsub.s32 4, %v9445_v61 }
 0x1dc   :  { %4663 = vst [vmem:[#allocation7] sm:$0xff] %v1438_v15  ;;  %7991 = vst [vmem:[#allocation7 + $0x10] sm:$0xff] %v4797_v1  ;;  %v1686_v13 = vsel %vm1680_vm1, %v1683_v56, %v1685_v60  ;;  %v1692_v45 = vsel %vm1682_vm2, %v1678_v22, 1326507024  ;;  %v8051_v21 = vadd.s32 4294967294, %v1611_v17  ;;  %vm1538_vm12 = vcmp.eq.s32.totalorder %v9443_v30, 2 }
 0x1dd   :  { %v1693_v18 = vsel %vm1681_vm4, %v1675_v62, %v1692_v45  ;;  %v9518_v49 = vmul.u32.u64.low %v9448_v35, %v1690_v36  ;;  %v9519_v47 = vmul.u32.u64.high %v9448_v35, %v1690_v36, %v9518_v49  ;;  %v8630_v27 = vpop.eup %8629  ;;  %v1599_v32 = vadd.s32 %v9397_v7, %v9393_v39 }
 0x1de   :  { %v1694_v51 = vsel %vm1680_vm1, %v1691_v46, %v1693_v18  ;;  %v1755_v33 = vshrl.u32 %v1754_v41, 23  ;;  %v8632_v37 = vpop.eup %8631  ;;  %v1539_v26 = vxor.u32 2147483648, %v8630_v27  ;;  %vm8052_vm13 = vcmp.lt.s32.totalorder %v8051_v21, 0 }
 0x1df   :  { %v9528_v62 = vmul.u32.u64.low %v9448_v35, %v1694_v51  ;;  %v9529_v0 = vmul.u32.u64.high %v9448_v35, %v1694_v51, %v9528_v62  ;;  %v1536_v9 = vxor.u32 2147483648, %v8632_v37  ;;  %v1614_v11 = vsel %vm8052_vm13, 0, %v8051_v21 }
 0x1e0   :  { %v1630_v14 = vsel %vm1545_vm5, %v1629_v44, %v9445_v61  ;;  %v1702_v10 = vmul.u32 %v9448_v35, %v1686_v13  ;;  %v1540_v39 = vsel %vm1538_vm12, %v1539_v26, %v8632_v37  ;;  %v4898_v7 = vsel %vm4896_vm6, %v1539_v26, %v8632_v37 }
 0x1e1   :  { %v1615_v54 = vsub.s32 32, %v1614_v11  ;;  %v8057_v24 = vadd.s32 4294967169, %v1755_v33  ;;  %v1537_v43 = vsel %vm1535_vm11, %v8630_v27, %v1536_v9  ;;  %v4895_v22 = vsel %vm4893_vm7, %v8630_v27, %v1536_v9 }
 0x1e2   :  { %v1619_v56 = vsub.s32 4294967266, %v1614_v11  ;;  %v1705_v12 = vadd.s32 1, %v9519_v47  ;;  %v1541_v61 = vsel %vm1534_vm8, %v1537_v43, %v1540_v39  ;;  %v4899_v35 = vsel %vm4892_vm9, %v4895_v22, %v4898_v7  ;;  %v9579_v39 = vpop.f32.mrb[10].mxu1 }
 0x1e3   :  { %v1616_v57 = vshll.u32 %v9464_v19, %v1614_v11  ;;  %v1617_v59 = vshrl.u32 %v1599_v32, %v1615_v54  ;;  %v1542_v60 = vsel %vm1531_vm10, nan, %v1541_v61  ;;  %v4900_v63 = vsel %vm1531_vm10, nan, %v4899_v35  ;;  %v9569_v32 = vpop.f32.mrb[10].mxu0 }
 0x1e4   :  { %v1620_v25 = vadd.s32 127, %v1619_v56  ;;  %vm1704_vm14 = vc.u32 %v9529_v0, %v9518_v49  ;;  %4664 = vst [vmem:[#allocation7 + $0x8] sm:$0xff] %v1542_v60  ;;  %7992 = vst [vmem:[#allocation7 + $0x18] sm:$0xff] %v4900_v63  ;;  %vm9555_vm15 = vcmp.le.f32.partialorder %v1543_v23, 0.7853982  ;;  %v1761_v36 = vadd.s32 1, %v8057_v24 }
 0x1e5   :  { %v1706_v30 = vsel %vm1704_vm14, %v1705_v12, %v9519_v47  ;;  %v1751_v19 = vand.u32 2147483647, %v9302_v4  ;;  %v1618_v41 = vor.u32 %v1617_v59, %v1616_v57  ;;  %v1632_v15 = vsel %vm9555_vm15, 0, %v1630_v14  ;;  %v9571_v33 = vpop.f32.mrb[11].mxu0 }
 0x1e6   :  { %v1621_v29 = vshll.u32 %v1620_v25, 23  ;;  %v1707_v1 = vadd.s32 %v1706_v30, %v1702_v10  ;;  %vm1762_vm0 = vcmp.gt.s32.totalorder %v1761_v36, 0  ;;  %v1636_v13 = vadd.s32 3, %v1632_v15 }
 0x1e7   :  { %v1763_v44 = vsel %vm1762_vm0, %v1761_v36, 0  ;;  %v1758_v23 = vand.u32 8388607, %v1751_v19  ;;  %v1625_v18 = vcvt.s32.f32 %v1618_v41  ;;  %v9567_v27 = vadd.f32 %v9219_v50, %v9225_v6 }
 0x1e8   :  { %v1622_v17 = vor.u32 4788187, %v1621_v29  ;;  %v1708_v46 = vadd.s32 536870912, %v1707_v1  ;;  %v1765_v45 = vand.u32 31, %v1763_v44  ;;  %v9573_v26 = vand.u32 3, %v1632_v15 }
 0x1e9   :  { %vm1649_vm2 = vcmp.lt.s32.totalorder %v9212_v31, 0  ;;  %v9576_v9 = vand.u32 3, %v1636_v13  ;;  %v1759_v11 = vor.u32 8388608, %v1758_v23  ;;  %v1764_v14 = vshrl.u32 %v1763_v44, 5 }
 0x1ea   :  { %v1623_v21 = vand.u32 2147483647, %v1622_v17  ;;  %v1709_v47 = vshrl.u32 %v1708_v46, 30  ;;  %v1766_v51 = vsub.s32 32, %v1765_v45  ;;  %v1768_v24 = vshll.u32 %v8832_v28, %v1765_v45 }
 0x1eb   :  { %v1771_v43 = vshll.u32 %v8833_v34, %v1765_v45  ;;  %v1774_v22 = vshll.u32 %v8834_v38, %v1765_v45  ;;  %vm9593_vm3 = vcmp.le.f32.partialorder %v1647_v52, 0.7853982  ;;  %v1777_v59 = vshll.u32 %v8835_v40, %v1765_v45 }
 0x1ec   :  { %v1626_v37 = vmul.f32 %v1625_v18, %v1623_v21  ;;  %v1710_v62 = vshll.u32 %v1709_v47, 30  ;;  %v1769_v10 = vshrl.u32 %v8833_v34, %v1766_v51  ;;  %v1772_v7 = vshrl.u32 %v8834_v38, %v1766_v51 }
 0x1ed   :  { %v1775_v54 = vshrl.u32 %v8835_v40, %v1766_v51  ;;  %v1778_v56 = vshrl.u32 %v8836_v16, %v1766_v51  ;;  %v1733_v57 = vsub.s32 4, %v1709_v47  ;;  %v1780_v25 = vshll.u32 %v8836_v16, %v1765_v45 }
 0x1ee   :  { %v1627_v50 = vxor.u32 2147483648, %v1626_v37  ;;  %v9581_v6 = vsub.s32 %v1707_v1, %v1710_v62  ;;  %v1770_v63 = vor.u32 %v1769_v10, %v1768_v24  ;;  %v1781_v30 = vshrl.u32 %v8837_v53, %v1766_v51 }
 0x1ef   :  { %v1773_v36 = vor.u32 %v1772_v7, %v1771_v43  ;;  %v1776_v41 = vor.u32 %v1775_v54, %v1774_v22  ;;  %v1703_v29 = vadd.s32 %v9518_v49, %v9529_v0  ;;  %v1779_v15 = vor.u32 %v1778_v56, %v1777_v59 }
 0x1f0   :  { %v1628_v12 = vsel %vm1545_vm5, %v1627_v50, %v1626_v37  ;;  %v1713_v35 = vsub.s32 0, %v9581_v6  ;;  %v1782_v1 = vor.u32 %v1781_v30, %v1780_v25  ;;  %v1767_v42 = vshrl.u32 %v8832_v28, %v1766_v51 }
 0x1f1   :  { %v1631_v60 = vsel %vm9555_vm15, %v9206_v3, %v1628_v12  ;;  %v9608_v46 = vshll.u32 %v1759_v11, 8  ;;  %v1858_v44 = vand.u32 2139095040, %v9306_v5  ;;  %v1734_v13 = vsel %vm1649_vm2, %v1733_v57, %v1709_v47 }
 0x1f2   :  { %8633 = vcosq.f32 %v1631_v60  ;;  %v8054_v52 = vmin.u32 %v1713_v35, %v9581_v6  ;;  %vm1783_vm1 = vcmp.lt.s32.totalorder %v1764_v14, 1  ;;  %vm1785_vm4 = vcmp.lt.s32.totalorder %v1764_v14, 3 }
 0x1f3   :  { %8635 = vsinq.f32 %v1631_v60  ;;  %vm1786_vm5 = vcmp.lt.s32.totalorder %v1764_v14, 4  ;;  %vm1642_vm6 = vcmp.eq.s32.totalorder %v9576_v9, 2  ;;  %v1787_v45 = vsel %vm1783_vm1, %v1767_v42, %v1770_v63 }
 0x1f4   :  { %v1715_v17 = vclz %v8054_v52  ;;  %v1788_v49 = vsel %vm1786_vm5, %v1776_v41, 2102212464  ;;  %v1791_v0 = vsel %vm1783_vm1, %v1770_v63, %v1773_v36  ;;  %vm1639_vm7 = vcmp.eq.s32.totalorder %v9576_v9, 0 }
 0x1f5   :  { %vm4996_vm8 = vcmp.eq.s32.totalorder %v9573_v26, 0  ;;  %v1789_v21 = vsel %vm1785_vm4, %v1773_v36, %v1788_v49  ;;  %v1792_v18 = vsel %vm1786_vm5, %v1779_v15, 920167782  ;;  %v1795_v51 = vsel %vm1783_vm1, %v1773_v36, %v1776_v41 }
 0x1f6   :  { %v8055_v23 = vadd.s32 4294967294, %v1715_v17  ;;  %v1796_v37 = vsel %vm1786_vm5, %v1782_v1, 1326507024  ;;  %vm1638_vm9 = vcmp.lt.s32.totalorder %v9576_v9, 2  ;;  %vm4995_vm10 = vcmp.lt.s32.totalorder %v9573_v26, 2 }
 0x1f7   :  { %vm1784_vm12 = vcmp.lt.s32.totalorder %v1764_v14, 2  ;;  %v1793_v47 = vsel %vm1785_vm4, %v1776_v41, %v1792_v18  ;;  %v1797_v62 = vsel %vm1785_vm4, %v1779_v15, %v1796_v37  ;;  %vm1635_vm13 = vweird.f32 %v9206_v3 }
 0x1f8   :  { %vm8056_vm11 = vcmp.lt.s32.totalorder %v8055_v23, 0  ;;  %v1736_v10 = vsel %vm9593_vm3, 0, %v1734_v13  ;;  %v1794_v50 = vsel %vm1784_vm12, %v1791_v0, %v1793_v47  ;;  %v1798_v7 = vsel %vm1784_vm12, %v1795_v51, %v1797_v62 }
 0x1f9   :  { %v1718_v11 = vsel %vm8056_vm11, 0, %v8055_v23  ;;  %v1790_v43 = vsel %vm1784_vm12, %v1787_v45, %v1789_v21  ;;  %v1859_v22 = vshrl.u32 %v1858_v44, 23  ;;  %vm4999_vm14 = vcmp.eq.s32.totalorder %v9573_v26, 2 }
 0x1fa   :  { %v1719_v54 = vsub.s32 32, %v1718_v11  ;;  %v1723_v24 = vsub.s32 4294967266, %v1718_v11  ;;  %v9625_v56 = vmul.u32.u64.low %v9608_v46, %v1798_v7  ;;  %v9626_v12 = vmul.u32.u64.high %v9608_v46, %v1798_v7, %v9625_v56 }
 0x1fb   :  { %v9629_v35 = vmul.u32.u64.low %v9608_v46, %v1794_v50  ;;  %v9630_v14 = vmul.u32.u64.high %v9608_v46, %v1794_v50, %v9629_v35  ;;  %v1720_v59 = vshll.u32 %v9581_v6, %v1718_v11  ;;  %v8061_v25 = vadd.s32 4294967169, %v1859_v22  ;;  %v9661_v22 = vpop.f32.mrb[11].mxu1 }
 0x1fc   :  { %v8634_v57 = vpop.eup %8633  ;;  %v1721_v60 = vshrl.u32 %v1703_v29, %v1719_v54  ;;  %v1724_v63 = vadd.s32 127, %v1723_v24  ;;  %v1740_v36 = vadd.s32 3, %v1736_v10  ;;  %v1855_v41 = vand.u32 2147483647, %v9306_v5 }
 0x1fd   :  { %v8636_v30 = vpop.eup %8635  ;;  %v1643_v52 = vxor.u32 2147483648, %v8634_v57  ;;  %v1865_v42 = vadd.s32 1, %v8061_v25  ;;  %v1806_v6 = vmul.u32 %v9608_v46, %v1790_v43  ;;  %vm1808_vm15 = vc.u32 %v9626_v12, %v9629_v35 }
 0x1fe   :  { %v1640_v15 = vxor.u32 2147483648, %v8636_v30  ;;  %v1722_v1 = vor.u32 %v1721_v60, %v1720_v59  ;;  %v1725_v17 = vshll.u32 %v1724_v63, 23  ;;  %v1809_v18 = vadd.s32 1, %v9630_v14 }
 0x1ff   :  { %v1644_v44 = vsel %vm1642_vm6, %v1643_v52, %v8636_v30  ;;  %v5001_v13 = vsel %vm4999_vm14, %v1643_v52, %v8636_v30  ;;  %vm1866_vm0 = vcmp.gt.s32.totalorder %v1865_v42, 0  ;;  %v1862_v26 = vand.u32 8388607, %v1855_v41 }
 0x200   :  { %v1641_v29 = vsel %vm1639_vm7, %v8634_v57, %v1640_v15  ;;  %v4998_v23 = vsel %vm4996_vm8, %v8634_v57, %v1640_v15  ;;  %v1726_v45 = vor.u32 4788187, %v1725_v17  ;;  %v1729_v49 = vcvt.s32.f32 %v1722_v1 }
 0x201   :  { %v1645_v0 = vsel %vm1638_vm9, %v1641_v29, %v1644_v44  ;;  %v5002_v21 = vsel %vm4995_vm10, %v4998_v23, %v5001_v13  ;;  %v1867_v47 = vsel %vm1866_vm0, %v1865_v42, 0  ;;  %v1810_v62 = vsel %vm1808_vm15, %v1809_v18, %v9630_v14 }
 0x202   :  { %v1646_v46 = vsel %vm1635_vm13, nan, %v1645_v0  ;;  %v5003_v51 = vsel %vm1635_vm13, nan, %v5002_v21  ;;  %v1727_v37 = vand.u32 2147483647, %v1726_v45  ;;  %v1869_v9 = vand.u32 31, %v1867_v47 }
 0x203   :  { %4665 = vst [vmem:[#allocation7 + $0x20] sm:$0xff] %v1646_v46  ;;  %7993 = vst [vmem:[#allocation7 + $0x30] sm:$0xff] %v5003_v51  ;;  %v1811_v50 = vadd.s32 %v1810_v62, %v1806_v6  ;;  %v9657_v24 = vand.u32 3, %v1740_v36  ;;  %v9659_v43 = vand.u32 3, %v1736_v10  ;;  %v9663_v56 = vshrl.u32 %v1867_v47, 5 }
 0x204   :  { %v1730_v11 = vmul.f32 %v1729_v49, %v1727_v37  ;;  %v1870_v7 = vsub.s32 32, %v1869_v9  ;;  %v1872_v52 = vshll.u32 %v8832_v28, %v1869_v9  ;;  %v1881_v36 = vshll.u32 %v8835_v40, %v1869_v9 }
 0x205   :  { %v1812_v3 = vadd.s32 536870912, %v1811_v50  ;;  %v1884_v15 = vshll.u32 %v8836_v16, %v1869_v9  ;;  %v1875_v17 = vshll.u32 %v8833_v34, %v1869_v9  ;;  %v1878_v42 = vshll.u32 %v8834_v38, %v1869_v9 }
 0x206   :  { %v1731_v54 = vxor.u32 2147483648, %v1730_v11  ;;  %v1873_v57 = vshrl.u32 %v8833_v34, %v1870_v7  ;;  %v1876_v14 = vshrl.u32 %v8834_v38, %v1870_v7  ;;  %v1879_v59 = vshrl.u32 %v8835_v40, %v1870_v7 }
 0x207   :  { %v9670_v63 = vshrl.u32 %v1812_v3, 30  ;;  %v1882_v25 = vshrl.u32 %v8836_v16, %v1870_v7  ;;  %v1885_v10 = vshrl.u32 %v8837_v53, %v1870_v7  ;;  %v1962_v6 = vand.u32 2139095040, %v9567_v27 }
 0x208   :  { %v1732_v60 = vsel %vm1649_vm2, %v1731_v54, %v1730_v11  ;;  %v1874_v29 = vor.u32 %v1873_v57, %v1872_v52  ;;  %v1877_v23 = vor.u32 %v1876_v14, %v1875_v17  ;;  %v1880_v45 = vor.u32 %v1879_v59, %v1878_v42 }
 0x209   :  { %v1735_v30 = vsel %vm9593_vm3, %v9212_v31, %v1732_v60  ;;  %v1814_v1 = vshll.u32 %v9670_v63, 30  ;;  %v1883_v44 = vor.u32 %v1882_v25, %v1881_v36  ;;  %v1886_v13 = vor.u32 %v1885_v10, %v1884_v15 }
 0x20a   :  { %8637 = vcosq.f32 %v1735_v30  ;;  %vm5102_vm2 = vcmp.eq.s32.totalorder %v9659_v43, 2  ;;  %v1863_v0 = vor.u32 8388608, %v1862_v26  ;;  %vm1890_vm3 = vcmp.lt.s32.totalorder %v9663_v56, 4 }
 0x20b   :  { %8639 = vsinq.f32 %v1735_v30  ;;  %v9684_v61 = vsub.s32 %v1811_v50, %v1814_v1  ;;  %vm1743_vm1 = vcmp.eq.s32.totalorder %v9657_v24, 0  ;;  %vm5099_vm4 = vcmp.eq.s32.totalorder %v9659_v43, 0 }
 0x20c   :  { %vm1753_vm5 = vcmp.lt.s32.totalorder %v9302_v4, 0  ;;  %vm1887_vm6 = vcmp.lt.s32.totalorder %v9663_v56, 1  ;;  %v1896_v21 = vsel %vm1890_vm3, %v1883_v44, 920167782  ;;  %v1900_v18 = vsel %vm1890_vm3, %v1886_v13, 1326507024 }
 0x20d   :  { %v1817_v49 = vsub.s32 0, %v9684_v61  ;;  %v1963_v46 = vshrl.u32 %v1962_v6, 23  ;;  %vm1742_vm7 = vcmp.lt.s32.totalorder %v9657_v24, 2  ;;  %vm5098_vm8 = vcmp.lt.s32.totalorder %v9659_v43, 2 }
 0x20e   :  { %vm1889_vm9 = vcmp.lt.s32.totalorder %v9663_v56, 3  ;;  %v1895_v37 = vsel %vm1887_vm6, %v1874_v29, %v1877_v23  ;;  %v1899_v47 = vsel %vm1887_vm6, %v1877_v23, %v1880_v45  ;;  %vm1739_vm10 = vweird.f32 %v9212_v31 }
 0x20f   :  { %v8058_v51 = vmin.u32 %v1817_v49, %v9684_v61  ;;  %vm1746_vm11 = vcmp.eq.s32.totalorder %v9657_v24, 2  ;;  %v1807_v62 = vadd.s32 %v9629_v35, %v9626_v12  ;;  %v1897_v9 = vsel %vm1889_vm9, %v1880_v45, %v1896_v21 }
 0x210   :  { %v1901_v11 = vsel %vm1889_vm9, %v1883_v44, %v1900_v18  ;;  %v1871_v26 = vshrl.u32 %v8832_v28, %v1870_v7  ;;  %vm1888_vm12 = vcmp.lt.s32.totalorder %v9663_v56, 2  ;;  %v1903_v54 = vshll.u32 %v1863_v0, 8 }
 0x211   :  { %v1819_v50 = vclz %v8058_v51  ;;  %vm9717_vm13 = vcmp.le.f32.partialorder %v1751_v19, 0.7853982  ;;  %v1892_v12 = vsel %vm1890_vm3, %v1880_v45, 2102212464  ;;  %v1898_v35 = vsel %vm1888_vm12, %v1895_v37, %v1897_v9 }
 0x212   :  { %v1902_v57 = vsel %vm1888_vm12, %v1899_v47, %v1901_v11  ;;  %v8065_v14 = vadd.s32 4294967169, %v1963_v46  ;;  %v1837_v60 = vsub.s32 4, %v9670_v63  ;;  %v1891_v52 = vsel %vm1887_vm6, %v1871_v26, %v1874_v29 }
 0x213   :  { %v8059_v59 = vadd.s32 4294967294, %v1819_v50  ;;  %v9728_v25 = vmul.u32.u64.low %v1903_v54, %v1902_v57  ;;  %v9729_v10 = vmul.u32.u64.high %v1903_v54, %v1902_v57, %v9728_v25  ;;  %v1893_v17 = vsel %vm1889_vm9, %v1877_v23, %v1892_v12 }
 0x214   :  { %v8638_v7 = vpop.eup %8637  ;;  %v9733_v36 = vmul.u32.u64.low %v1903_v54, %v1898_v35  ;;  %v9734_v15 = vmul.u32.u64.high %v1903_v54, %v1898_v35, %v9733_v36  ;;  %v9741_v42 = vadd.f32 %v9223_v2, %v9250_v8  ;;  %v1969_v29 = vadd.s32 1, %v8065_v14 }
 0x215   :  { %v8640_v19 = vpop.eup %8639  ;;  %v1747_v30 = vxor.u32 2147483648, %v8638_v7  ;;  %vm8060_vm14 = vcmp.lt.s32.totalorder %v8059_v59, 0  ;;  %v1838_v2 = vsel %vm1753_vm5, %v1837_v60, %v9670_v63  ;;  %v1894_v18 = vsel %vm1888_vm12, %v1891_v52, %v1893_v17  ;;  %v9785_v17 = vpop.f32.mrb[12].mxu1 }
 0x216   :  { %v1744_v1 = vxor.u32 2147483648, %v8640_v19  ;;  %v1822_v6 = vsel %vm8060_vm14, 0, %v8059_v59  ;;  %vm1912_vm15 = vc.u32 %v9729_v10, %v9733_v36  ;;  %v1913_v63 = vadd.s32 1, %v9734_v15 }
 0x217   :  { %v1748_v44 = vsel %vm1746_vm11, %v1747_v30, %v8640_v19  ;;  %v5104_v13 = vsel %vm5102_vm2, %v1747_v30, %v8640_v19  ;;  %v1823_v0 = vsub.s32 32, %v1822_v6  ;;  %v1827_v21 = vsub.s32 4294967266, %v1822_v6 }
 0x218   :  { %v1745_v45 = vsel %vm1743_vm1, %v8638_v7, %v1744_v1  ;;  %v5101_v49 = vsel %vm5099_vm4, %v8638_v7, %v1744_v1  ;;  %v1824_v24 = vshll.u32 %v9684_v61, %v1822_v6  ;;  %vm1970_vm0 = vcmp.gt.s32.totalorder %v1969_v29, 0  ;;  %v9772_v61 = vpop.f32.mrb[12].mxu0 }
 0x219   :  { %v1749_v8 = vsel %vm1742_vm7, %v1745_v45, %v1748_v44  ;;  %v5105_v23 = vsel %vm5098_vm8, %v5101_v49, %v5104_v13  ;;  %v1825_v37 = vshrl.u32 %v1807_v62, %v1823_v0  ;;  %v1828_v43 = vadd.s32 127, %v1827_v21  ;;  %v9774_v59 = vpop.f32.mrb[13].mxu0 }
 0x21a   :  { %v1750_v46 = vsel %vm1739_vm10, nan, %v1749_v8  ;;  %v5106_v51 = vsel %vm1739_vm10, nan, %v5105_v23  ;;  %v1840_v56 = vsel %vm9717_vm13, 0, %v1838_v2  ;;  %v1910_v47 = vmul.u32 %v1903_v54, %v1894_v18 }
 0x21b   :  { %4666 = vst [vmem:[#allocation7 + $0x28] sm:$0xff] %v1750_v46  ;;  %7994 = vst [vmem:[#allocation7 + $0x38] sm:$0xff] %v5106_v51  ;;  %v1959_v9 = vand.u32 2147483647, %v9567_v27  ;;  %v1971_v31 = vsel %vm1970_vm0, %v1969_v29, 0  ;;  %v1826_v11 = vor.u32 %v1825_v37, %v1824_v24  ;;  %v1829_v62 = vshll.u32 %v1828_v43, 23 }
 0x21c   :  { %v1914_v50 = vsel %vm1912_vm15, %v1913_v63, %v9734_v15  ;;  %v1973_v26 = vand.u32 31, %v1971_v31  ;;  %v1844_v14 = vadd.s32 3, %v1840_v56  ;;  %v9776_v54 = vand.u32 3, %v1840_v56 }
 0x21d   :  { %v1915_v12 = vadd.s32 %v1914_v50, %v1910_v47  ;;  %v1830_v35 = vor.u32 4788187, %v1829_v62  ;;  %v1833_v25 = vcvt.s32.f32 %v1826_v11  ;;  %v1966_v19 = vand.u32 8388607, %v1959_v9 }
 0x21e   :  { %v1974_v57 = vsub.s32 32, %v1973_v26  ;;  %v1985_v6 = vshll.u32 %v8835_v40, %v1973_v26  ;;  %v2066_v29 = vand.u32 2139095040, %v9741_v42  ;;  %v9791_v49 = vshrl.u32 %v1971_v31, 5 }
 0x21f   :  { %v1916_v7 = vadd.s32 536870912, %v1915_v12  ;;  %v1831_v60 = vand.u32 2147483647, %v1830_v35  ;;  %v1976_v0 = vshll.u32 %v8832_v28, %v1973_v26  ;;  %v1979_v2 = vshll.u32 %v8833_v34, %v1973_v26 }
 0x220   :  { %v1977_v52 = vshrl.u32 %v8833_v34, %v1974_v57  ;;  %v1980_v15 = vshrl.u32 %v8834_v38, %v1974_v57  ;;  %v1986_v1 = vshrl.u32 %v8836_v16, %v1974_v57  ;;  %v1983_v13 = vshrl.u32 %v8835_v40, %v1974_v57 }
 0x221   :  { %v9780_v30 = vshrl.u32 %v1916_v7, 30  ;;  %v1834_v44 = vmul.f32 %v1833_v25, %v1831_v60  ;;  %v1982_v23 = vshll.u32 %v8834_v38, %v1973_v26  ;;  %v1989_v18 = vshrl.u32 %v8837_v53, %v1974_v57 }
 0x222   :  { %v1987_v21 = vor.u32 %v1986_v1, %v1985_v6  ;;  %v9797_v46 = vand.u32 3, %v1844_v14  ;;  %v1978_v37 = vor.u32 %v1977_v52, %v1976_v0  ;;  %v1981_v24 = vor.u32 %v1980_v15, %v1979_v2 }
 0x223   :  { %v1918_v45 = vshll.u32 %v9780_v30, 30  ;;  %v1835_v8 = vxor.u32 2147483648, %v1834_v44  ;;  %v1967_v63 = vor.u32 8388608, %v1966_v19  ;;  %v1984_v56 = vor.u32 %v1983_v13, %v1982_v23 }
 0x224   :  { %v1988_v47 = vshll.u32 %v8836_v16, %v1973_v26  ;;  %vm1994_vm2 = vcmp.lt.s32.totalorder %v9791_v49, 4  ;;  %v2067_v62 = vshrl.u32 %v2066_v29, 23  ;;  %vm1991_vm3 = vcmp.lt.s32.totalorder %v9791_v49, 1 }
 0x225   :  { %v9799_v51 = vsub.s32 %v1915_v12, %v1918_v45  ;;  %v1836_v43 = vsel %vm1753_vm5, %v1835_v8, %v1834_v44  ;;  %v2000_v12 = vsel %vm1994_vm2, %v1987_v21, 920167782  ;;  %vm1993_vm1 = vcmp.lt.s32.totalorder %v9791_v49, 3 }
 0x226   :  { %v1839_v31 = vsel %vm9717_vm13, %v9302_v4, %v1836_v43  ;;  %v1990_v50 = vor.u32 %v1989_v18, %v1988_v47  ;;  %v1999_v3 = vsel %vm1991_vm3, %v1978_v37, %v1981_v24  ;;  %vm1857_vm4 = vcmp.lt.s32.totalorder %v9306_v5, 0 }
 0x227   :  { %v1921_v11 = vsub.s32 0, %v9799_v51  ;;  %8641 = vcosq.f32 %v1839_v31  ;;  %v1975_v26 = vshrl.u32 %v8832_v28, %v1974_v57  ;;  %v2001_v14 = vsel %vm1993_vm1, %v1984_v56, %v2000_v12 }
 0x228   :  { %8643 = vsinq.f32 %v1839_v31  ;;  %v9820_v7 = vshll.u32 %v1967_v63, 8  ;;  %vm9824_vm5 = vcmp.le.f32.partialorder %v1855_v41, 0.7853982  ;;  %vm1992_vm6 = vcmp.lt.s32.totalorder %v9791_v49, 2 }
 0x229   :  { %v8062_v35 = vmin.u32 %v1921_v11, %v9799_v51  ;;  %v1996_v19 = vsel %vm1994_vm2, %v1984_v56, 2102212464  ;;  %v2003_v57 = vsel %vm1991_vm3, %v1981_v24, %v1984_v56  ;;  %vm5205_vm7 = vcmp.eq.s32.totalorder %v9776_v54, 2 }
 0x22a   :  { %v1941_v52 = vsub.s32 4, %v9780_v30  ;;  %v2002_v15 = vsel %vm1992_vm6, %v1999_v3, %v2001_v14  ;;  %v2004_v41 = vsel %vm1994_vm2, %v1990_v50, 1326507024  ;;  %v8069_v1 = vadd.s32 4294967169, %v2067_v62 }
 0x22b   :  { %v1923_v25 = vclz %v8062_v35  ;;  %vm1847_vm8 = vcmp.eq.s32.totalorder %v9797_v46, 0  ;;  %vm5202_vm9 = vcmp.eq.s32.totalorder %v9776_v54, 0  ;;  %v2005_v13 = vsel %vm1993_vm1, %v1987_v21, %v2004_v41 }
 0x22c   :  { %v9844_v6 = vmul.u32.u64.low %v9820_v7, %v2002_v15  ;;  %v9845_v29 = vmul.u32.u64.high %v9820_v7, %v2002_v15, %v9844_v6  ;;  %vm1846_vm10 = vcmp.lt.s32.totalorder %v9797_v46, 2  ;;  %vm5201_vm11 = vcmp.lt.s32.totalorder %v9776_v54, 2  ;;  %v9904_v54 = vpop.f32.mrb[13].mxu1 }
 0x22d   :  { %v8063_v44 = vadd.s32 4294967294, %v1923_v25  ;;  %v1995_v45 = vsel %vm1991_vm3, %v1975_v26, %v1978_v37  ;;  %v1997_v0 = vsel %vm1993_vm1, %v1981_v24, %v1996_v19  ;;  %v2006_v2 = vsel %vm1992_vm6, %v2003_v57, %v2005_v13 }
 0x22e   :  { %v2073_v8 = vadd.s32 1, %v8069_v1  ;;  %vm1843_vm12 = vweird.f32 %v9302_v4  ;;  %v9858_v23 = vmul.u32.u64.low %v9820_v7, %v2006_v2  ;;  %v9859_v21 = vmul.u32.u64.high %v9820_v7, %v2006_v2, %v9858_v23 }
 0x22f   :  { %vm8064_vm13 = vcmp.lt.s32.totalorder %v8063_v44, 0  ;;  %v9863_v18 = vadd.f32 %v9325_v55, %v9344_v58  ;;  %vm1850_vm14 = vcmp.eq.s32.totalorder %v9797_v46, 2  ;;  %v9868_v24 = vadd.f32 %v9333_v20, %v9458_v48 }
 0x230   :  { %v1926_v37 = vsel %vm8064_vm13, 0, %v8063_v44  ;;  %vm2074_vm15 = vcmp.gt.s32.totalorder %v2073_v8, 0  ;;  %v1911_v43 = vadd.s32 %v9733_v36, %v9729_v10  ;;  %v1942_v47 = vsel %vm1857_vm4, %v1941_v52, %v9780_v30 }
 0x231   :  { %v1927_v63 = vsub.s32 32, %v1926_v37  ;;  %v1931_v56 = vsub.s32 4294967266, %v1926_v37  ;;  %v8642_v31 = vpop.eup %8641  ;;  %v1998_v55 = vsel %vm1992_vm6, %v1995_v45, %v1997_v0  ;;  %v2017_v58 = vadd.s32 1, %v9845_v29 }
 0x232   :  { %v2063_v11 = vand.u32 2147483647, %v9741_v42  ;;  %v2075_v62 = vsel %vm2074_vm15, %v2073_v8, 0  ;;  %v8644_v20 = vpop.eup %8643  ;;  %v1851_v48 = vxor.u32 2147483648, %v8642_v31  ;;  %v1928_v50 = vshll.u32 %v9799_v51, %v1926_v37 }
 0x233   :  { %v1929_v10 = vshrl.u32 %v1911_v43, %v1927_v63  ;;  %v1932_v36 = vadd.s32 127, %v1931_v56  ;;  %v1848_v12 = vxor.u32 2147483648, %v8644_v20  ;;  %v1944_v35 = vsel %vm9824_vm5, 0, %v1942_v47 }
 0x234   :  { %vm2016_vm0 = vc.u32 %v9859_v21, %v9844_v6  ;;  %v2077_v30 = vand.u32 31, %v2075_v62  ;;  %v1852_v49 = vsel %vm1850_vm14, %v1851_v48, %v8644_v20  ;;  %v5207_v3 = vsel %vm5205_vm7, %v1851_v48, %v8644_v20 }
 0x235   :  { %v1930_v26 = vor.u32 %v1929_v10, %v1928_v50  ;;  %v1933_v14 = vshll.u32 %v1932_v36, 23  ;;  %v1849_v51 = vsel %vm1847_vm8, %v8642_v31, %v1848_v12  ;;  %v5204_v25 = vsel %vm5202_vm9, %v8642_v31, %v1848_v12 }
 0x236   :  { %v2014_v19 = vmul.u32 %v9820_v7, %v1998_v55  ;;  %v2018_v57 = vsel %vm2016_vm0, %v2017_v58, %v9845_v29  ;;  %v1853_v52 = vsel %vm1846_vm10, %v1849_v51, %v1852_v49  ;;  %v5208_v15 = vsel %vm5201_vm11, %v5204_v25, %v5207_v3 }
 0x237   :  { %v1934_v41 = vor.u32 4788187, %v1933_v14  ;;  %v2078_v1 = vsub.s32 32, %v2077_v30  ;;  %v1854_v44 = vsel %vm1843_vm12, nan, %v1853_v52  ;;  %v5209_v13 = vsel %vm1843_vm12, nan, %v5208_v15 }
 0x238   :  { %v2019_v45 = vadd.s32 %v2018_v57, %v2014_v19  ;;  %4667 = vst [vmem:[#allocation7 + $0x40] sm:$0xff] %v1854_v44  ;;  %7995 = vst [vmem:[#allocation7 + $0x50] sm:$0xff] %v5209_v13  ;;  %v1937_v0 = vcvt.s32.f32 %v1930_v26  ;;  %v1948_v29 = vadd.s32 3, %v1944_v35  ;;  %v2070_v46 = vand.u32 8388607, %v2063_v11 }
 0x239   :  { %v1935_v7 = vand.u32 2147483647, %v1934_v41  ;;  %v2076_v23 = vshrl.u32 %v2075_v62, 5  ;;  %v2087_v37 = vshrl.u32 %v8835_v40, %v2078_v1  ;;  %v2090_v43 = vshrl.u32 %v8836_v16, %v2078_v1 }
 0x23a   :  { %v2020_v2 = vadd.s32 536870912, %v2019_v45  ;;  %v2081_v63 = vshrl.u32 %v8833_v34, %v2078_v1  ;;  %v2084_v56 = vshrl.u32 %v8834_v38, %v2078_v1  ;;  %v2086_v47 = vshll.u32 %v8834_v38, %v2077_v30 }
 0x23b   :  { %v1938_v8 = vmul.f32 %v1937_v0, %v1935_v7  ;;  %v2089_v55 = vshll.u32 %v8835_v40, %v2077_v30  ;;  %v2092_v58 = vshll.u32 %v8836_v16, %v2077_v30  ;;  %v2093_v20 = vshrl.u32 %v8837_v53, %v2078_v1 }
 0x23c   :  { %v2021_v4 = vshrl.u32 %v2020_v2, 30  ;;  %v9914_v48 = vand.u32 3, %v1944_v35  ;;  %v2080_v50 = vshll.u32 %v8832_v28, %v2077_v30  ;;  %v2083_v10 = vshll.u32 %v8833_v34, %v2077_v30 }
 0x23d   :  { %v1939_v31 = vxor.u32 2147483648, %v1938_v8  ;;  %vm1961_vm2 = vcmp.lt.s32.totalorder %v9567_v27, 0  ;;  %v2088_v12 = vor.u32 %v2087_v37, %v2086_v47  ;;  %v2091_v49 = vor.u32 %v2090_v43, %v2089_v55 }
 0x23e   :  { %v2022_v62 = vshll.u32 %v2021_v4, 30  ;;  %v2094_v3 = vor.u32 %v2093_v20, %v2092_v58  ;;  %v2082_v35 = vor.u32 %v2081_v63, %v2080_v50  ;;  %v2085_v51 = vor.u32 %v2084_v56, %v2083_v10 }
 0x23f   :  { %v1940_v36 = vsel %vm1857_vm4, %v1939_v31, %v1938_v8  ;;  %v9926_v25 = vand.u32 3, %v1948_v29  ;;  %v2071_v30 = vor.u32 8388608, %v2070_v46  ;;  %vm2095_vm3 = vcmp.lt.s32.totalorder %v2076_v23, 1 }
 0x240   :  { %v1943_v26 = vsel %vm9824_vm5, %v9306_v5, %v1940_v36  ;;  %v9924_v14 = vsub.s32 %v2019_v45, %v2022_v62  ;;  %vm9930_vm1 = vcmp.le.f32.partialorder %v1959_v9, 0.7853982  ;;  %v2045_v60 = vsub.s32 4, %v2021_v4 }
 0x241   :  { %8645 = vcosq.f32 %v1943_v26  ;;  %vm2098_vm4 = vcmp.lt.s32.totalorder %v2076_v23, 4  ;;  %v2079_v52 = vshrl.u32 %v8832_v28, %v2078_v1  ;;  %vm2097_vm5 = vcmp.lt.s32.totalorder %v2076_v23, 3 }
 0x242   :  { %8647 = vsinq.f32 %v1943_v26  ;;  %v2025_v57 = vsub.s32 0, %v9924_v14  ;;  %v2100_v15 = vsel %vm2098_vm4, %v2088_v12, 2102212464  ;;  %v2104_v41 = vsel %vm2098_vm4, %v2091_v49, 920167782 }
 0x243   :  { %v2108_v44 = vsel %vm2098_vm4, %v2094_v3, 1326507024  ;;  %v2103_v45 = vsel %vm2095_vm3, %v2082_v35, %v2085_v51  ;;  %v2107_v7 = vsel %vm2095_vm3, %v2085_v51, %v2088_v12  ;;  %vm5308_vm6 = vcmp.eq.s32.totalorder %v9914_v48, 2 }
 0x244   :  { %v8066_v13 = vmin.u32 %v2025_v57, %v9924_v14  ;;  %v2105_v9 = vsel %vm2097_vm5, %v2088_v12, %v2104_v41  ;;  %v2109_v0 = vsel %vm2097_vm5, %v2091_v49, %v2108_v44  ;;  %v2111_v29 = vshll.u32 %v2071_v30, 8 }
 0x245   :  { %vm5305_vm7 = vcmp.eq.s32.totalorder %v9914_v48, 0  ;;  %vm2096_vm8 = vcmp.lt.s32.totalorder %v2076_v23, 2  ;;  %v2099_v1 = vsel %vm2095_vm3, %v2079_v52, %v2082_v35  ;;  %v2101_v46 = vsel %vm2097_vm5, %v2085_v51, %v2100_v15 }
 0x246   :  { %v2027_v2 = vclz %v8066_v13  ;;  %vm1950_vm9 = vcmp.lt.s32.totalorder %v9926_v25, 2  ;;  %vm5304_vm10 = vcmp.lt.s32.totalorder %v9914_v48, 2  ;;  %v2106_v8 = vsel %vm2096_vm8, %v2103_v45, %v2105_v9 }
 0x247   :  { %v2110_v37 = vsel %vm2096_vm8, %v2107_v7, %v2109_v0  ;;  %v2170_v43 = vand.u32 2139095040, %v9863_v18  ;;  %vm1947_vm11 = vweird.f32 %v9306_v5  ;;  %v2046_v56 = vsel %vm1961_vm2, %v2045_v60, %v2021_v4 }
 0x248   :  { %v8067_v63 = vadd.s32 4294967294, %v2027_v2  ;;  %v9948_v47 = vmul.u32.u64.low %v2111_v29, %v2110_v37  ;;  %v9949_v31 = vmul.u32.u64.high %v2111_v29, %v2110_v37, %v9948_v47  ;;  %v2102_v23 = vsel %vm2096_vm8, %v2099_v1, %v2101_v46 }
 0x249   :  { %v9951_v55 = vmul.u32.u64.low %v2111_v29, %v2106_v8  ;;  %v9952_v58 = vmul.u32.u64.high %v2111_v29, %v2106_v8, %v9951_v55  ;;  %v2171_v20 = vshrl.u32 %v2170_v43, 23  ;;  %vm1951_vm12 = vcmp.eq.s32.totalorder %v9926_v25, 0 }
 0x24a   :  { %vm1954_vm13 = vcmp.eq.s32.totalorder %v9926_v25, 2  ;;  %vm8068_vm14 = vcmp.lt.s32.totalorder %v8067_v63, 0  ;;  %v2167_v62 = vand.u32 2147483647, %v9863_v18  ;;  %v2015_v4 = vadd.s32 %v9844_v6, %v9859_v21 }
 0x24b   :  { %v8646_v50 = vpop.eup %8645  ;;  %v2030_v10 = vsel %vm8068_vm14, 0, %v8067_v63  ;;  %v2048_v36 = vsel %vm9930_vm1, 0, %v2046_v56  ;;  %v8073_v12 = vadd.s32 4294967169, %v2171_v20  ;;  %v2118_v51 = vmul.u32 %v2111_v29, %v2102_v23 }
 0x24c   :  { %v8648_v49 = vpop.eup %8647  ;;  %v1955_v3 = vxor.u32 2147483648, %v8646_v50  ;;  %v2031_v26 = vsub.s32 32, %v2030_v10  ;;  %v2035_v35 = vsub.s32 4294967266, %v2030_v10  ;;  %v2032_v57 = vshll.u32 %v9924_v14, %v2030_v10 }
 0x24d   :  { %v1952_v30 = vxor.u32 2147483648, %v8648_v49  ;;  %vm2120_vm15 = vc.u32 %v9949_v31, %v9951_v55  ;;  %v2121_v60 = vadd.s32 1, %v9952_v58  ;;  %v2177_v13 = vadd.s32 1, %v8073_v12 }
 0x24e   :  { %v1956_v6 = vsel %vm1954_vm13, %v1955_v3, %v8648_v49  ;;  %v5310_v21 = vsel %vm5308_vm6, %v1955_v3, %v8648_v49  ;;  %v2033_v52 = vshrl.u32 %v2015_v4, %v2031_v26  ;;  %v2036_v15 = vadd.s32 127, %v2035_v35 }
 0x24f   :  { %v1953_v41 = vsel %vm1951_vm12, %v8646_v50, %v1952_v30  ;;  %v5307_v44 = vsel %vm5305_vm7, %v8646_v50, %v1952_v30  ;;  %v2122_v14 = vsel %vm2120_vm15, %v2121_v60, %v9952_v58  ;;  %vm2178_vm0 = vcmp.gt.s32.totalorder %v2177_v13, 0  ;;  %v9991_v58 = vpop.f32.mrb[14].mxu0 }
 0x250   :  { %v1957_v45 = vsel %vm1950_vm9, %v1953_v41, %v1956_v6  ;;  %v5311_v7 = vsel %vm5304_vm10, %v5307_v44, %v5310_v21  ;;  %v2034_v9 = vor.u32 %v2033_v52, %v2032_v57  ;;  %v2037_v0 = vshll.u32 %v2036_v15, 23  ;;  %v9995_v4 = vpop.f32.mrb[15].mxu0 }
 0x251   :  { %v1958_v29 = vsel %vm1947_vm11, nan, %v1957_v45  ;;  %v5312_v2 = vsel %vm1947_vm11, nan, %v5311_v7  ;;  %v2123_v1 = vadd.s32 %v2122_v14, %v2118_v51  ;;  %v2179_v8 = vsel %vm2178_vm0, %v2177_v13, 0  ;;  %v10004_v51 = vpop.f32.mrb[14].mxu1 }
 0x252   :  { %4668 = vst [vmem:[#allocation7 + $0x48] sm:$0xff] %v1958_v29  ;;  %7996 = vst [vmem:[#allocation7 + $0x58] sm:$0xff] %v5312_v2  ;;  %v2038_v46 = vor.u32 4788187, %v2037_v0  ;;  %v2052_v37 = vadd.s32 3, %v2048_v36  ;;  %v2181_v43 = vand.u32 31, %v2179_v8  ;;  %v2041_v56 = vcvt.s32.f32 %v2034_v9 }
 0x253   :  { %v2124_v25 = vadd.s32 536870912, %v2123_v1  ;;  %v2174_v48 = vand.u32 8388607, %v2167_v62  ;;  %v9987_v47 = vadd.f32 %v9569_v32, %v9579_v39  ;;  %v9993_v50 = vand.u32 3, %v2048_v36 }
 0x254   :  { %v2039_v63 = vand.u32 2147483647, %v2038_v46  ;;  %v2182_v23 = vsub.s32 32, %v2181_v43  ;;  %v9997_v10 = vand.u32 3, %v2052_v37  ;;  %v2271_v3 = vand.u32 2147483647, %v9868_v24 }
 0x255   :  { %v9989_v5 = vshrl.u32 %v2124_v25, 30  ;;  %v2175_v49 = vor.u32 8388608, %v2174_v48  ;;  %v2274_v35 = vand.u32 2139095040, %v9868_v24  ;;  %v10008_v30 = vshrl.u32 %v2179_v8, 5 }
 0x256   :  { %v2042_v20 = vmul.f32 %v2041_v56, %v2039_v63  ;;  %v2185_v32 = vshrl.u32 %v8833_v34, %v2182_v23  ;;  %v2188_v39 = vshrl.u32 %v8834_v38, %v2182_v23  ;;  %v2191_v57 = vshrl.u32 %v8835_v40, %v2182_v23 }
 0x257   :  { %v2126_v12 = vshll.u32 %v9989_v5, 30  ;;  %v2194_v60 = vshrl.u32 %v8836_v16, %v2182_v23  ;;  %vm2065_vm3 = vcmp.lt.s32.totalorder %v9741_v42, 0  ;;  %v2184_v21 = vshll.u32 %v8832_v28, %v2181_v43 }
 0x258   :  { %v2043_v26 = vxor.u32 2147483648, %v2042_v20  ;;  %v2187_v52 = vshll.u32 %v8833_v34, %v2181_v43  ;;  %v2197_v15 = vshrl.u32 %v8837_v53, %v2182_v23  ;;  %v2190_v14 = vshll.u32 %v8834_v38, %v2181_v43 }
 0x259   :  { %v10006_v36 = vsub.s32 %v2123_v1, %v2126_v12  ;;  %v2193_v13 = vshll.u32 %v8835_v40, %v2181_v43  ;;  %v2186_v45 = vor.u32 %v2185_v32, %v2184_v21  ;;  %v2196_v9 = vshll.u32 %v8836_v16, %v2181_v43 }
 0x25a   :  { %v2044_v6 = vsel %vm1961_vm2, %v2043_v26, %v2042_v20  ;;  %v2189_v7 = vor.u32 %v2188_v39, %v2187_v52  ;;  %vm10027_vm2 = vcmp.le.f32.partialorder %v2063_v11, 0.7853982  ;;  %v2192_v29 = vor.u32 %v2191_v57, %v2190_v14 }
 0x25b   :  { %v2047_v41 = vsel %vm9930_vm1, %v9567_v27, %v2044_v6  ;;  %v2129_v44 = vsub.s32 0, %v10006_v36  ;;  %v2195_v2 = vor.u32 %v2194_v60, %v2193_v13  ;;  %v2119_v1 = vadd.s32 %v9951_v55, %v9949_v31 }
 0x25c   :  { %8649 = vcosq.f32 %v2047_v41  ;;  %v2198_v46 = vor.u32 %v2197_v15, %v2196_v9  ;;  %v10034_v8 = vshll.u32 %v2175_v49, 8  ;;  %v2275_v37 = vshrl.u32 %v2274_v35, 23 }
 0x25d   :  { %8651 = vsinq.f32 %v2047_v41  ;;  %v8070_v19 = vmin.u32 %v2129_v44, %v10006_v36  ;;  %v2149_v48 = vsub.s32 4, %v9989_v5  ;;  %vm2199_vm1 = vcmp.lt.s32.totalorder %v10008_v30, 1 }
 0x25e   :  { %v10040_v11 = vand.u32 8388607, %v2271_v3  ;;  %vm2058_vm4 = vcmp.eq.s32.totalorder %v9997_v10, 2  ;;  %vm5411_vm5 = vcmp.eq.s32.totalorder %v9993_v50, 2  ;;  %v2183_v43 = vshrl.u32 %v8832_v28, %v2182_v23 }
 0x25f   :  { %v2131_v25 = vclz %v8070_v19  ;;  %vm2200_vm6 = vcmp.lt.s32.totalorder %v10008_v30, 2  ;;  %vm2202_vm7 = vcmp.lt.s32.totalorder %v10008_v30, 4  ;;  %v2207_v31 = vsel %vm2199_vm1, %v2186_v45, %v2189_v7 }
 0x260   :  { %vm2055_vm8 = vcmp.eq.s32.totalorder %v9997_v10, 0  ;;  %vm5408_vm9 = vcmp.eq.s32.totalorder %v9993_v50, 0  ;;  %vm2201_vm10 = vcmp.lt.s32.totalorder %v10008_v30, 3  ;;  %v2208_v63 = vsel %vm2202_vm7, %v2195_v2, 920167782 }
 0x261   :  { %v8071_v55 = vadd.s32 4294967294, %v2131_v25  ;;  %v2211_v56 = vsel %vm2199_vm1, %v2189_v7, %v2192_v29  ;;  %vm2054_vm11 = vcmp.lt.s32.totalorder %v9997_v10, 2  ;;  %vm5407_vm12 = vcmp.lt.s32.totalorder %v9993_v50, 2 }
 0x262   :  { %v2204_v23 = vsel %vm2202_vm7, %v2192_v29, 2102212464  ;;  %v2209_v20 = vsel %vm2201_vm10, %v2192_v29, %v2208_v63  ;;  %v2212_v12 = vsel %vm2202_vm7, %v2198_v46, 1326507024  ;;  %v8077_v49 = vadd.s32 4294967169, %v2275_v37 }
 0x263   :  { %vm2051_vm13 = vweird.f32 %v9567_v27  ;;  %vm8072_vm14 = vcmp.lt.s32.totalorder %v8071_v55, 0  ;;  %v2150_v26 = vsel %vm2065_vm3, %v2149_v48, %v9989_v5  ;;  %v2210_v32 = vsel %vm2200_vm6, %v2207_v31, %v2209_v20 }
 0x264   :  { %v2213_v39 = vsel %vm2201_vm10, %v2195_v2, %v2212_v12  ;;  %v2134_v35 = vsel %vm8072_vm14, 0, %v8071_v55  ;;  %v10069_v60 = vmul.u32.u64.low %v10034_v8, %v2210_v32  ;;  %v10070_v6 = vmul.u32.u64.high %v10034_v8, %v2210_v32, %v10069_v60 }
 0x265   :  { %v2214_v57 = vsel %vm2200_vm6, %v2211_v56, %v2213_v39  ;;  %v2135_v21 = vsub.s32 32, %v2134_v35  ;;  %v2139_v52 = vsub.s32 4294967266, %v2134_v35  ;;  %v2203_v5 = vsel %vm2199_vm1, %v2183_v43, %v2186_v45 }
 0x266   :  { %v2205_v15 = vsel %vm2201_vm10, %v2189_v7, %v2204_v23  ;;  %v8650_v41 = vpop.eup %8649  ;;  %v2152_v44 = vsel %vm10027_vm2, 0, %v2150_v26  ;;  %v10080_v14 = vmul.u32.u64.low %v10034_v8, %v2214_v57  ;;  %v10081_v13 = vmul.u32.u64.high %v10034_v8, %v2214_v57, %v10080_v14 }
 0x267   :  { %v2281_v9 = vadd.s32 1, %v8077_v49  ;;  %v8652_v19 = vpop.eup %8651  ;;  %v2059_v29 = vxor.u32 2147483648, %v8650_v41  ;;  %v2136_v2 = vshll.u32 %v10006_v36, %v2134_v35  ;;  %v2137_v46 = vshrl.u32 %v2119_v1, %v2135_v21 }
 0x268   :  { %v2140_v37 = vadd.s32 127, %v2139_v52  ;;  %v2056_v25 = vxor.u32 2147483648, %v8652_v19  ;;  %v2206_v45 = vsel %vm2200_vm6, %v2203_v5, %v2205_v15  ;;  %v2225_v7 = vadd.s32 1, %v10070_v6 }
 0x269   :  { %vm2282_vm15 = vcmp.gt.s32.totalorder %v2281_v9, 0  ;;  %v2060_v48 = vsel %vm2058_vm4, %v2059_v29, %v8652_v19  ;;  %v5413_v43 = vsel %vm5411_vm5, %v2059_v29, %v8652_v19  ;;  %v2138_v31 = vor.u32 %v2137_v46, %v2136_v2 }
 0x26a   :  { %v2141_v55 = vshll.u32 %v2140_v37, 23  ;;  %v2057_v36 = vsel %vm2055_vm8, %v8650_v41, %v2056_v25  ;;  %v5410_v1 = vsel %vm5408_vm9, %v8650_v41, %v2056_v25  ;;  %v2156_v63 = vadd.s32 3, %v2152_v44 }
 0x26b   :  { %vm2224_vm0 = vc.u32 %v10081_v13, %v10069_v60  ;;  %v2061_v30 = vsel %vm2054_vm11, %v2057_v36, %v2060_v48  ;;  %v5414_v56 = vsel %vm5407_vm12, %v5410_v1, %v5413_v43  ;;  %v2222_v20 = vmul.u32 %v10034_v8, %v2206_v45  ;;  %v10108_v8 = vpop.f32.mrb[15].mxu1 }
 0x26c   :  { %v2142_v23 = vor.u32 4788187, %v2141_v55  ;;  %v2062_v12 = vsel %vm2051_vm13, nan, %v2061_v30  ;;  %v5415_v49 = vsel %vm2051_vm13, nan, %v5414_v56  ;;  %v2226_v26 = vsel %vm2224_vm0, %v2225_v7, %v10070_v6 }
 0x26d   :  { %v2283_v32 = vsel %vm2282_vm15, %v2281_v9, 0  ;;  %4669 = vst [vmem:[#allocation7 + $0x60] sm:$0xff] %v2062_v12  ;;  %7997 = vst [vmem:[#allocation7 + $0x70] sm:$0xff] %v5415_v49  ;;  %v2145_v39 = vcvt.s32.f32 %v2138_v31  ;;  %v2227_v35 = vadd.s32 %v2226_v26, %v2222_v20  ;;  %v10110_v5 = vand.u32 3, %v2156_v63 }
 0x26e   :  { %v2143_v10 = vand.u32 2147483647, %v2142_v23  ;;  %v2285_v50 = vand.u32 31, %v2283_v32  ;;  %v10112_v15 = vand.u32 3, %v2152_v44  ;;  %v2279_v27 = vor.u32 8388608, %v10040_v11 }
 0x26f   :  { %v2228_v21 = vadd.s32 536870912, %v2227_v35  ;;  %v10115_v14 = vshrl.u32 %v2283_v32, 5  ;;  %v2378_v46 = vand.u32 2139095040, %v9987_v47  ;;  %v2375_v49 = vand.u32 2147483647, %v9987_v47 }
 0x270   :  { %v2146_v57 = vmul.f32 %v2145_v39, %v2143_v10  ;;  %v2286_v52 = vsub.s32 32, %v2285_v50  ;;  %v2288_v11 = vshll.u32 %v8832_v28, %v2285_v50  ;;  %v2291_v25 = vshll.u32 %v8833_v34, %v2285_v50 }
 0x271   :  { %v2229_v41 = vshrl.u32 %v2228_v21, 30  ;;  %v2294_v7 = vshll.u32 %v8834_v38, %v2285_v50  ;;  %v2297_v48 = vshll.u32 %v8835_v40, %v2285_v50  ;;  %v2300_v36 = vshll.u32 %v8836_v16, %v2285_v50 }
 0x272   :  { %v2147_v6 = vxor.u32 2147483648, %v2146_v57  ;;  %v2289_v9 = vshrl.u32 %v8833_v34, %v2286_v52  ;;  %v2292_v19 = vshrl.u32 %v8834_v38, %v2286_v52  ;;  %v2295_v29 = vshrl.u32 %v8835_v40, %v2286_v52 }
 0x273   :  { %v2298_v2 = vshrl.u32 %v8836_v16, %v2286_v52  ;;  %v2230_v37 = vshll.u32 %v2229_v41, 30  ;;  %v2301_v43 = vshrl.u32 %v8837_v53, %v2286_v52  ;;  %v10137_v56 = vshll.u32 %v2279_v27, 8 }
 0x274   :  { %v2148_v44 = vsel %vm2065_vm3, %v2147_v6, %v2146_v57  ;;  %v2290_v55 = vor.u32 %v2289_v9, %v2288_v11  ;;  %v2293_v1 = vor.u32 %v2292_v19, %v2291_v25  ;;  %v2296_v63 = vor.u32 %v2295_v29, %v2294_v7 }
 0x275   :  { %v2151_v45 = vsel %vm10027_vm2, %v9741_v42, %v2148_v44  ;;  %v10132_v31 = vsub.s32 %v2227_v35, %v2230_v37  ;;  %v2299_v30 = vor.u32 %v2298_v2, %v2297_v48  ;;  %vm2169_vm3 = vcmp.lt.s32.totalorder %v9863_v18, 0 }
 0x276   :  { %8653 = vcosq.f32 %v2151_v45  ;;  %v2253_v23 = vsub.s32 4, %v2229_v41  ;;  %v2287_v20 = vshrl.u32 %v8832_v28, %v2286_v52  ;;  %v2302_v12 = vor.u32 %v2301_v43, %v2300_v36 }
 0x277   :  { %8655 = vsinq.f32 %v2151_v45  ;;  %v2233_v0 = vsub.s32 0, %v10132_v31  ;;  %vm2162_vm2 = vcmp.eq.s32.totalorder %v10110_v5, 2  ;;  %vm5514_vm1 = vcmp.eq.s32.totalorder %v10112_v15, 2 }
 0x278   :  { %vm2303_vm4 = vcmp.lt.s32.totalorder %v10115_v14, 1  ;;  %vm2304_vm5 = vcmp.lt.s32.totalorder %v10115_v14, 2  ;;  %vm2306_vm6 = vcmp.lt.s32.totalorder %v10115_v14, 4  ;;  %vm2159_vm7 = vcmp.eq.s32.totalorder %v10110_v5, 0 }
 0x279   :  { %v8074_v26 = vmin.u32 %v2233_v0, %v10132_v31  ;;  %vm5511_vm8 = vcmp.eq.s32.totalorder %v10112_v15, 0  ;;  %v2308_v32 = vsel %vm2306_vm6, %v2296_v63, 2102212464  ;;  %v2311_v10 = vsel %vm2303_vm4, %v2290_v55, %v2293_v1 }
 0x27a   :  { %v2312_v39 = vsel %vm2306_vm6, %v2299_v30, 920167782  ;;  %v2379_v35 = vshrl.u32 %v2378_v46, 23  ;;  %vm2158_vm9 = vcmp.lt.s32.totalorder %v10110_v5, 2  ;;  %vm5510_vm10 = vcmp.lt.s32.totalorder %v10112_v15, 2 }
 0x27b   :  { %v2235_v50 = vclz %v8074_v26  ;;  %vm2305_vm11 = vcmp.lt.s32.totalorder %v10115_v14, 3  ;;  %v2307_v57 = vsel %vm2303_vm4, %v2287_v20, %v2290_v55  ;;  %v2315_v21 = vsel %vm2303_vm4, %v2293_v1, %v2296_v63 }
 0x27c   :  { %vm2155_vm12 = vweird.f32 %v9741_v42  ;;  %v2309_v52 = vsel %vm2305_vm11, %v2293_v1, %v2308_v32  ;;  %v2313_v27 = vsel %vm2305_vm11, %v2296_v63, %v2312_v39  ;;  %v2316_v6 = vsel %vm2306_vm6, %v2302_v12, 1326507024 }
 0x27d   :  { %v8081_v9 = vadd.s32 4294967169, %v2379_v35  ;;  %v2223_v19 = vadd.s32 %v10069_v60, %v10081_v13  ;;  %v8075_v29 = vadd.s32 4294967294, %v2235_v50  ;;  %v2314_v2 = vsel %vm2304_vm5, %v2311_v10, %v2313_v27 }
 0x27e   :  { %v2317_v46 = vsel %vm2305_vm11, %v2299_v30, %v2316_v6  ;;  %v2254_v44 = vsel %vm2169_vm3, %v2253_v23, %v2229_v41  ;;  %v10168_v11 = vmul.u32.u64.low %v10137_v56, %v2314_v2  ;;  %v10169_v25 = vmul.u32.u64.high %v10137_v56, %v2314_v2, %v10168_v11 }
 0x27f   :  { %v2318_v37 = vsel %vm2304_vm5, %v2315_v21, %v2317_v46  ;;  %vm8076_vm13 = vcmp.lt.s32.totalorder %v8075_v29, 0  ;;  %v2310_v60 = vsel %vm2304_vm5, %v2307_v57, %v2309_v52  ;;  %v2385_v55 = vadd.s32 1, %v8081_v9 }
 0x280   :  { %v8654_v45 = vpop.eup %8653  ;;  %v10175_v13 = vmul.u32.u64.low %v10137_v56, %v2318_v37  ;;  %v10176_v7 = vmul.u32.u64.high %v10137_v56, %v2318_v37, %v10175_v13  ;;  %v2238_v41 = vsel %vm8076_vm13, 0, %v8075_v29  ;;  %v10180_v36 = vadd.f32 %v9571_v33, %v9661_v22 }
 0x281   :  { %v8656_v48 = vpop.eup %8655  ;;  %v2163_v43 = vxor.u32 2147483648, %v8654_v45  ;;  %v2239_v63 = vsub.s32 32, %v2238_v41  ;;  %v2240_v30 = vshll.u32 %v10132_v31, %v2238_v41  ;;  %v2243_v0 = vsub.s32 4294967266, %v2238_v41 }
 0x282   :  { %v2160_v1 = vxor.u32 2147483648, %v8656_v48  ;;  %v2329_v20 = vadd.s32 1, %v10169_v25  ;;  %vm2386_vm14 = vcmp.gt.s32.totalorder %v2385_v55, 0  ;;  %v2326_v10 = vmul.u32 %v10137_v56, %v2310_v60 }
 0x283   :  { %v2164_v14 = vsel %vm2162_vm2, %v2163_v43, %v8656_v48  ;;  %v5516_v23 = vsel %vm5514_vm1, %v2163_v43, %v8656_v48  ;;  %v2241_v22 = vshrl.u32 %v2223_v19, %v2239_v63  ;;  %v2244_v26 = vadd.s32 127, %v2243_v0 }
 0x284   :  { %v2161_v12 = vsel %vm2159_vm7, %v8654_v45, %v2160_v1  ;;  %v5513_v33 = vsel %vm5511_vm8, %v8654_v45, %v2160_v1  ;;  %vm2328_vm15 = vc.u32 %v10176_v7, %v10168_v11  ;;  %vm10205_vm0 = vcmp.le.f32.partialorder %v2167_v62, 0.7853982  ;;  %v10215_v62 = vpop.f32.mrb[16].mxu0 }
 0x285   :  { %v2165_v31 = vsel %vm2158_vm9, %v2161_v12, %v2164_v14  ;;  %v5517_v32 = vsel %vm5510_vm10, %v5513_v33, %v5516_v23  ;;  %v2242_v50 = vor.u32 %v2241_v22, %v2240_v30  ;;  %v2245_v57 = vshll.u32 %v2244_v26, 23  ;;  %v10217_v37 = vpop.f32.mrb[17].mxu0 }
 0x286   :  { %v2166_v39 = vsel %vm2155_vm12, nan, %v2165_v31  ;;  %v5518_v35 = vsel %vm2155_vm12, nan, %v5517_v32  ;;  %v2330_v15 = vsel %vm2328_vm15, %v2329_v20, %v10169_v25  ;;  %v2387_v56 = vsel %vm2386_vm14, %v2385_v55, 0  ;;  %v10224_v55 = vpop.f32.mrb[16].mxu1 }
 0x287   :  { %4670 = vst [vmem:[#allocation7 + $0x68] sm:$0xff] %v2166_v39  ;;  %7998 = vst [vmem:[#allocation7 + $0x78] sm:$0xff] %v5518_v35  ;;  %v2246_v21 = vor.u32 4788187, %v2245_v57  ;;  %v2256_v52 = vsel %vm10205_vm0, 0, %v2254_v44  ;;  %v2331_v42 = vadd.s32 %v2330_v15, %v2326_v10  ;;  %v2389_v6 = vand.u32 31, %v2387_v56 }
 0x288   :  { %v2382_v27 = vand.u32 8388607, %v2375_v49  ;;  %v2249_v19 = vcvt.s32.f32 %v2242_v50  ;;  %v2260_v2 = vadd.s32 3, %v2256_v52  ;;  %v10219_v45 = vand.u32 3, %v2256_v52 }
 0x289   :  { %v2247_v9 = vand.u32 2147483647, %v2246_v21  ;;  %v2332_v29 = vadd.s32 536870912, %v2331_v42  ;;  %v2390_v46 = vsub.s32 32, %v2389_v6  ;;  %v2388_v44 = vshrl.u32 %v2387_v56, 5 }
 0x28a   :  { %v2383_v13 = vor.u32 8388608, %v2382_v27  ;;  %v2392_v30 = vshll.u32 %v8832_v28, %v2389_v6  ;;  %vm2273_vm2 = vcmp.lt.s32.totalorder %v9868_v24, 0  ;;  %v2395_v14 = vshll.u32 %v8833_v34, %v2389_v6 }
 0x28b   :  { %v2250_v25 = vmul.f32 %v2249_v19, %v2247_v9  ;;  %v2333_v60 = vshrl.u32 %v2332_v29, 30  ;;  %v2393_v48 = vshrl.u32 %v8833_v34, %v2390_v46  ;;  %v2396_v43 = vshrl.u32 %v8834_v38, %v2390_v46 }
 0x28c   :  { %v2399_v41 = vshrl.u32 %v8835_v40, %v2390_v46  ;;  %v2402_v0 = vshrl.u32 %v8836_v16, %v2390_v46  ;;  %v2398_v23 = vshll.u32 %v8834_v38, %v2389_v6  ;;  %v2401_v20 = vshll.u32 %v8835_v40, %v2389_v6 }
 0x28d   :  { %v2251_v1 = vxor.u32 2147483648, %v2250_v25  ;;  %v2334_v63 = vshll.u32 %v2333_v60, 30  ;;  %v2405_v12 = vshrl.u32 %v8837_v53, %v2390_v46  ;;  %v2394_v26 = vor.u32 %v2393_v48, %v2392_v30 }
 0x28e   :  { %v2404_v31 = vshll.u32 %v8836_v16, %v2389_v6  ;;  %v2397_v10 = vor.u32 %v2396_v43, %v2395_v14  ;;  %v2400_v39 = vor.u32 %v2399_v41, %v2398_v23  ;;  %v2403_v35 = vor.u32 %v2402_v0, %v2401_v20 }
 0x28f   :  { %v2252_v33 = vsel %vm2169_vm3, %v2251_v1, %v2250_v25  ;;  %v10235_v22 = vsub.s32 %v2331_v42, %v2334_v63  ;;  %v10241_v50 = vand.u32 3, %v2260_v2  ;;  %v10244_v15 = vshll.u32 %v2383_v13, 8 }
 0x290   :  { %v2255_v32 = vsel %vm10205_vm0, %v9863_v18, %v2252_v33  ;;  %v2406_v56 = vor.u32 %v2405_v12, %v2404_v31  ;;  %vm2407_vm3 = vcmp.lt.s32.totalorder %v2388_v44, 1  ;;  %v2482_v21 = vand.u32 2139095040, %v10180_v36 }
 0x291   :  { %8657 = vcosq.f32 %v2255_v32  ;;  %v2337_v57 = vsub.s32 0, %v10235_v22  ;;  %vm10249_vm1 = vcmp.le.f32.partialorder %v2271_v3, 0.7853982  ;;  %v2357_v42 = vsub.s32 4, %v2333_v60 }
 0x292   :  { %8659 = vsinq.f32 %v2255_v32  ;;  %v2391_v27 = vshrl.u32 %v8832_v28, %v2390_v46  ;;  %vm2410_vm4 = vcmp.lt.s32.totalorder %v2388_v44, 4  ;;  %vm2408_vm5 = vcmp.lt.s32.totalorder %v2388_v44, 2 }
 0x293   :  { %v8078_v52 = vmin.u32 %v2337_v57, %v10235_v22  ;;  %v2412_v6 = vsel %vm2410_vm4, %v2400_v39, 2102212464  ;;  %v2415_v9 = vsel %vm2407_vm3, %v2394_v26, %v2397_v10  ;;  %v2416_v19 = vsel %vm2410_vm4, %v2403_v35, 920167782 }
 0x294   :  { %vm5617_vm6 = vcmp.eq.s32.totalorder %v10219_v45, 2  ;;  %vm2409_vm7 = vcmp.lt.s32.totalorder %v2388_v44, 3  ;;  %v2411_v2 = vsel %vm2407_vm3, %v2391_v27, %v2394_v26  ;;  %v2419_v25 = vsel %vm2407_vm3, %v2397_v10, %v2400_v39 }
 0x295   :  { %v2339_v29 = vclz %v8078_v52  ;;  %vm2263_vm8 = vcmp.eq.s32.totalorder %v10241_v50, 0  ;;  %vm5614_vm9 = vcmp.eq.s32.totalorder %v10219_v45, 0  ;;  %v2413_v3 = vsel %vm2409_vm7, %v2397_v10, %v2412_v6 }
 0x296   :  { %v2417_v13 = vsel %vm2409_vm7, %v2400_v39, %v2416_v19  ;;  %v2420_v48 = vsel %vm2410_vm4, %v2406_v56, 1326507024  ;;  %v2483_v43 = vshrl.u32 %v2482_v21, 23  ;;  %vm2262_vm10 = vcmp.lt.s32.totalorder %v10241_v50, 2 }
 0x297   :  { %vm5613_vm11 = vcmp.lt.s32.totalorder %v10219_v45, 2  ;;  %v8079_v46 = vadd.s32 4294967294, %v2339_v29  ;;  %v2358_v41 = vsel %vm2273_vm2, %v2357_v42, %v2333_v60  ;;  %v2418_v1 = vsel %vm2408_vm5, %v2415_v9, %v2417_v13 }
 0x298   :  { %v2421_v63 = vsel %vm2409_vm7, %v2403_v35, %v2420_v48  ;;  %vm2259_vm12 = vweird.f32 %v9863_v18  ;;  %v2414_v30 = vsel %vm2408_vm5, %v2411_v2, %v2413_v3  ;;  %v8085_v60 = vadd.s32 4294967169, %v2483_v43 }
 0x299   :  { %v2422_v0 = vsel %vm2408_vm5, %v2419_v25, %v2421_v63  ;;  %v10267_v14 = vmul.u32.u64.low %v10244_v15, %v2418_v1  ;;  %v10268_v23 = vmul.u32.u64.high %v10244_v15, %v2418_v1, %v10267_v14  ;;  %vm8080_vm13 = vcmp.lt.s32.totalorder %v8079_v46, 0 }
 0x29a   :  { %v10272_v20 = vmul.u32.u64.low %v10244_v15, %v2422_v0  ;;  %v10273_v12 = vmul.u32.u64.high %v10244_v15, %v2422_v0, %v10272_v20  ;;  %vm2266_vm14 = vcmp.eq.s32.totalorder %v10241_v50, 2  ;;  %v2327_v33 = vadd.s32 %v10168_v11, %v10176_v7 }
 0x29b   :  { %v2342_v26 = vsel %vm8080_vm13, 0, %v8079_v46  ;;  %v10280_v44 = vadd.f32 %v9772_v61, %v9785_v17  ;;  %v8658_v31 = vpop.eup %8657  ;;  %v2479_v39 = vand.u32 2147483647, %v10180_v36  ;;  %v2489_v35 = vadd.s32 1, %v8085_v60 }
 0x29c   :  { %v2343_v32 = vsub.s32 32, %v2342_v26  ;;  %v2347_v10 = vsub.s32 4294967266, %v2342_v26  ;;  %v8660_v57 = vpop.eup %8659  ;;  %v2267_v56 = vxor.u32 2147483648, %v8658_v31  ;;  %v2360_v21 = vsel %vm10249_vm1, 0, %v2358_v41 }
 0x29d   :  { %v2430_v52 = vmul.u32 %v10244_v15, %v2414_v30  ;;  %v2433_v11 = vadd.s32 1, %v10268_v23  ;;  %v2264_v7 = vxor.u32 2147483648, %v8660_v57  ;;  %v2344_v42 = vshll.u32 %v10235_v22, %v2342_v26 }
 0x29e   :  { %v2345_v61 = vshrl.u32 %v2327_v33, %v2343_v32  ;;  %v2348_v17 = vadd.s32 127, %v2347_v10  ;;  %v2268_v27 = vsel %vm2266_vm14, %v2267_v56, %v8660_v57  ;;  %v5619_v6 = vsel %vm5617_vm6, %v2267_v56, %v8660_v57 }
 0x29f   :  { %vm2432_vm15 = vc.u32 %v10273_v12, %v10267_v14  ;;  %vm2490_vm0 = vcmp.gt.s32.totalorder %v2489_v35, 0  ;;  %v2265_v15 = vsel %vm2263_vm8, %v8658_v31, %v2264_v7  ;;  %v5616_v9 = vsel %vm5614_vm9, %v8658_v31, %v2264_v7  ;;  %v10317_v31 = vpop.f32.mrb[17].mxu1 }
 0x2a0   :  { %v2346_v19 = vor.u32 %v2345_v61, %v2344_v42  ;;  %v2349_v22 = vshll.u32 %v2348_v17, 23  ;;  %v2269_v29 = vsel %vm2262_vm10, %v2265_v15, %v2268_v27  ;;  %v5620_v2 = vsel %vm5613_vm11, %v5616_v9, %v5619_v6 }
 0x2a1   :  { %v2434_v25 = vsel %vm2432_vm15, %v2433_v11, %v10268_v23  ;;  %v2491_v3 = vsel %vm2490_vm0, %v2489_v35, 0  ;;  %v2270_v13 = vsel %vm2259_vm12, nan, %v2269_v29  ;;  %v5621_v48 = vsel %vm2259_vm12, nan, %v5620_v2 }
 0x2a2   :  { %v2350_v43 = vor.u32 4788187, %v2349_v22  ;;  %4671 = vst [vmem:[#allocation7 + $0x80] sm:$0xff] %v2270_v13  ;;  %7999 = vst [vmem:[#allocation7 + $0x90] sm:$0xff] %v5621_v48  ;;  %v2364_v46 = vadd.s32 3, %v2360_v21  ;;  %v2435_v41 = vadd.s32 %v2434_v25, %v2430_v52  ;;  %v2493_v1 = vand.u32 31, %v2491_v3 }
 0x2a3   :  { %v2486_v50 = vand.u32 8388607, %v2479_v39  ;;  %v2353_v63 = vcvt.s32.f32 %v2346_v19  ;;  %v10309_v20 = vand.u32 3, %v2360_v21  ;;  %v10315_v26 = vshrl.u32 %v2491_v3, 5 }
 0x2a4   :  { %v2351_v45 = vand.u32 2147483647, %v2350_v43  ;;  %v2436_v30 = vadd.s32 536870912, %v2435_v41  ;;  %v2494_v0 = vsub.s32 32, %v2493_v1  ;;  %v10311_v60 = vand.u32 3, %v2364_v46 }
 0x2a5   :  { %v2487_v33 = vor.u32 8388608, %v2486_v50  ;;  %v2496_v21 = vshll.u32 %v8832_v28, %v2493_v1  ;;  %v2586_v11 = vand.u32 2139095040, %v10280_v44  ;;  %v2499_v42 = vshll.u32 %v8833_v34, %v2493_v1 }
 0x2a6   :  { %v2354_v23 = vmul.f32 %v2353_v63, %v2351_v45  ;;  %v10313_v18 = vshrl.u32 %v2436_v30, 30  ;;  %v2497_v10 = vshrl.u32 %v8833_v34, %v2494_v0  ;;  %v2500_v35 = vshrl.u32 %v8834_v38, %v2494_v0 }
 0x2a7   :  { %v2506_v57 = vshrl.u32 %v8836_v16, %v2494_v0  ;;  %v2503_v52 = vshrl.u32 %v8835_v40, %v2494_v0  ;;  %v2505_v61 = vshll.u32 %v8835_v40, %v2493_v1  ;;  %v2509_v17 = vshrl.u32 %v8837_v53, %v2494_v0 }
 0x2a8   :  { %v2355_v32 = vxor.u32 2147483648, %v2354_v23  ;;  %v2438_v56 = vshll.u32 %v10313_v18, 30  ;;  %v2502_v15 = vshll.u32 %v8834_v38, %v2493_v1  ;;  %v2508_v9 = vshll.u32 %v8836_v16, %v2493_v1 }
 0x2a9   :  { %v2498_v19 = vor.u32 %v2497_v10, %v2496_v21  ;;  %v2501_v22 = vor.u32 %v2500_v35, %v2499_v42  ;;  %v2507_v29 = vor.u32 %v2506_v57, %v2505_v61  ;;  %v10340_v13 = vshll.u32 %v2487_v33, 8 }
 0x2aa   :  { %v2356_v7 = vsel %vm2273_vm2, %v2355_v32, %v2354_v23  ;;  %v10334_v6 = vsub.s32 %v2435_v41, %v2438_v56  ;;  %v2504_v25 = vor.u32 %v2503_v52, %v2502_v15  ;;  %vm2377_vm2 = vcmp.lt.s32.totalorder %v9987_v47, 0 }
 0x2ab   :  { %v2359_v27 = vsel %vm10249_vm1, %v9868_v24, %v2356_v7  ;;  %v2510_v3 = vor.u32 %v2509_v17, %v2508_v9  ;;  %v2583_v5 = vand.u32 2147483647, %v10280_v44  ;;  %v2495_v43 = vshrl.u32 %v8832_v28, %v2494_v0 }
 0x2ac   :  { %8661 = vcosq.f32 %v2359_v27  ;;  %v2441_v2 = vsub.s32 0, %v10334_v6  ;;  %vm2511_vm3 = vcmp.lt.s32.totalorder %v10315_v26, 1  ;;  %vm2514_vm1 = vcmp.lt.s32.totalorder %v10315_v26, 4 }
 0x2ad   :  { %8663 = vsinq.f32 %v2359_v27  ;;  %vm2370_vm4 = vcmp.eq.s32.totalorder %v10311_v60, 2  ;;  %vm5720_vm5 = vcmp.eq.s32.totalorder %v10309_v20, 2  ;;  %v2461_v46 = vsub.s32 4, %v10313_v18 }
 0x2ae   :  { %v8082_v48 = vmin.u32 %v2441_v2, %v10334_v6  ;;  %v2519_v41 = vsel %vm2511_vm3, %v2498_v19, %v2501_v22  ;;  %v2520_v50 = vsel %vm2514_vm1, %v2507_v29, 920167782  ;;  %v2587_v1 = vshrl.u32 %v2586_v11, 23 }
 0x2af   :  { %vm2367_vm6 = vcmp.eq.s32.totalorder %v10311_v60, 0  ;;  %vm5717_vm7 = vcmp.eq.s32.totalorder %v10309_v20, 0  ;;  %vm2513_vm8 = vcmp.lt.s32.totalorder %v10315_v26, 3  ;;  %v2516_v63 = vsel %vm2514_vm1, %v2504_v25, 2102212464 }
 0x2b0   :  { %v2443_v45 = vclz %v8082_v48  ;;  %v2523_v30 = vsel %vm2511_vm3, %v2501_v22, %v2504_v25  ;;  %vm2366_vm9 = vcmp.lt.s32.totalorder %v10311_v60, 2  ;;  %vm5716_vm10 = vcmp.lt.s32.totalorder %v10309_v20, 2 }
 0x2b1   :  { %vm2512_vm11 = vcmp.lt.s32.totalorder %v10315_v26, 2  ;;  %v2521_v0 = vsel %vm2513_vm8, %v2504_v25, %v2520_v50  ;;  %v2524_v23 = vsel %vm2514_vm1, %v2510_v3, 1326507024  ;;  %v8089_v33 = vadd.s32 4294967169, %v2587_v1 }
 0x2b2   :  { %vm2363_vm12 = vweird.f32 %v9868_v24  ;;  %v8083_v32 = vadd.s32 4294967294, %v2443_v45  ;;  %v2515_v10 = vsel %vm2511_vm3, %v2495_v43, %v2498_v19  ;;  %v2522_v35 = vsel %vm2512_vm11, %v2519_v41, %v2521_v0 }
 0x2b3   :  { %v2525_v57 = vsel %vm2513_vm8, %v2507_v29, %v2524_v23  ;;  %v2517_v56 = vsel %vm2513_vm8, %v2501_v22, %v2516_v63  ;;  %v10374_v52 = vmul.u32.u64.low %v10340_v13, %v2522_v35  ;;  %v10375_v11 = vmul.u32.u64.high %v10340_v13, %v2522_v35, %v10374_v52 }
 0x2b4   :  { %v2526_v21 = vsel %vm2512_vm11, %v2523_v30, %v2525_v57  ;;  %v2431_v7 = vadd.s32 %v10267_v14, %v10273_v12  ;;  %vm8084_vm13 = vcmp.lt.s32.totalorder %v8083_v32, 0  ;;  %v2462_v15 = vsel %vm2377_vm2, %v2461_v46, %v10313_v18 }
 0x2b5   :  { %v10381_v42 = vmul.u32.u64.low %v10340_v13, %v2526_v21  ;;  %v10382_v61 = vmul.u32.u64.high %v10340_v13, %v2526_v21, %v10381_v42  ;;  %v2446_v27 = vsel %vm8084_vm13, 0, %v8083_v32  ;;  %v2593_v9 = vadd.s32 1, %v8089_v33 }
 0x2b6   :  { %v8662_v17 = vpop.eup %8661  ;;  %v10389_v19 = vadd.f32 %v9774_v59, %v9904_v54  ;;  %v2447_v2 = vsub.s32 32, %v2446_v27  ;;  %v2451_v14 = vsub.s32 4294967266, %v2446_v27  ;;  %v2518_v12 = vsel %vm2512_vm11, %v2515_v10, %v2517_v56  ;;  %v10426_v56 = vpop.f32.mrb[18].mxu0 }
 0x2b7   :  { %v8664_v22 = vpop.eup %8663  ;;  %v2371_v29 = vxor.u32 2147483648, %v8662_v17  ;;  %v2448_v3 = vshll.u32 %v10334_v6, %v2446_v27  ;;  %v2537_v48 = vadd.s32 1, %v10375_v11  ;;  %vm2594_vm14 = vcmp.gt.s32.totalorder %v2593_v9, 0 }
 0x2b8   :  { %v2368_v25 = vxor.u32 2147483648, %v8664_v22  ;;  %v2449_v54 = vshrl.u32 %v2431_v7, %v2447_v2  ;;  %v2452_v43 = vadd.s32 127, %v2451_v14  ;;  %v2534_v41 = vmul.u32 %v10340_v13, %v2518_v12 }
 0x2b9   :  { %v2372_v18 = vsel %vm2370_vm4, %v2371_v29, %v8664_v22  ;;  %v5722_v59 = vsel %vm5720_vm5, %v2371_v29, %v8664_v22  ;;  %vm2536_vm15 = vc.u32 %v10382_v61, %v10374_v52  ;;  %v2595_v13 = vsel %vm2594_vm14, %v2593_v9, 0  ;;  %v10433_v29 = vpop.f32.mrb[18].mxu1 }
 0x2ba   :  { %v2369_v46 = vsel %vm2367_vm6, %v8662_v17, %v2368_v25  ;;  %v5719_v26 = vsel %vm5717_vm7, %v8662_v17, %v2368_v25  ;;  %v2450_v1 = vor.u32 %v2449_v54, %v2448_v3  ;;  %v2453_v45 = vshll.u32 %v2452_v43, 23 }
 0x2bb   :  { %v2373_v6 = vsel %vm2366_vm9, %v2369_v46, %v2372_v18  ;;  %v5723_v50 = vsel %vm5716_vm10, %v5719_v26, %v5722_v59  ;;  %v2538_v0 = vsel %vm2536_vm15, %v2537_v48, %v10375_v11  ;;  %vm10418_vm0 = vcmp.le.f32.partialorder %v2375_v49, 0.7853982  ;;  %v10428_v11 = vpop.f32.mrb[19].mxu0 }
 0x2bc   :  { %v2374_v63 = vsel %vm2363_vm12, nan, %v2373_v6  ;;  %v5724_v30 = vsel %vm2363_vm12, nan, %v5723_v50  ;;  %v2454_v20 = vor.u32 4788187, %v2453_v45  ;;  %v2539_v23 = vadd.s32 %v2538_v0, %v2534_v41 }
 0x2bd   :  { %4672 = vst [vmem:[#allocation7 + $0x88] sm:$0xff] %v2374_v63  ;;  %8000 = vst [vmem:[#allocation7 + $0x98] sm:$0xff] %v5724_v30  ;;  %v2590_v33 = vand.u32 8388607, %v2583_v5  ;;  %v2464_v24 = vsel %vm10418_vm0, 0, %v2462_v15  ;;  %v2597_v32 = vand.u32 31, %v2595_v13  ;;  %v2457_v35 = vcvt.s32.f32 %v2450_v1 }
 0x2be   :  { %v2455_v10 = vand.u32 2147483647, %v2454_v20  ;;  %v2540_v57 = vadd.s32 536870912, %v2539_v23  ;;  %v2468_v7 = vadd.s32 3, %v2464_v24  ;;  %v2596_v27 = vshrl.u32 %v2595_v13, 5 }
 0x2bf   :  { %v2598_v21 = vsub.s32 32, %v2597_v32  ;;  %v2591_v17 = vor.u32 8388608, %v2590_v33  ;;  %v2600_v12 = vshll.u32 %v8832_v28, %v2597_v32  ;;  %v2603_v3 = vshll.u32 %v8833_v34, %v2597_v32 }
 0x2c0   :  { %v2458_v49 = vmul.f32 %v2457_v35, %v2455_v10  ;;  %v2541_v42 = vshrl.u32 %v2540_v57, 30  ;;  %v2606_v48 = vshll.u32 %v8834_v38, %v2597_v32  ;;  %v2609_v18 = vshll.u32 %v8835_v40, %v2597_v32 }
 0x2c1   :  { %v2601_v9 = vshrl.u32 %v8833_v34, %v2598_v21  ;;  %v2604_v22 = vshrl.u32 %v8834_v38, %v2598_v21  ;;  %v2607_v15 = vshrl.u32 %v8835_v40, %v2598_v21  ;;  %v2610_v25 = vshrl.u32 %v8836_v16, %v2598_v21 }
 0x2c2   :  { %v2459_v2 = vxor.u32 2147483648, %v2458_v49  ;;  %v2542_v14 = vshll.u32 %v2541_v42, 30  ;;  %v2613_v59 = vshrl.u32 %v8837_v53, %v2598_v21  ;;  %v2612_v26 = vshll.u32 %v8836_v16, %v2597_v32 }
 0x2c3   :  { %v2602_v46 = vor.u32 %v2601_v9, %v2600_v12  ;;  %v2605_v6 = vor.u32 %v2604_v22, %v2603_v3  ;;  %v2608_v50 = vor.u32 %v2607_v15, %v2606_v48  ;;  %v2611_v1 = vor.u32 %v2610_v25, %v2609_v18 }
 0x2c4   :  { %v2460_v54 = vsel %vm2377_vm2, %v2459_v2, %v2458_v49  ;;  %v10443_v43 = vsub.s32 %v2539_v23, %v2542_v14  ;;  %v10449_v45 = vand.u32 3, %v2464_v24  ;;  %vm2481_vm3 = vcmp.lt.s32.totalorder %v10180_v36, 0 }
 0x2c5   :  { %v2463_v41 = vsel %vm10418_vm0, %v9987_v47, %v2460_v54  ;;  %v10453_v30 = vand.u32 3, %v2468_v7  ;;  %v2614_v0 = vor.u32 %v2613_v59, %v2612_v26  ;;  %vm2615_vm2 = vcmp.lt.s32.totalorder %v2596_v27, 1 }
 0x2c6   :  { %8665 = vcosq.f32 %v2463_v41  ;;  %v2545_v63 = vsub.s32 0, %v10443_v43  ;;  %vm10457_vm1 = vcmp.le.f32.partialorder %v2479_v39, 0.7853982  ;;  %v2565_v20 = vsub.s32 4, %v2541_v42 }
 0x2c7   :  { %8667 = vsinq.f32 %v2463_v41  ;;  %v2599_v23 = vshrl.u32 %v8832_v28, %v2598_v21  ;;  %vm2618_vm4 = vcmp.lt.s32.totalorder %v2596_v27, 4  ;;  %v2623_v24 = vsel %vm2615_vm2, %v2602_v46, %v2605_v6 }
 0x2c8   :  { %v8086_v60 = vmin.u32 %v2545_v63, %v10443_v43  ;;  %v2620_v33 = vsel %vm2618_vm4, %v2608_v50, 2102212464  ;;  %v2624_v32 = vsel %vm2618_vm4, %v2611_v1, 920167782  ;;  %v10463_v10 = vshll.u32 %v2591_v17, 8 }
 0x2c9   :  { %vm5823_vm5 = vcmp.eq.s32.totalorder %v10449_v45, 2  ;;  %vm2617_vm6 = vcmp.lt.s32.totalorder %v2596_v27, 3  ;;  %v2619_v57 = vsel %vm2615_vm2, %v2599_v23, %v2602_v46  ;;  %v2627_v39 = vsel %vm2615_vm2, %v2605_v6, %v2608_v50 }
 0x2ca   :  { %v2547_v35 = vclz %v8086_v60  ;;  %vm2471_vm7 = vcmp.eq.s32.totalorder %v10453_v30, 0  ;;  %vm5820_vm8 = vcmp.eq.s32.totalorder %v10449_v45, 0  ;;  %vm2616_vm9 = vcmp.lt.s32.totalorder %v2596_v27, 2 }
 0x2cb   :  { %v2621_v49 = vsel %vm2617_vm6, %v2605_v6, %v2620_v33  ;;  %v2625_v7 = vsel %vm2617_vm6, %v2608_v50, %v2624_v32  ;;  %v2628_v21 = vsel %vm2618_vm4, %v2614_v0, 1326507024  ;;  %vm2470_vm10 = vcmp.lt.s32.totalorder %v10453_v30, 2 }
 0x2cc   :  { %vm5819_vm11 = vcmp.lt.s32.totalorder %v10449_v45, 2  ;;  %v8087_v17 = vadd.s32 4294967294, %v2547_v35  ;;  %v2566_v9 = vsel %vm2481_vm3, %v2565_v20, %v2541_v42  ;;  %v2626_v22 = vsel %vm2616_vm9, %v2623_v24, %v2625_v7 }
 0x2cd   :  { %v2629_v15 = vsel %vm2617_vm6, %v2611_v1, %v2628_v21  ;;  %vm2467_vm12 = vweird.f32 %v9987_v47  ;;  %v2622_v2 = vsel %vm2616_vm9, %v2619_v57, %v2621_v49  ;;  %v2690_v48 = vand.u32 2139095040, %v10389_v19 }
 0x2ce   :  { %v2630_v14 = vsel %vm2616_vm9, %v2627_v39, %v2629_v15  ;;  %v10474_v12 = vmul.u32.u64.low %v10463_v10, %v2626_v22  ;;  %v10475_v27 = vmul.u32.u64.high %v10463_v10, %v2626_v22, %v10474_v12  ;;  %vm8088_vm13 = vcmp.lt.s32.totalorder %v8087_v17, 0 }
 0x2cf   :  { %v10479_v25 = vmul.u32.u64.low %v10463_v10, %v2630_v14  ;;  %v10480_v3 = vmul.u32.u64.high %v10463_v10, %v2630_v14, %v10479_v25  ;;  %vm2474_vm14 = vcmp.eq.s32.totalorder %v10453_v30, 2  ;;  %v2535_v42 = vadd.s32 %v10374_v52, %v10382_v61 }
 0x2d0   :  { %v2550_v18 = vsel %vm8088_vm13, 0, %v8087_v17  ;;  %v10488_v59 = vadd.f32 %v9991_v58, %v10004_v51  ;;  %v8666_v54 = vpop.eup %8665  ;;  %v2687_v41 = vand.u32 2147483647, %v10389_v19  ;;  %v2691_v6 = vshrl.u32 %v2690_v48, 23 }
 0x2d1   :  { %v2551_v46 = vsub.s32 32, %v2550_v18  ;;  %v2555_v26 = vsub.s32 4294967266, %v2550_v18  ;;  %v8668_v50 = vpop.eup %8667  ;;  %v2475_v1 = vxor.u32 2147483648, %v8666_v54  ;;  %v2568_v63 = vsel %vm10457_vm1, 0, %v2566_v9 }
 0x2d2   :  { %v2638_v0 = vmul.u32 %v10463_v10, %v2622_v2  ;;  %v2641_v52 = vadd.s32 1, %v10475_v27  ;;  %v2472_v61 = vxor.u32 2147483648, %v8668_v50  ;;  %v2552_v60 = vshll.u32 %v10443_v43, %v2550_v18 }
 0x2d3   :  { %v2553_v58 = vshrl.u32 %v2535_v42, %v2551_v46  ;;  %v2556_v51 = vadd.s32 127, %v2555_v26  ;;  %v2476_v20 = vsel %vm2474_vm14, %v2475_v1, %v8668_v50  ;;  %v5825_v23 = vsel %vm5823_vm5, %v2475_v1, %v8668_v50 }
 0x2d4   :  { %vm2640_vm15 = vc.u32 %v10480_v3, %v10474_v12  ;;  %v8093_v33 = vadd.s32 4294967169, %v2691_v6  ;;  %v2473_v24 = vsel %vm2471_vm7, %v8666_v54, %v2472_v61  ;;  %v5822_v32 = vsel %vm5820_vm8, %v8666_v54, %v2472_v61 }
 0x2d5   :  { %v2554_v10 = vor.u32 %v2553_v58, %v2552_v60  ;;  %v2557_v43 = vshll.u32 %v2556_v51, 23  ;;  %v2477_v35 = vsel %vm2470_vm10, %v2473_v24, %v2476_v20  ;;  %v5826_v57 = vsel %vm5819_vm11, %v5822_v32, %v5825_v23  ;;  %v10535_v60 = vpop.f32.mrb[19].mxu1 }
 0x2d6   :  { %v2642_v39 = vsel %vm2640_vm15, %v2641_v52, %v10475_v27  ;;  %v2697_v49 = vadd.s32 1, %v8093_v33  ;;  %v2478_v7 = vsel %vm2467_vm12, nan, %v2477_v35  ;;  %v5827_v21 = vsel %vm2467_vm12, nan, %v5826_v57 }
 0x2d7   :  { %v2558_v17 = vor.u32 4788187, %v2557_v43  ;;  %4673 = vst [vmem:[#allocation7 + $0xa0] sm:$0xff] %v2478_v7  ;;  %8001 = vst [vmem:[#allocation7 + $0xb0] sm:$0xff] %v5827_v21  ;;  %v2572_v9 = vadd.s32 3, %v2568_v63  ;;  %v2643_v22 = vadd.s32 %v2642_v39, %v2638_v0  ;;  %v2561_v15 = vcvt.s32.f32 %v2554_v10 }
 0x2d8   :  { %vm2698_vm0 = vcmp.gt.s32.totalorder %v2697_v49, 0  ;;  %v2694_v45 = vand.u32 8388607, %v2687_v41  ;;  %v10519_v48 = vadd.f32 %v9995_v4, %v10108_v8  ;;  %vm2585_vm2 = vcmp.lt.s32.totalorder %v10280_v44, 0 }
 0x2d9   :  { %v2559_v30 = vand.u32 2147483647, %v2558_v17  ;;  %v2699_v2 = vsel %vm2698_vm0, %v2697_v49, 0  ;;  %v2644_v14 = vadd.s32 536870912, %v2643_v22  ;;  %v10522_v54 = vand.u32 3, %v2572_v9 }
 0x2da   :  { %v2701_v27 = vand.u32 31, %v2699_v2  ;;  %v10524_v46 = vand.u32 3, %v2568_v63  ;;  %v2695_v26 = vor.u32 8388608, %v2694_v45  ;;  %v10526_v50 = vshrl.u32 %v2699_v2, 5 }
 0x2db   :  { %v2562_v25 = vmul.f32 %v2561_v15, %v2559_v30  ;;  %v2645_v47 = vshrl.u32 %v2644_v14, 30  ;;  %v2794_v0 = vand.u32 2139095040, %v10488_v59  ;;  %v2791_v17 = vand.u32 2147483647, %v10488_v59 }
 0x2dc   :  { %v2702_v42 = vsub.s32 32, %v2701_v27  ;;  %v2704_v51 = vshll.u32 %v8832_v28, %v2701_v27  ;;  %v2707_v20 = vshll.u32 %v8833_v34, %v2701_v27  ;;  %v2710_v33 = vshll.u32 %v8834_v38, %v2701_v27 }
 0x2dd   :  { %v2563_v18 = vxor.u32 2147483648, %v2562_v25  ;;  %v2646_v6 = vshll.u32 %v2645_v47, 30  ;;  %v2669_v23 = vsub.s32 4, %v2645_v47  ;;  %v2713_v24 = vshll.u32 %v8835_v40, %v2701_v27 }
 0x2de   :  { %v2705_v1 = vshrl.u32 %v8833_v34, %v2702_v42  ;;  %v2708_v8 = vshrl.u32 %v8834_v38, %v2702_v42  ;;  %v2711_v52 = vshrl.u32 %v8835_v40, %v2702_v42  ;;  %v2714_v61 = vshrl.u32 %v8836_v16, %v2702_v42 }
 0x2df   :  { %v2564_v4 = vsel %vm2481_vm3, %v2563_v18, %v2562_v25  ;;  %v10540_v58 = vsub.s32 %v2643_v22, %v2646_v6  ;;  %vm10548_vm3 = vcmp.le.f32.partialorder %v2583_v5, 0.7853982  ;;  %v2716_v43 = vshll.u32 %v8836_v16, %v2701_v27 }
 0x2e0   :  { %v2567_v63 = vsel %vm10457_vm1, %v10180_v36, %v2564_v4  ;;  %v2706_v10 = vor.u32 %v2705_v1, %v2704_v51  ;;  %v2709_v35 = vor.u32 %v2708_v8, %v2707_v20  ;;  %v2712_v57 = vor.u32 %v2711_v52, %v2710_v33 }
 0x2e1   :  { %8669 = vcosq.f32 %v2567_v63  ;;  %v2649_v13 = vsub.s32 0, %v10540_v58  ;;  %v2715_v39 = vor.u32 %v2714_v61, %v2713_v24  ;;  %v2717_v49 = vshrl.u32 %v8837_v53, %v2702_v42 }
 0x2e2   :  { %8671 = vsinq.f32 %v2567_v63  ;;  %v10556_v21 = vshll.u32 %v2695_v26, 8  ;;  %v2795_v5 = vshrl.u32 %v2794_v0, 23  ;;  %vm2578_vm1 = vcmp.eq.s32.totalorder %v10522_v54, 2 }
 0x2e3   :  { %v8090_v7 = vmin.u32 %v2649_v13, %v10540_v58  ;;  %vm5926_vm4 = vcmp.eq.s32.totalorder %v10524_v46, 2  ;;  %v2670_v9 = vsel %vm2585_vm2, %v2669_v23, %v2645_v47  ;;  %v2703_v22 = vshrl.u32 %v8832_v28, %v2702_v42 }
 0x2e4   :  { %v2718_v30 = vor.u32 %v2717_v49, %v2716_v43  ;;  %vm2719_vm5 = vcmp.lt.s32.totalorder %v10526_v50, 1  ;;  %vm2575_vm6 = vcmp.eq.s32.totalorder %v10522_v54, 0  ;;  %vm5923_vm7 = vcmp.eq.s32.totalorder %v10524_v46, 0 }
 0x2e5   :  { %v2651_v15 = vclz %v8090_v7  ;;  %vm2720_vm8 = vcmp.lt.s32.totalorder %v10526_v50, 2  ;;  %vm2721_vm9 = vcmp.lt.s32.totalorder %v10526_v50, 3  ;;  %vm2722_vm10 = vcmp.lt.s32.totalorder %v10526_v50, 4 }
 0x2e6   :  { %vm2574_vm11 = vcmp.lt.s32.totalorder %v10522_v54, 2  ;;  %vm5922_vm12 = vcmp.lt.s32.totalorder %v10524_v46, 2  ;;  %v2723_v45 = vsel %vm2719_vm5, %v2703_v22, %v2706_v10  ;;  %v2724_v2 = vsel %vm2722_vm10, %v2712_v57, 2102212464 }
 0x2e7   :  { %v2727_v14 = vsel %vm2719_vm5, %v2706_v10, %v2709_v35  ;;  %v2728_v27 = vsel %vm2722_vm10, %v2715_v39, 920167782  ;;  %vm2571_vm13 = vweird.f32 %v10180_v36  ;;  %v8091_v25 = vadd.s32 4294967294, %v2651_v15 }
 0x2e8   :  { %v2725_v47 = vsel %vm2721_vm9, %v2709_v35, %v2724_v2  ;;  %v2729_v42 = vsel %vm2721_vm9, %v2712_v57, %v2728_v27  ;;  %v2731_v18 = vsel %vm2719_vm5, %v2709_v35, %v2712_v57  ;;  %v2639_v26 = vadd.s32 %v10474_v12, %v10480_v3 }
 0x2e9   :  { %v2730_v6 = vsel %vm2720_vm8, %v2727_v14, %v2729_v42  ;;  %v2732_v1 = vsel %vm2722_vm10, %v2718_v30, 1326507024  ;;  %v8097_v0 = vadd.s32 4294967169, %v2795_v5  ;;  %vm8092_vm14 = vcmp.lt.s32.totalorder %v8091_v25, 0 }
 0x2ea   :  { %v2733_v4 = vsel %vm2721_vm9, %v2715_v39, %v2732_v1  ;;  %v10590_v8 = vmul.u32.u64.low %v10556_v21, %v2730_v6  ;;  %v10591_v52 = vmul.u32.u64.high %v10556_v21, %v2730_v6, %v10590_v8  ;;  %v2654_v63 = vsel %vm8092_vm14, 0, %v8091_v25 }
 0x2eb   :  { %v8670_v61 = vpop.eup %8669  ;;  %v2672_v51 = vsel %vm10548_vm3, 0, %v2670_v9  ;;  %v2726_v12 = vsel %vm2720_vm8, %v2723_v45, %v2725_v47  ;;  %v2734_v3 = vsel %vm2720_vm8, %v2731_v18, %v2733_v4  ;;  %v2655_v33 = vsub.s32 32, %v2654_v63 }
 0x2ec   :  { %v8672_v20 = vpop.eup %8671  ;;  %v2579_v23 = vxor.u32 2147483648, %v8670_v61  ;;  %v2656_v24 = vshll.u32 %v10540_v58, %v2654_v63  ;;  %v2659_v13 = vsub.s32 4294967266, %v2654_v63  ;;  %v2801_v57 = vadd.s32 1, %v8097_v0 }
 0x2ed   :  { %v2576_v10 = vxor.u32 2147483648, %v8672_v20  ;;  %v10602_v43 = vmul.u32.u64.low %v10556_v21, %v2734_v3  ;;  %v10603_v35 = vmul.u32.u64.high %v10556_v21, %v2734_v3, %v10602_v43  ;;  %v2657_v50 = vshrl.u32 %v2639_v26, %v2655_v33 }
 0x2ee   :  { %v2580_v39 = vsel %vm2578_vm1, %v2579_v23, %v8672_v20  ;;  %v5928_v49 = vsel %vm5926_vm4, %v2579_v23, %v8672_v20  ;;  %v2660_v7 = vadd.s32 127, %v2659_v13  ;;  %v2745_v9 = vadd.s32 1, %v10591_v52 }
 0x2ef   :  { %v2577_v5 = vsel %vm2575_vm6, %v8670_v61, %v2576_v10  ;;  %v5925_v58 = vsel %vm5923_vm7, %v8670_v61, %v2576_v10  ;;  %vm2802_vm15 = vcmp.gt.s32.totalorder %v2801_v57, 0  ;;  %v2658_v15 = vor.u32 %v2657_v50, %v2656_v24 }
 0x2f0   :  { %v2581_v22 = vsel %vm2574_vm11, %v2577_v5, %v2580_v39  ;;  %v5929_v30 = vsel %vm5922_vm12, %v5925_v58, %v5928_v49  ;;  %v2661_v45 = vshll.u32 %v2660_v7, 23  ;;  %v2742_v27 = vmul.u32 %v10556_v21, %v2726_v12 }
 0x2f1   :  { %v2582_v2 = vsel %vm2571_vm13, nan, %v2581_v22  ;;  %v5930_v14 = vsel %vm2571_vm13, nan, %v5929_v30  ;;  %vm2744_vm0 = vc.u32 %v10603_v35, %v10590_v8  ;;  %v2803_v46 = vsel %vm2802_vm15, %v2801_v57, 0  ;;  %v10652_v30 = vpop.f32.mrb[20].mxu0 }
 0x2f2   :  { %4674 = vst [vmem:[#allocation7 + $0xa8] sm:$0xff] %v2582_v2  ;;  %8002 = vst [vmem:[#allocation7 + $0xb8] sm:$0xff] %v5930_v14  ;;  %v2662_v54 = vor.u32 4788187, %v2661_v45  ;;  %v2746_v25 = vsel %vm2744_vm0, %v2745_v9, %v10591_v52  ;;  %v2676_v47 = vadd.s32 3, %v2672_v51  ;;  %v2805_v26 = vand.u32 31, %v2803_v46 }
 0x2f3   :  { %v2747_v42 = vadd.s32 %v2746_v25, %v2742_v27  ;;  %v2798_v18 = vand.u32 8388607, %v2791_v17  ;;  %v2665_v36 = vcvt.s32.f32 %v2658_v15  ;;  %v10630_v61 = vand.u32 3, %v2672_v51  ;;  %v10656_v32 = vpop.f32.mrb[21].mxu0 }
 0x2f4   :  { %v2663_v6 = vand.u32 2147483647, %v2662_v54  ;;  %v2806_v0 = vsub.s32 32, %v2805_v26  ;;  %v10628_v4 = vand.u32 3, %v2676_v47  ;;  %vm2689_vm1 = vcmp.lt.s32.totalorder %v10389_v19, 0 }
 0x2f5   :  { %v2748_v1 = vadd.s32 536870912, %v2747_v42  ;;  %v2799_v12 = vor.u32 8388608, %v2798_v18  ;;  %v10636_v24 = vshrl.u32 %v2803_v46, 5  ;;  %v2808_v13 = vshll.u32 %v8832_v28, %v2805_v26 }
 0x2f6   :  { %v2666_v21 = vmul.f32 %v2665_v36, %v2663_v6  ;;  %v2809_v52 = vshrl.u32 %v8833_v34, %v2806_v0  ;;  %v2812_v20 = vshrl.u32 %v8834_v38, %v2806_v0  ;;  %v2818_v23 = vshrl.u32 %v8836_v16, %v2806_v0 }
 0x2f7   :  { %v2749_v63 = vshrl.u32 %v2748_v1, 30  ;;  %v2815_v10 = vshrl.u32 %v8835_v40, %v2806_v0  ;;  %v2811_v43 = vshll.u32 %v8833_v34, %v2805_v26  ;;  %v2817_v57 = vshll.u32 %v8835_v40, %v2805_v26 }
 0x2f8   :  { %v2667_v3 = vxor.u32 2147483648, %v2666_v21  ;;  %v2821_v39 = vshrl.u32 %v8837_v53, %v2806_v0  ;;  %v2814_v7 = vshll.u32 %v8834_v38, %v2805_v26  ;;  %v2820_v5 = vshll.u32 %v8836_v16, %v2805_v26 }
 0x2f9   :  { %v2750_v33 = vshll.u32 %v2749_v63, 30  ;;  %v2810_v58 = vor.u32 %v2809_v52, %v2808_v13  ;;  %v2813_v9 = vor.u32 %v2812_v20, %v2811_v43  ;;  %v2819_v22 = vor.u32 %v2818_v23, %v2817_v57 }
 0x2fa   :  { %v2668_v51 = vsel %vm2585_vm2, %v2667_v3, %v2666_v21  ;;  %v2816_v45 = vor.u32 %v2815_v10, %v2814_v7  ;;  %v2898_v2 = vand.u32 2139095040, %v10519_v48  ;;  %vm10660_vm2 = vcmp.le.f32.partialorder %v2687_v41, 0.7853982 }
 0x2fb   :  { %v2671_v49 = vsel %vm10548_vm3, %v10280_v44, %v2668_v51  ;;  %v10648_v50 = vsub.s32 %v2747_v42, %v2750_v33  ;;  %v2743_v27 = vadd.s32 %v10590_v8, %v10603_v35  ;;  %v2773_v54 = vsub.s32 4, %v2749_v63  ;;  %v10671_v42 = vpop.f32.mrb[20].mxu1 }
 0x2fc   :  { %8673 = vcosq.f32 %v2671_v49  ;;  %v2822_v25 = vor.u32 %v2821_v39, %v2820_v5  ;;  %vm2823_vm3 = vcmp.lt.s32.totalorder %v10636_v24, 1  ;;  %vm2826_vm4 = vcmp.lt.s32.totalorder %v10636_v24, 4 }
 0x2fd   :  { %8675 = vsinq.f32 %v2671_v49  ;;  %v2753_v15 = vsub.s32 0, %v10648_v50  ;;  %v10669_v47 = vshll.u32 %v2799_v12, 8  ;;  %vm2682_vm5 = vcmp.eq.s32.totalorder %v10628_v4, 2 }
 0x2fe   :  { %vm6029_vm6 = vcmp.eq.s32.totalorder %v10630_v61, 2  ;;  %v2807_v41 = vshrl.u32 %v8832_v28, %v2806_v0  ;;  %vm2825_vm7 = vcmp.lt.s32.totalorder %v10636_v24, 3  ;;  %v2831_v8 = vsel %vm2823_vm3, %v2810_v58, %v2813_v9 }
 0x2ff   :  { %v8094_v46 = vmin.u32 %v2753_v15, %v10648_v50  ;;  %v2832_v35 = vsel %vm2826_vm4, %v2819_v22, 920167782  ;;  %vm2679_vm8 = vcmp.eq.s32.totalorder %v10628_v4, 0  ;;  %vm6026_vm9 = vcmp.eq.s32.totalorder %v10630_v61, 0 }
 0x300   :  { %v2828_v26 = vsel %vm2826_vm4, %v2816_v45, 2102212464  ;;  %v2835_v6 = vsel %vm2823_vm3, %v2813_v9, %v2816_v45  ;;  %v2899_v36 = vshrl.u32 %v2898_v2, 23  ;;  %vm2678_vm10 = vcmp.lt.s32.totalorder %v10628_v4, 2 }
 0x301   :  { %v2755_v18 = vclz %v8094_v46  ;;  %vm6025_vm11 = vcmp.lt.s32.totalorder %v10630_v61, 2  ;;  %v2774_v1 = vsel %vm2689_vm1, %v2773_v54, %v2749_v63  ;;  %vm2824_vm12 = vcmp.lt.s32.totalorder %v10636_v24, 2 }
 0x302   :  { %v2833_v0 = vsel %vm2825_vm7, %v2816_v45, %v2832_v35  ;;  %v2836_v21 = vsel %vm2826_vm4, %v2822_v25, 1326507024  ;;  %vm2675_vm13 = vweird.f32 %v10280_v44  ;;  %v2827_v3 = vsel %vm2823_vm3, %v2807_v41, %v2810_v58 }
 0x303   :  { %v8095_v12 = vadd.s32 4294967294, %v2755_v18  ;;  %v2834_v52 = vsel %vm2824_vm12, %v2831_v8, %v2833_v0  ;;  %v2837_v63 = vsel %vm2825_vm7, %v2819_v22, %v2836_v21  ;;  %v2829_v20 = vsel %vm2825_vm7, %v2813_v9, %v2828_v26 }
 0x304   :  { %v2838_v23 = vsel %vm2824_vm12, %v2835_v6, %v2837_v63  ;;  %v10708_v33 = vmul.u32.u64.low %v10669_v47, %v2834_v52  ;;  %v10709_v13 = vmul.u32.u64.high %v10669_v47, %v2834_v52, %v10708_v33  ;;  %v8101_v43 = vadd.s32 4294967169, %v2899_v36 }
 0x305   :  { %vm8096_vm14 = vcmp.lt.s32.totalorder %v8095_v12, 0  ;;  %v10713_v10 = vmul.u32.u64.low %v10669_v47, %v2838_v23  ;;  %v10714_v51 = vmul.u32.u64.high %v10669_v47, %v2838_v23, %v10713_v10  ;;  %v2776_v49 = vsel %vm10660_vm2, 0, %v2774_v1 }
 0x306   :  { %v8674_v57 = vpop.eup %8673  ;;  %v2758_v39 = vsel %vm8096_vm14, 0, %v8095_v12  ;;  %v2895_v7 = vand.u32 2147483647, %v10519_v48  ;;  %v10721_v5 = vadd.f32 %v10215_v62, %v10224_v55  ;;  %v2830_v45 = vsel %vm2824_vm12, %v2827_v3, %v2829_v20  ;;  %v10747_v12 = vpop.f32.mrb[21].mxu1 }
 0x307   :  { %v8676_v58 = vpop.eup %8675  ;;  %v2683_v9 = vxor.u32 2147483648, %v8674_v57  ;;  %v2759_v22 = vsub.s32 32, %v2758_v39  ;;  %v2763_v15 = vsub.s32 4294967266, %v2758_v39  ;;  %v2760_v54 = vshll.u32 %v10648_v50, %v2758_v39 }
 0x308   :  { %v2680_v2 = vxor.u32 2147483648, %v8676_v58  ;;  %v2849_v25 = vadd.s32 1, %v10709_v13  ;;  %v2905_v46 = vadd.s32 1, %v8101_v43  ;;  %v2846_v18 = vmul.u32 %v10669_v47, %v2830_v45 }
 0x309   :  { %v2684_v41 = vsel %vm2682_vm5, %v2683_v9, %v8676_v58  ;;  %v6031_v62 = vsel %vm6029_vm6, %v2683_v9, %v8676_v58  ;;  %v2761_v55 = vshrl.u32 %v2743_v27, %v2759_v22  ;;  %v2764_v8 = vadd.s32 127, %v2763_v15 }
 0x30a   :  { %v2681_v35 = vsel %vm2679_vm8, %v8674_v57, %v2680_v2  ;;  %v6028_v24 = vsel %vm6026_vm9, %v8674_v57, %v2680_v2  ;;  %vm2848_vm15 = vc.u32 %v10714_v51, %v10708_v33  ;;  %vm2906_vm0 = vcmp.gt.s32.totalorder %v2905_v46, 0 }
 0x30b   :  { %v2685_v50 = vsel %vm2678_vm10, %v2681_v35, %v2684_v41  ;;  %v6032_v26 = vsel %vm6025_vm11, %v6028_v24, %v6031_v62  ;;  %v2762_v6 = vor.u32 %v2761_v55, %v2760_v54  ;;  %v2765_v27 = vshll.u32 %v2764_v8, 23 }
 0x30c   :  { %v2686_v36 = vsel %vm2675_vm13, nan, %v2685_v50  ;;  %v6033_v1 = vsel %vm2675_vm13, nan, %v6032_v26  ;;  %v2850_v0 = vsel %vm2848_vm15, %v2849_v25, %v10709_v13  ;;  %v2907_v4 = vsel %vm2906_vm0, %v2905_v46, 0 }
 0x30d   :  { %4675 = vst [vmem:[#allocation7 + $0xc0] sm:$0xff] %v2686_v36  ;;  %8003 = vst [vmem:[#allocation7 + $0xd0] sm:$0xff] %v6033_v1  ;;  %v2766_v47 = vor.u32 4788187, %v2765_v27  ;;  %v2851_v21 = vadd.s32 %v2850_v0, %v2846_v18  ;;  %v2780_v61 = vadd.s32 3, %v2776_v49  ;;  %v2909_v52 = vand.u32 31, %v2907_v4 }
 0x30e   :  { %v2902_v3 = vand.u32 8388607, %v2895_v7  ;;  %v2769_v20 = vcvt.s32.f32 %v2762_v6  ;;  %v10753_v57 = vand.u32 3, %v2776_v49  ;;  %v2908_v2 = vshrl.u32 %v2907_v4, 5 }
 0x30f   :  { %v2767_v63 = vand.u32 2147483647, %v2766_v47  ;;  %v2852_v23 = vadd.s32 536870912, %v2851_v21  ;;  %v2910_v44 = vsub.s32 32, %v2909_v52  ;;  %v10751_v13 = vand.u32 3, %v2780_v61 }
 0x310   :  { %v2903_v39 = vor.u32 8388608, %v2902_v3  ;;  %v2918_v54 = vshll.u32 %v8834_v38, %v2909_v52  ;;  %v2912_v62 = vshll.u32 %v8832_v28, %v2909_v52  ;;  %v2915_v55 = vshll.u32 %v8833_v34, %v2909_v52 }
 0x311   :  { %v2770_v10 = vmul.f32 %v2769_v20, %v2767_v63  ;;  %v2853_v43 = vshrl.u32 %v2852_v23, 30  ;;  %v2919_v58 = vshrl.u32 %v8835_v40, %v2910_v44  ;;  %v2913_v15 = vshrl.u32 %v8833_v34, %v2910_v44 }
 0x312   :  { %v2916_v45 = vshrl.u32 %v8834_v38, %v2910_v44  ;;  %v2922_v25 = vshrl.u32 %v8836_v16, %v2910_v44  ;;  %v2925_v46 = vshrl.u32 %v8837_v53, %v2910_v44  ;;  %v2921_v24 = vshll.u32 %v8835_v40, %v2909_v52 }
 0x313   :  { %v2771_v9 = vxor.u32 2147483648, %v2770_v10  ;;  %v2854_v22 = vshll.u32 %v2853_v43, 30  ;;  %v2920_v35 = vor.u32 %v2919_v58, %v2918_v54  ;;  %v2924_v18 = vshll.u32 %v8836_v16, %v2909_v52 }
 0x314   :  { %v2914_v26 = vor.u32 %v2913_v15, %v2912_v62  ;;  %v2917_v6 = vor.u32 %v2916_v45, %v2915_v55  ;;  %vm2793_vm3 = vcmp.lt.s32.totalorder %v10488_v59, 0  ;;  %v2923_v14 = vor.u32 %v2922_v25, %v2921_v24 }
 0x315   :  { %v2772_v49 = vsel %vm2689_vm1, %v2771_v9, %v2770_v10  ;;  %v10763_v41 = vsub.s32 %v2851_v21, %v2854_v22  ;;  %vm10775_vm1 = vcmp.le.f32.partialorder %v2791_v17, 0.7853982  ;;  %v2926_v36 = vor.u32 %v2925_v46, %v2924_v18 }
 0x316   :  { %v2775_v8 = vsel %vm10660_vm2, %v10389_v19, %v2772_v49  ;;  %v2911_v0 = vshrl.u32 %v8832_v28, %v2910_v44  ;;  %vm2930_vm2 = vcmp.lt.s32.totalorder %v2908_v2, 4  ;;  %v10782_v47 = vshll.u32 %v2903_v39, 8 }
 0x317   :  { %8677 = vcosq.f32 %v2775_v8  ;;  %v2857_v50 = vsub.s32 0, %v10763_v41  ;;  %v2877_v21 = vsub.s32 4, %v2853_v43  ;;  %vm2927_vm4 = vcmp.lt.s32.totalorder %v2908_v2, 1 }
 0x318   :  { %8679 = vsinq.f32 %v2775_v8  ;;  %v2932_v4 = vsel %vm2930_vm2, %v2920_v35, 2102212464  ;;  %v3002_v17 = vand.u32 2139095040, %v10721_v5  ;;  %vm2786_vm5 = vcmp.eq.s32.totalorder %v10751_v13, 2 }
 0x319   :  { %v8098_v1 = vmin.u32 %v2857_v50, %v10763_v41  ;;  %vm6132_vm6 = vcmp.eq.s32.totalorder %v10753_v57, 2  ;;  %vm2929_vm7 = vcmp.lt.s32.totalorder %v2908_v2, 3  ;;  %v2931_v3 = vsel %vm2927_vm4, %v2911_v0, %v2914_v26 }
 0x31a   :  { %v2935_v52 = vsel %vm2927_vm4, %v2914_v26, %v2917_v6  ;;  %vm2783_vm8 = vcmp.eq.s32.totalorder %v10751_v13, 0  ;;  %vm6129_vm9 = vcmp.eq.s32.totalorder %v10753_v57, 0  ;;  %v2933_v63 = vsel %vm2929_vm7, %v2917_v6, %v2932_v4 }
 0x31b   :  { %v2859_v61 = vclz %v8098_v1  ;;  %v2936_v20 = vsel %vm2930_vm2, %v2923_v14, 920167782  ;;  %v2939_v23 = vsel %vm2927_vm4, %v2917_v6, %v2920_v35  ;;  %v2940_v44 = vsel %vm2930_vm2, %v2926_v36, 1326507024 }
 0x31c   :  { %vm2782_vm10 = vcmp.lt.s32.totalorder %v10751_v13, 2  ;;  %vm6128_vm11 = vcmp.lt.s32.totalorder %v10753_v57, 2  ;;  %vm2928_vm12 = vcmp.lt.s32.totalorder %v2908_v2, 2  ;;  %v2937_v39 = vsel %vm2929_vm7, %v2920_v35, %v2936_v20 }
 0x31d   :  { %v8099_v10 = vadd.s32 4294967294, %v2859_v61  ;;  %v2941_v58 = vsel %vm2929_vm7, %v2923_v14, %v2940_v44  ;;  %vm2779_vm13 = vweird.f32 %v10389_v19  ;;  %v2878_v9 = vsel %vm2793_vm3, %v2877_v21, %v2853_v43 }
 0x31e   :  { %v2934_v22 = vsel %vm2928_vm12, %v2931_v3, %v2933_v63  ;;  %v2938_v15 = vsel %vm2928_vm12, %v2935_v52, %v2937_v39  ;;  %v2942_v45 = vsel %vm2928_vm12, %v2939_v23, %v2941_v58  ;;  %v3003_v46 = vshrl.u32 %v3002_v17, 23 }
 0x31f   :  { %vm8100_vm14 = vcmp.lt.s32.totalorder %v8099_v10, 0  ;;  %v10798_v54 = vmul.u32.u64.low %v10782_v47, %v2942_v45  ;;  %v10799_v25 = vmul.u32.u64.high %v10782_v47, %v2942_v45, %v10798_v54  ;;  %v2847_v49 = vadd.s32 %v10708_v33, %v10714_v51 }
 0x320   :  { %v2862_v2 = vsel %vm8100_vm14, 0, %v8099_v10  ;;  %v10804_v62 = vmul.u32.u64.low %v10782_v47, %v2938_v15  ;;  %v10805_v55 = vmul.u32.u64.high %v10782_v47, %v2938_v15, %v10804_v62  ;;  %v2880_v24 = vsel %vm10775_vm1, 0, %v2878_v9 }
 0x321   :  { %v8678_v8 = vpop.eup %8677  ;;  %v2863_v43 = vsub.s32 32, %v2862_v2  ;;  %v2867_v35 = vsub.s32 4294967266, %v2862_v2  ;;  %v2999_v18 = vand.u32 2147483647, %v10721_v5  ;;  %v2950_v6 = vmul.u32 %v10782_v47, %v2934_v22 }
 0x322   :  { %v8680_v50 = vpop.eup %8679  ;;  %v2787_v26 = vxor.u32 2147483648, %v8678_v8  ;;  %v8105_v14 = vadd.s32 4294967169, %v3003_v46  ;;  %v10814_v33 = vadd.f32 %v10217_v37, %v10317_v31  ;;  %v2864_v36 = vshll.u32 %v10763_v41, %v2862_v2  ;;  %v10840_v46 = vpop.f32.mrb[22].mxu0 }
 0x323   :  { %v2784_v51 = vxor.u32 2147483648, %v8680_v50  ;;  %v2865_v1 = vshrl.u32 %v2847_v49, %v2863_v43  ;;  %v2868_v0 = vadd.s32 127, %v2867_v35  ;;  %vm2952_vm15 = vc.u32 %v10799_v25, %v10804_v62  ;;  %v10846_v43 = vpop.f32.mrb[23].mxu0 }
 0x324   :  { %v2788_v21 = vsel %vm2786_vm5, %v2787_v26, %v8680_v50  ;;  %v6134_v4 = vsel %vm6132_vm6, %v2787_v26, %v8680_v50  ;;  %v2953_v47 = vadd.s32 1, %v10805_v55  ;;  %v3009_v63 = vadd.s32 1, %v8105_v14 }
 0x325   :  { %v2785_v37 = vsel %vm2783_vm8, %v8678_v8, %v2784_v51  ;;  %v6131_v31 = vsel %vm6129_vm9, %v8678_v8, %v2784_v51  ;;  %v2866_v41 = vor.u32 %v2865_v1, %v2864_v36  ;;  %v2869_v17 = vshll.u32 %v2868_v0, 23  ;;  %v10857_v1 = vpop.f32.mrb[22].mxu1 }
 0x326   :  { %v2789_v61 = vsel %vm2782_vm10, %v2785_v37, %v2788_v21  ;;  %v6135_v3 = vsel %vm6128_vm11, %v6131_v31, %v6134_v4  ;;  %v2954_v52 = vsel %vm2952_vm15, %v2953_v47, %v10805_v55  ;;  %v2884_v10 = vadd.s32 3, %v2880_v24 }
 0x327   :  { %v2790_v20 = vsel %vm2779_vm13, nan, %v2789_v61  ;;  %v6136_v23 = vsel %vm2779_vm13, nan, %v6135_v3  ;;  %v2870_v44 = vor.u32 4788187, %v2869_v17  ;;  %v2955_v39 = vadd.s32 %v2954_v52, %v2950_v6 }
 0x328   :  { %4676 = vst [vmem:[#allocation7 + $0xc8] sm:$0xff] %v2790_v20  ;;  %8004 = vst [vmem:[#allocation7 + $0xd8] sm:$0xff] %v6136_v23  ;;  %vm3010_vm0 = vcmp.gt.s32.totalorder %v3009_v63, 0  ;;  %v2873_v58 = vcvt.s32.f32 %v2866_v41  ;;  %v3006_v57 = vand.u32 8388607, %v2999_v18  ;;  %vm2897_vm2 = vcmp.lt.s32.totalorder %v10519_v48, 0 }
 0x329   :  { %v2871_v13 = vand.u32 2147483647, %v2870_v44  ;;  %v3011_v9 = vsel %vm3010_vm0, %v3009_v63, 0  ;;  %v2956_v22 = vadd.s32 536870912, %v2955_v39  ;;  %v10842_v2 = vand.u32 3, %v2884_v10 }
 0x32a   :  { %v3013_v15 = vand.u32 31, %v3011_v9  ;;  %v10844_v55 = vand.u32 3, %v2880_v24  ;;  %v3007_v8 = vor.u32 8388608, %v3006_v57  ;;  %v10848_v50 = vshrl.u32 %v3011_v9, 5 }
 0x32b   :  { %v2874_v45 = vmul.f32 %v2873_v58, %v2871_v13  ;;  %v2957_v54 = vshrl.u32 %v2956_v22, 30  ;;  %v3106_v6 = vand.u32 2139095040, %v10814_v33  ;;  %v2951_v44 = vadd.s32 %v10804_v62, %v10799_v25 }
 0x32c   :  { %v3014_v19 = vsub.s32 32, %v3013_v15  ;;  %v3016_v4 = vshll.u32 %v8832_v28, %v3013_v15  ;;  %v3019_v47 = vshll.u32 %v8833_v34, %v3013_v15  ;;  %v3022_v31 = vshll.u32 %v8834_v38, %v3013_v15 }
 0x32d   :  { %v2875_v49 = vxor.u32 2147483648, %v2874_v45  ;;  %v2958_v35 = vshll.u32 %v2957_v54, 30  ;;  %v2981_v37 = vsub.s32 4, %v2957_v54  ;;  %v3025_v41 = vshll.u32 %v8835_v40, %v3013_v15 }
 0x32e   :  { %v3017_v26 = vshrl.u32 %v8833_v34, %v3014_v19  ;;  %v3020_v51 = vshrl.u32 %v8834_v38, %v3014_v19  ;;  %v3023_v36 = vshrl.u32 %v8835_v40, %v3014_v19  ;;  %v3026_v24 = vshrl.u32 %v8836_v16, %v3014_v19 }
 0x32f   :  { %v2876_v14 = vsel %vm2793_vm3, %v2875_v49, %v2874_v45  ;;  %v10862_v21 = vsub.s32 %v2955_v39, %v2958_v35  ;;  %vm10870_vm3 = vcmp.le.f32.partialorder %v2895_v7, 0.7853982  ;;  %v3028_v3 = vshll.u32 %v8836_v16, %v3013_v15 }
 0x330   :  { %v2879_v0 = vsel %vm10775_vm1, %v10488_v59, %v2876_v14  ;;  %v3018_v61 = vor.u32 %v3017_v26, %v3016_v4  ;;  %v3021_v52 = vor.u32 %v3020_v51, %v3019_v47  ;;  %v3024_v63 = vor.u32 %v3023_v36, %v3022_v31 }
 0x331   :  { %8681 = vcosq.f32 %v2879_v0  ;;  %v2961_v27 = vsub.s32 0, %v10862_v21  ;;  %v3027_v20 = vor.u32 %v3026_v24, %v3025_v41  ;;  %v3029_v23 = vshrl.u32 %v8837_v53, %v3014_v19 }
 0x332   :  { %8683 = vsinq.f32 %v2879_v0  ;;  %v10880_v39 = vshll.u32 %v3007_v8, 8  ;;  %v3107_v7 = vshrl.u32 %v3106_v6, 23  ;;  %vm2890_vm1 = vcmp.eq.s32.totalorder %v10842_v2, 2 }
 0x333   :  { %v8102_v10 = vmin.u32 %v2961_v27, %v10862_v21  ;;  %vm6235_vm4 = vcmp.eq.s32.totalorder %v10844_v55, 2  ;;  %v2982_v13 = vsel %vm2897_vm2, %v2981_v37, %v2957_v54  ;;  %v3015_v58 = vshrl.u32 %v8832_v28, %v3014_v19 }
 0x334   :  { %v3030_v57 = vor.u32 %v3029_v23, %v3028_v3  ;;  %vm3031_vm5 = vcmp.lt.s32.totalorder %v10848_v50, 1  ;;  %vm2887_vm6 = vcmp.eq.s32.totalorder %v10842_v2, 0  ;;  %vm6232_vm7 = vcmp.eq.s32.totalorder %v10844_v55, 0 }
 0x335   :  { %v2963_v25 = vclz %v8102_v10  ;;  %vm3032_vm8 = vcmp.lt.s32.totalorder %v10848_v50, 2  ;;  %vm3033_vm9 = vcmp.lt.s32.totalorder %v10848_v50, 3  ;;  %vm3034_vm10 = vcmp.lt.s32.totalorder %v10848_v50, 4 }
 0x336   :  { %vm2886_vm11 = vcmp.lt.s32.totalorder %v10842_v2, 2  ;;  %vm6231_vm12 = vcmp.lt.s32.totalorder %v10844_v55, 2  ;;  %v3035_v62 = vsel %vm3031_vm5, %v3015_v58, %v3018_v61  ;;  %v3036_v9 = vsel %vm3034_vm10, %v3024_v63, 2102212464 }
 0x337   :  { %v3039_v22 = vsel %vm3031_vm5, %v3018_v61, %v3021_v52  ;;  %v3040_v15 = vsel %vm3034_vm10, %v3027_v20, 920167782  ;;  %vm2883_vm13 = vweird.f32 %v10488_v59  ;;  %v8103_v45 = vadd.s32 4294967294, %v2963_v25 }
 0x338   :  { %v3037_v54 = vsel %vm3033_vm9, %v3021_v52, %v3036_v9  ;;  %v3041_v19 = vsel %vm3033_vm9, %v3024_v63, %v3040_v15  ;;  %v3043_v49 = vsel %vm3031_vm5, %v3021_v52, %v3024_v63  ;;  %v3044_v35 = vsel %vm3034_vm10, %v3030_v57, 1326507024 }
 0x339   :  { %v3042_v8 = vsel %vm3032_vm8, %v3039_v22, %v3041_v19  ;;  %v3103_v26 = vand.u32 2147483647, %v10814_v33  ;;  %v8109_v6 = vadd.s32 4294967169, %v3107_v7  ;;  %vm8104_vm14 = vcmp.lt.s32.totalorder %v8103_v45, 0 }
 0x33a   :  { %v3045_v14 = vsel %vm3033_vm9, %v3027_v20, %v3044_v35  ;;  %v10912_v51 = vmul.u32.u64.low %v10880_v39, %v3042_v8  ;;  %v10913_v36 = vmul.u32.u64.high %v10880_v39, %v3042_v8, %v10912_v51  ;;  %v2966_v0 = vsel %vm8104_vm14, 0, %v8103_v45 }
 0x33b   :  { %v8682_v24 = vpop.eup %8681  ;;  %v2984_v4 = vsel %vm10870_vm3, 0, %v2982_v13  ;;  %v3038_v47 = vsel %vm3032_vm8, %v3035_v62, %v3037_v54  ;;  %v3046_v37 = vsel %vm3032_vm8, %v3043_v49, %v3045_v14  ;;  %v2967_v27 = vsub.s32 32, %v2966_v0 }
 0x33c   :  { %v8684_v31 = vpop.eup %8683  ;;  %v2891_v41 = vxor.u32 2147483648, %v8682_v24  ;;  %v2968_v61 = vshll.u32 %v10862_v21, %v2966_v0  ;;  %v2971_v3 = vsub.s32 4294967266, %v2966_v0  ;;  %v3113_v23 = vadd.s32 1, %v8109_v6 }
 0x33d   :  { %v2888_v52 = vxor.u32 2147483648, %v8684_v31  ;;  %v10924_v63 = vmul.u32.u64.low %v10880_v39, %v3046_v37  ;;  %v10925_v20 = vmul.u32.u64.high %v10880_v39, %v3046_v37, %v10924_v63  ;;  %v2969_v50 = vshrl.u32 %v2951_v44, %v2967_v27 }
 0x33e   :  { %v2892_v10 = vsel %vm2890_vm1, %v2891_v41, %v8684_v31  ;;  %v6237_v7 = vsel %vm6235_vm4, %v2891_v41, %v8684_v31  ;;  %v2972_v13 = vadd.s32 127, %v2971_v3  ;;  %v3057_v57 = vadd.s32 1, %v10913_v36 }
 0x33f   :  { %v2889_v58 = vsel %vm2887_vm6, %v8682_v24, %v2888_v52  ;;  %v6234_v21 = vsel %vm6232_vm7, %v8682_v24, %v2888_v52  ;;  %vm3114_vm15 = vcmp.gt.s32.totalorder %v3113_v23, 0  ;;  %v2970_v9 = vor.u32 %v2969_v50, %v2968_v61 }
 0x340   :  { %v2893_v25 = vsel %vm2886_vm11, %v2889_v58, %v2892_v10  ;;  %v6238_v62 = vsel %vm6231_vm12, %v6234_v21, %v6237_v7  ;;  %v2973_v22 = vshll.u32 %v2972_v13, 23  ;;  %v3054_v45 = vmul.u32 %v10880_v39, %v3038_v47  ;;  %v10981_v10 = vpop.f32.mrb[23].mxu1 }
 0x341   :  { %v2894_v44 = vsel %vm2883_vm13, nan, %v2893_v25  ;;  %v6239_v15 = vsel %vm2883_vm13, nan, %v6238_v62  ;;  %vm3056_vm0 = vc.u32 %v10925_v20, %v10912_v51  ;;  %v3110_v55 = vand.u32 8388607, %v3103_v26 }
 0x342   :  { %4677 = vst [vmem:[#allocation7 + $0xe0] sm:$0xff] %v2894_v44  ;;  %8005 = vst [vmem:[#allocation7 + $0xf0] sm:$0xff] %v6239_v15  ;;  %v2974_v2 = vor.u32 4788187, %v2973_v22  ;;  %v3058_v54 = vsel %vm3056_vm0, %v3057_v57, %v10913_v36  ;;  %v3115_v19 = vsel %vm3114_vm15, %v3113_v23, 0  ;;  %v2977_v49 = vcvt.s32.f32 %v2970_v9 }
 0x343   :  { %v2988_v8 = vadd.s32 3, %v2984_v4  ;;  %v3059_v35 = vadd.s32 %v3058_v54, %v3054_v45  ;;  %v3117_v6 = vand.u32 31, %v3115_v19  ;;  %v10952_v39 = vadd.f32 %v10426_v56, %v10433_v29 }
 0x344   :  { %v2975_v59 = vand.u32 2147483647, %v2974_v2  ;;  %v10956_v14 = vadd.f32 %v10428_v11, %v10535_v60  ;;  %v10960_v36 = vadd.f32 %v10652_v30, %v10671_v42  ;;  %v10964_v31 = vand.u32 3, %v2984_v4 }
 0x345   :  { %v3060_v24 = vadd.s32 536870912, %v3059_v35  ;;  %v3118_v0 = vsub.s32 32, %v3117_v6  ;;  %v10962_v37 = vand.u32 3, %v2988_v8  ;;  %v3111_v27 = vor.u32 8388608, %v3110_v55 }
 0x346   :  { %v2978_v47 = vmul.f32 %v2977_v49, %v2975_v59  ;;  %v10972_v42 = vshrl.u32 %v3115_v19, 5  ;;  %v3120_v61 = vshll.u32 %v8832_v28, %v3117_v6  ;;  %v3123_v52 = vshll.u32 %v8833_v34, %v3117_v6 }
 0x347   :  { %v10966_v41 = vshrl.u32 %v3060_v24, 30  ;;  %v3121_v29 = vshrl.u32 %v8833_v34, %v3118_v0  ;;  %v3124_v11 = vshrl.u32 %v8834_v38, %v3118_v0  ;;  %v3130_v60 = vshrl.u32 %v8836_v16, %v3118_v0 }
 0x348   :  { %v2979_v56 = vxor.u32 2147483648, %v2978_v47  ;;  %v3127_v3 = vshrl.u32 %v8835_v40, %v3118_v0  ;;  %v3129_v63 = vshll.u32 %v8835_v40, %v3117_v6  ;;  %v3133_v23 = vshrl.u32 %v8837_v53, %v3118_v0 }
 0x349   :  { %v3062_v30 = vshll.u32 %v10966_v41, 30  ;;  %v3126_v13 = vshll.u32 %v8834_v38, %v3117_v6  ;;  %v3132_v58 = vshll.u32 %v8836_v16, %v3117_v6  ;;  %v3122_v21 = vor.u32 %v3121_v29, %v3120_v61 }
 0x34a   :  { %v2980_v4 = vsel %vm2897_vm2, %v2979_v56, %v2978_v47  ;;  %v3125_v57 = vor.u32 %v3124_v11, %v3123_v52  ;;  %v3131_v25 = vor.u32 %v3130_v60, %v3129_v63  ;;  %vm3001_vm2 = vcmp.lt.s32.totalorder %v10721_v5, 0 }
 0x34b   :  { %v2983_v7 = vsel %vm10870_vm3, %v10519_v48, %v2980_v4  ;;  %v10986_v50 = vsub.s32 %v3059_v35, %v3062_v30  ;;  %v3128_v9 = vor.u32 %v3127_v3, %v3126_v13  ;;  %v3134_v22 = vor.u32 %v3133_v23, %v3132_v58 }
 0x34c   :  { %8685 = vcosq.f32 %v2983_v7  ;;  %vm3135_vm3 = vcmp.lt.s32.totalorder %v10972_v42, 1  ;;  %vm3138_vm1 = vcmp.lt.s32.totalorder %v10972_v42, 4  ;;  %vm2994_vm4 = vcmp.eq.s32.totalorder %v10962_v37, 2 }
 0x34d   :  { %8687 = vsinq.f32 %v2983_v7  ;;  %v3065_v62 = vsub.s32 0, %v10986_v50  ;;  %vm6338_vm5 = vcmp.eq.s32.totalorder %v10964_v31, 2  ;;  %v3119_v44 = vshrl.u32 %v8832_v28, %v3118_v0 }
 0x34e   :  { %v3143_v15 = vsel %vm3135_vm3, %v3122_v21, %v3125_v57  ;;  %v3144_v45 = vsel %vm3138_vm1, %v3131_v25, 920167782  ;;  %v3151_v2 = vshll.u32 %v3111_v27, 8  ;;  %vm2991_vm6 = vcmp.eq.s32.totalorder %v10962_v37, 0 }
 0x34f   :  { %v8106_v17 = vmin.u32 %v3065_v62, %v10986_v50  ;;  %vm6335_vm7 = vcmp.eq.s32.totalorder %v10964_v31, 0  ;;  %vm3137_vm8 = vcmp.lt.s32.totalorder %v10972_v42, 3  ;;  %v3140_v55 = vsel %vm3138_vm1, %v3128_v9, 2102212464 }
 0x350   :  { %v3147_v19 = vsel %vm3135_vm3, %v3125_v57, %v3128_v9  ;;  %vm2990_vm9 = vcmp.lt.s32.totalorder %v10962_v37, 2  ;;  %vm6334_vm10 = vcmp.lt.s32.totalorder %v10964_v31, 2  ;;  %v3085_v49 = vsub.s32 4, %v10966_v41 }
 0x351   :  { %v3067_v54 = vclz %v8106_v17  ;;  %vm3136_vm11 = vcmp.lt.s32.totalorder %v10972_v42, 2  ;;  %v3145_v8 = vsel %vm3137_vm8, %v3128_v9, %v3144_v45  ;;  %v3148_v35 = vsel %vm3138_vm1, %v3134_v22, 1326507024 }
 0x352   :  { %vm2987_vm12 = vweird.f32 %v10519_v48  ;;  %v3139_v59 = vsel %vm3135_vm3, %v3119_v44, %v3122_v21  ;;  %v3146_v24 = vsel %vm3136_vm11, %v3143_v15, %v3145_v8  ;;  %v3149_v0 = vsel %vm3137_vm8, %v3131_v25, %v3148_v35 }
 0x353   :  { %v8107_v6 = vadd.s32 4294967294, %v3067_v54  ;;  %vm11022_vm13 = vcmp.le.f32.partialorder %v2999_v18, 0.7853982  ;;  %v3141_v27 = vsel %vm3137_vm8, %v3125_v57, %v3140_v55  ;;  %v3150_v56 = vsel %vm3136_vm11, %v3147_v19, %v3149_v0 }
 0x354   :  { %v11028_v29 = vmul.u32.u64.low %v3151_v2, %v3146_v24  ;;  %v11029_v11 = vmul.u32.u64.high %v3151_v2, %v3146_v24, %v11028_v29  ;;  %v3055_v60 = vadd.s32 %v10912_v51, %v10925_v20  ;;  %v3086_v4 = vsel %vm3001_vm2, %v3085_v49, %v10966_v41 }
 0x355   :  { %vm8108_vm14 = vcmp.lt.s32.totalorder %v8107_v6, 0  ;;  %v11034_v30 = vmul.u32.u64.low %v3151_v2, %v3150_v56  ;;  %v11035_v61 = vmul.u32.u64.high %v3151_v2, %v3150_v56, %v11034_v30  ;;  %v3207_v52 = vand.u32 2147483647, %v10952_v39 }
 0x356   :  { %v8686_v3 = vpop.eup %8685  ;;  %v3070_v18 = vsel %vm8108_vm14, 0, %v8107_v6  ;;  %v3210_v63 = vand.u32 2139095040, %v10952_v39  ;;  %v3142_v51 = vsel %vm3136_vm11, %v3139_v59, %v3141_v27  ;;  %v3161_v57 = vadd.s32 1, %v11029_v11 }
 0x357   :  { %v8688_v23 = vpop.eup %8687  ;;  %v2995_v7 = vxor.u32 2147483648, %v8686_v3  ;;  %v3071_v13 = vsub.s32 32, %v3070_v18  ;;  %v3075_v58 = vsub.s32 4294967266, %v3070_v18  ;;  %v3072_v21 = vshll.u32 %v10986_v50, %v3070_v18 }
 0x358   :  { %v2992_v20 = vxor.u32 2147483648, %v8688_v23  ;;  %v3211_v25 = vshrl.u32 %v3210_v63, 23  ;;  %v3158_v44 = vmul.u32 %v3151_v2, %v3142_v51  ;;  %vm3160_vm15 = vc.u32 %v11035_v61, %v11028_v29 }
 0x359   :  { %v2996_v41 = vsel %vm2994_vm4, %v2995_v7, %v8688_v23  ;;  %v6340_v62 = vsel %vm6338_vm5, %v2995_v7, %v8688_v23  ;;  %v3073_v9 = vshrl.u32 %v3055_v60, %v3071_v13  ;;  %v3076_v22 = vadd.s32 127, %v3075_v58 }
 0x35a   :  { %v2993_v17 = vsel %vm2991_vm6, %v8686_v3, %v2992_v20  ;;  %v6337_v42 = vsel %vm6335_vm7, %v8686_v3, %v2992_v20  ;;  %v3162_v49 = vsel %vm3160_vm15, %v3161_v57, %v11029_v11  ;;  %v8113_v2 = vadd.s32 4294967169, %v3211_v25  ;;  %v11070_v3 = vpop.f32.mrb[24].mxu0  ;;  %v11083_v57 = vpop.f32.mrb[24].mxu1 }
 0x35b   :  { %v2997_v50 = vsel %vm2990_vm9, %v2993_v17, %v2996_v41  ;;  %v6341_v15 = vsel %vm6334_vm10, %v6337_v42, %v6340_v62  ;;  %v3074_v45 = vor.u32 %v3073_v9, %v3072_v21  ;;  %v3077_v54 = vshll.u32 %v3076_v22, 23  ;;  %v11072_v63 = vpop.f32.mrb[25].mxu0 }
 0x35c   :  { %v2998_v55 = vsel %vm2987_vm12, nan, %v2997_v50  ;;  %v6342_v19 = vsel %vm2987_vm12, nan, %v6341_v15  ;;  %v3088_v37 = vsel %vm11022_vm13, 0, %v3086_v4  ;;  %v3163_v35 = vadd.s32 %v3162_v49, %v3158_v44 }
 0x35d   :  { %4678 = vst [vmem:[#allocation7 + $0xe8] sm:$0xff] %v2998_v55  ;;  %8006 = vst [vmem:[#allocation7 + $0xf8] sm:$0xff] %v6342_v19  ;;  %v3078_v8 = vor.u32 4788187, %v3077_v54  ;;  %v3217_v31 = vadd.s32 1, %v8113_v2  ;;  %v3081_v59 = vcvt.s32.f32 %v3074_v45  ;;  %v3092_v0 = vadd.s32 3, %v3088_v37 }
 0x35e   :  { %v3164_v24 = vadd.s32 536870912, %v3163_v35  ;;  %v3214_v27 = vand.u32 8388607, %v3207_v52  ;;  %v3314_v60 = vand.u32 2139095040, %v10956_v14  ;;  %v11076_v7 = vand.u32 3, %v3088_v37 }
 0x35f   :  { %v3079_v6 = vand.u32 2147483647, %v3078_v8  ;;  %vm3218_vm0 = vcmp.gt.s32.totalorder %v3217_v31, 0  ;;  %v11074_v23 = vand.u32 3, %v3092_v0  ;;  %vm3105_vm3 = vcmp.lt.s32.totalorder %v10814_v33, 0 }
 0x360   :  { %v3165_v56 = vshrl.u32 %v3164_v24, 30  ;;  %v3219_v11 = vsel %vm3218_vm0, %v3217_v31, 0  ;;  %v3215_v20 = vor.u32 8388608, %v3214_v27  ;;  %v3315_v21 = vshrl.u32 %v3314_v60, 23 }
 0x361   :  { %v3082_v48 = vmul.f32 %v3081_v59, %v3079_v6  ;;  %v3221_v30 = vand.u32 31, %v3219_v11  ;;  %v11088_v62 = vshrl.u32 %v3219_v11, 5  ;;  %v3159_v15 = vadd.s32 %v11028_v29, %v11035_v61 }
 0x362   :  { %v3166_v4 = vshll.u32 %v3165_v56, 30  ;;  %v3189_v41 = vsub.s32 4, %v3165_v56  ;;  %v11101_v55 = vshll.u32 %v3215_v20, 8  ;;  %vm6441_vm1 = vcmp.eq.s32.totalorder %v11076_v7, 2 }
 0x363   :  { %v3083_v18 = vxor.u32 2147483648, %v3082_v48  ;;  %v3222_v13 = vsub.s32 32, %v3221_v30  ;;  %v3224_v17 = vshll.u32 %v8832_v28, %v3221_v30  ;;  %v3227_v42 = vshll.u32 %v8833_v34, %v3221_v30 }
 0x364   :  { %v11081_v51 = vsub.s32 %v3163_v35, %v3166_v4  ;;  %v3230_v50 = vshll.u32 %v8834_v38, %v3221_v30  ;;  %v3233_v54 = vshll.u32 %v8835_v40, %v3221_v30  ;;  %v3190_v35 = vsel %vm3105_vm3, %v3189_v41, %v3165_v56 }
 0x365   :  { %v3084_v58 = vsel %vm3001_vm2, %v3083_v18, %v3082_v48  ;;  %v3225_v9 = vshrl.u32 %v8833_v34, %v3222_v13  ;;  %v3228_v44 = vshrl.u32 %v8834_v38, %v3222_v13  ;;  %v3231_v47 = vshrl.u32 %v8835_v40, %v3222_v13 }
 0x366   :  { %v3087_v25 = vsel %vm11022_vm13, %v10721_v5, %v3084_v58  ;;  %v3169_v22 = vsub.s32 0, %v11081_v51  ;;  %v3234_v8 = vshrl.u32 %v8836_v16, %v3222_v13  ;;  %vm3098_vm2 = vcmp.eq.s32.totalorder %v11074_v23, 2 }
 0x367   :  { %8689 = vcosq.f32 %v3087_v25  ;;  %v3226_v19 = vor.u32 %v3225_v9, %v3224_v17  ;;  %v3229_v49 = vor.u32 %v3228_v44, %v3227_v42  ;;  %v3232_v2 = vor.u32 %v3231_v47, %v3230_v50 }
 0x368   :  { %8691 = vsinq.f32 %v3087_v25  ;;  %v8110_v45 = vmin.u32 %v3169_v22, %v11081_v51  ;;  %v3223_v29 = vshrl.u32 %v8832_v28, %v3222_v13  ;;  %v8117_v61 = vadd.s32 4294967169, %v3315_v21 }
 0x369   :  { %vm3095_vm4 = vcmp.eq.s32.totalorder %v11074_v23, 0  ;;  %vm6438_vm5 = vcmp.eq.s32.totalorder %v11076_v7, 0  ;;  %v3235_v31 = vor.u32 %v3234_v8, %v3233_v54  ;;  %v3236_v6 = vshll.u32 %v8836_v16, %v3221_v30 }
 0x36a   :  { %v3171_v37 = vclz %v8110_v45  ;;  %v3237_v59 = vshrl.u32 %v8837_v53, %v3222_v13  ;;  %vm3239_vm6 = vcmp.lt.s32.totalorder %v11088_v62, 1  ;;  %vm3094_vm7 = vcmp.lt.s32.totalorder %v11074_v23, 2 }
 0x36b   :  { %vm6437_vm8 = vcmp.lt.s32.totalorder %v11076_v7, 2  ;;  %vm3240_vm9 = vcmp.lt.s32.totalorder %v11088_v62, 2  ;;  %vm3241_vm10 = vcmp.lt.s32.totalorder %v11088_v62, 3  ;;  %vm3242_vm11 = vcmp.lt.s32.totalorder %v11088_v62, 4 }
 0x36c   :  { %v8111_v24 = vadd.s32 4294967294, %v3171_v37  ;;  %vm3091_vm12 = vweird.f32 %v10721_v5  ;;  %v3238_v0 = vor.u32 %v3237_v59, %v3236_v6  ;;  %v3243_v27 = vsel %vm3239_vm6, %v3223_v29, %v3226_v19 }
 0x36d   :  { %v3244_v48 = vsel %vm3242_vm11, %v3232_v2, 2102212464  ;;  %v3247_v56 = vsel %vm3239_vm6, %v3226_v19, %v3229_v49  ;;  %v3248_v60 = vsel %vm3242_vm11, %v3235_v31, 920167782  ;;  %v3251_v30 = vsel %vm3239_vm6, %v3229_v49, %v3232_v2 }
 0x36e   :  { %vm8112_vm13 = vcmp.lt.s32.totalorder %v8111_v24, 0  ;;  %v3245_v11 = vsel %vm3241_vm10, %v3229_v49, %v3244_v48  ;;  %v3249_v13 = vsel %vm3241_vm10, %v3232_v2, %v3248_v60  ;;  %v3252_v58 = vsel %vm3242_vm11, %v3238_v0, 1326507024 }
 0x36f   :  { %v3174_v18 = vsel %vm8112_vm13, 0, %v8111_v24  ;;  %v3246_v4 = vsel %vm3240_vm9, %v3243_v27, %v3245_v11  ;;  %v3250_v9 = vsel %vm3240_vm9, %v3247_v56, %v3249_v13  ;;  %v3253_v42 = vsel %vm3241_vm10, %v3235_v31, %v3252_v58  ;;  %v11176_v58 = vpop.f32.mrb[25].mxu1 }
 0x370   :  { %v3175_v21 = vsub.s32 32, %v3174_v18  ;;  %v3176_v25 = vshll.u32 %v11081_v51, %v3174_v18  ;;  %v3179_v41 = vsub.s32 4294967266, %v3174_v18  ;;  %v3254_v19 = vsel %vm3240_vm9, %v3251_v30, %v3253_v42 }
 0x371   :  { %v8690_v20 = vpop.eup %8689  ;;  %v11132_v44 = vmul.u32.u64.low %v11101_v55, %v3250_v9  ;;  %v11133_v50 = vmul.u32.u64.high %v11101_v55, %v3250_v9, %v11132_v44  ;;  %v11142_v2 = vmul.u32.u64.low %v11101_v55, %v3254_v19  ;;  %v11143_v8 = vmul.u32.u64.high %v11101_v55, %v3254_v19, %v11142_v2 }
 0x372   :  { %v8692_v22 = vpop.eup %8691  ;;  %v3099_v17 = vxor.u32 2147483648, %v8690_v20  ;;  %v3177_v45 = vshrl.u32 %v3159_v15, %v3175_v21  ;;  %v3180_v54 = vadd.s32 127, %v3179_v41  ;;  %v3311_v24 = vand.u32 2147483647, %v10956_v14 }
 0x373   :  { %v3096_v47 = vxor.u32 2147483648, %v8692_v22  ;;  %v3265_v59 = vadd.s32 1, %v11133_v50  ;;  %vm11161_vm14 = vcmp.le.f32.partialorder %v3103_v26, 0.7853982  ;;  %v3262_v56 = vmul.u32 %v11101_v55, %v3246_v4 }
 0x374   :  { %v3100_v51 = vsel %vm3098_vm2, %v3099_v17, %v8692_v22  ;;  %v6443_v49 = vsel %vm6441_vm1, %v3099_v17, %v8692_v22  ;;  %v3178_v29 = vor.u32 %v3177_v45, %v3176_v25  ;;  %v3181_v31 = vshll.u32 %v3180_v54, 23 }
 0x375   :  { %v3097_v37 = vsel %vm3095_vm4, %v8690_v20, %v3096_v47  ;;  %v6440_v15 = vsel %vm6438_vm5, %v8690_v20, %v3096_v47  ;;  %v3192_v7 = vsel %vm11161_vm14, 0, %v3190_v35  ;;  %vm3264_vm15 = vc.u32 %v11143_v8, %v11132_v44 }
 0x376   :  { %v3101_v62 = vsel %vm3094_vm7, %v3097_v37, %v3100_v51  ;;  %v6444_v6 = vsel %vm6437_vm8, %v6440_v15, %v6443_v49  ;;  %v3182_v23 = vor.u32 4788187, %v3181_v31  ;;  %v3321_v11 = vadd.s32 1, %v8117_v61 }
 0x377   :  { %v3102_v0 = vsel %vm3091_vm12, nan, %v3101_v62  ;;  %v6445_v27 = vsel %vm3091_vm12, nan, %v6444_v6  ;;  %v3185_v5 = vcvt.s32.f32 %v3178_v29  ;;  %v3266_v30 = vsel %vm3264_vm15, %v3265_v59, %v11133_v50 }
 0x378   :  { %4679 = vst [vmem:[#allocation7 + $0x100] sm:$0xff] %v3102_v0  ;;  %8007 = vst [vmem:[#allocation7 + $0x110] sm:$0xff] %v6445_v27  ;;  %v3183_v60 = vand.u32 2147483647, %v3182_v23  ;;  %v3267_v18 = vadd.s32 %v3266_v30, %v3262_v56  ;;  %v3318_v26 = vand.u32 8388607, %v3311_v24  ;;  %v11174_v13 = vadd.f32 %v10656_v32, %v10747_v12 }
 0x379   :  { %vm3322_vm0 = vcmp.gt.s32.totalorder %v3321_v11, 0  ;;  %v3196_v55 = vadd.s32 3, %v3192_v7  ;;  %v3415_v21 = vand.u32 2147483647, %v10960_v36  ;;  %v3418_v25 = vand.u32 2139095040, %v10960_v36 }
 0x37a   :  { %v3186_v35 = vmul.f32 %v3185_v5, %v3183_v60  ;;  %v3323_v4 = vsel %vm3322_vm0, %v3321_v11, 0  ;;  %v3268_v20 = vadd.s32 536870912, %v3267_v18  ;;  %v3319_v22 = vor.u32 8388608, %v3318_v26 }
 0x37b   :  { %v3325_v61 = vand.u32 31, %v3323_v4  ;;  %v11182_v32 = vand.u32 3, %v3196_v55  ;;  %v11184_v12 = vand.u32 3, %v3192_v7  ;;  %v11187_v50 = vadd.s32 %v11132_v44, %v11143_v8 }
 0x37c   :  { %v3187_v41 = vxor.u32 2147483648, %v3186_v35  ;;  %v3269_v9 = vshrl.u32 %v3268_v20, 30  ;;  %v3419_v54 = vshrl.u32 %v3418_v25, 23  ;;  %v11194_v19 = vand.u32 8388607, %v3415_v21 }
 0x37d   :  { %v3326_v17 = vsub.s32 32, %v3325_v61  ;;  %v3328_v8 = vshll.u32 %v8832_v28, %v3325_v61  ;;  %v3324_v15 = vshrl.u32 %v3323_v4, 5  ;;  %v3331_v29 = vshll.u32 %v8833_v34, %v3325_v61 }
 0x37e   :  { %v3188_v42 = vsel %vm3105_vm3, %v3187_v41, %v3186_v35  ;;  %v3270_v45 = vshll.u32 %v3269_v9, 30  ;;  %vm3209_vm3 = vcmp.lt.s32.totalorder %v10952_v39, 0  ;;  %v3334_v31 = vshll.u32 %v8834_v38, %v3325_v61 }
 0x37f   :  { %v3191_v47 = vsel %vm11161_vm14, %v10814_v33, %v3188_v42  ;;  %v3329_v51 = vshrl.u32 %v8833_v34, %v3326_v17  ;;  %v3332_v49 = vshrl.u32 %v8834_v38, %v3326_v17  ;;  %v3335_v2 = vshrl.u32 %v8835_v40, %v3326_v17 }
 0x380   :  { %8693 = vcosq.f32 %v3191_v47  ;;  %v11200_v44 = vsub.s32 %v3267_v18, %v3270_v45  ;;  %v3338_v37 = vshrl.u32 %v8836_v16, %v3326_v17  ;;  %v3337_v62 = vshll.u32 %v8835_v40, %v3325_v61 }
 0x381   :  { %8695 = vsinq.f32 %v3191_v47  ;;  %v3330_v59 = vor.u32 %v3329_v51, %v3328_v8  ;;  %v3340_v0 = vshll.u32 %v8836_v16, %v3325_v61  ;;  %v11209_v27 = vshll.u32 %v3319_v22, 8 }
 0x382   :  { %v3273_v6 = vsub.s32 0, %v11200_v44  ;;  %vm3202_vm2 = vcmp.eq.s32.totalorder %v11182_v32, 2  ;;  %vm6544_vm1 = vcmp.eq.s32.totalorder %v11184_v12, 2  ;;  %v3333_v48 = vor.u32 %v3332_v49, %v3331_v29 }
 0x383   :  { %v3336_v23 = vor.u32 %v3335_v2, %v3334_v31  ;;  %v3339_v7 = vor.u32 %v3338_v37, %v3337_v62  ;;  %v3341_v56 = vshrl.u32 %v8837_v53, %v3326_v17  ;;  %vm3199_vm4 = vcmp.eq.s32.totalorder %v11182_v32, 0 }
 0x384   :  { %vm6541_vm5 = vcmp.eq.s32.totalorder %v11184_v12, 0  ;;  %v8114_v11 = vmin.u32 %v3273_v6, %v11200_v44  ;;  %v3327_v60 = vshrl.u32 %v8832_v28, %v3326_v17  ;;  %v8121_v5 = vadd.s32 4294967169, %v3419_v54 }
 0x385   :  { %v3423_v30 = vor.u32 8388608, %v11194_v19  ;;  %vm3198_vm6 = vcmp.lt.s32.totalorder %v11182_v32, 2  ;;  %vm6540_vm7 = vcmp.lt.s32.totalorder %v11184_v12, 2  ;;  %v3293_v18 = vsub.s32 4, %v3269_v9 }
 0x386   :  { %v3342_v26 = vor.u32 %v3341_v56, %v3340_v0  ;;  %vm3343_vm8 = vcmp.lt.s32.totalorder %v3324_v15, 1  ;;  %vm3344_vm9 = vcmp.lt.s32.totalorder %v3324_v15, 2  ;;  %vm3195_vm10 = vweird.f32 %v10814_v33 }
 0x387   :  { %v3275_v35 = vclz %v8114_v11  ;;  %vm3345_vm11 = vcmp.lt.s32.totalorder %v3324_v15, 3  ;;  %vm3346_vm12 = vcmp.lt.s32.totalorder %v3324_v15, 4  ;;  %v3347_v55 = vsel %vm3343_vm8, %v3327_v60, %v3330_v59 }
 0x388   :  { %v3348_v4 = vsel %vm3346_vm12, %v3336_v23, 2102212464  ;;  %v3351_v20 = vsel %vm3343_vm8, %v3330_v59, %v3333_v48  ;;  %v3352_v61 = vsel %vm3346_vm12, %v3339_v7, 920167782  ;;  %v3355_v25 = vsel %vm3343_vm8, %v3333_v48, %v3336_v23 }
 0x389   :  { %vm11224_vm13 = vcmp.le.f32.partialorder %v3207_v52, 0.7853982  ;;  %v8115_v22 = vadd.s32 4294967294, %v3275_v35  ;;  %v3349_v17 = vsel %vm3345_vm11, %v3333_v48, %v3348_v4  ;;  %v3353_v42 = vsel %vm3345_vm11, %v3336_v23, %v3352_v61 }
 0x38a   :  { %v3356_v47 = vsel %vm3346_vm12, %v3342_v26, 1326507024  ;;  %v8694_v45 = vpop.eup %8693  ;;  %v3294_v54 = vsel %vm3209_vm3, %v3293_v18, %v3269_v9  ;;  %v3350_v19 = vsel %vm3344_vm9, %v3347_v55, %v3349_v17  ;;  %v3425_v49 = vadd.s32 1, %v8121_v5 }
 0x38b   :  { %v3357_v51 = vsel %vm3345_vm11, %v3339_v7, %v3356_v47  ;;  %v8696_v2 = vpop.eup %8695  ;;  %v3203_v8 = vxor.u32 2147483648, %v8694_v45  ;;  %vm8116_vm14 = vcmp.lt.s32.totalorder %v8115_v22, 0  ;;  %v3354_v52 = vsel %vm3344_vm9, %v3351_v20, %v3353_v42 }
 0x38c   :  { %v3358_v37 = vsel %vm3344_vm9, %v3355_v25, %v3357_v51  ;;  %v3200_v29 = vxor.u32 2147483648, %v8696_v2  ;;  %v3278_v31 = vsel %vm8116_vm14, 0, %v8115_v22  ;;  %vm3426_vm15 = vcmp.gt.s32.totalorder %v3425_v49, 0 }
 0x38d   :  { %v11234_v62 = vmul.u32.u64.low %v11209_v27, %v3358_v37  ;;  %v11235_v6 = vmul.u32.u64.high %v11209_v27, %v3358_v37, %v11234_v62  ;;  %v3204_v9 = vsel %vm3202_vm2, %v3203_v8, %v8696_v2  ;;  %v6546_v59 = vsel %vm6544_vm1, %v3203_v8, %v8696_v2 }
 0x38e   :  { %v3279_v0 = vsub.s32 32, %v3278_v31  ;;  %v3280_v48 = vshll.u32 %v11200_v44, %v3278_v31  ;;  %v3201_v23 = vsel %vm3199_vm4, %v8694_v45, %v3200_v29  ;;  %v6543_v15 = vsel %vm6541_vm5, %v8694_v45, %v3200_v29 }
 0x38f   :  { %v3283_v7 = vsub.s32 4294967266, %v3278_v31  ;;  %v3205_v56 = vsel %vm3198_vm6, %v3201_v23, %v3204_v9  ;;  %v6547_v11 = vsel %vm6540_vm7, %v6543_v15, %v6546_v59  ;;  %v3427_v5 = vsel %vm3426_vm15, %v3425_v49, 0 }
 0x390   :  { %v3281_v60 = vshrl.u32 %v11187_v50, %v3279_v0  ;;  %v3206_v44 = vsel %vm3195_vm10, nan, %v3205_v56  ;;  %v6548_v18 = vsel %vm3195_vm10, nan, %v6547_v11  ;;  %v11255_v35 = vshrl.u32 %v3427_v5, 5 }
 0x391   :  { %v3284_v26 = vadd.s32 127, %v3283_v7  ;;  %4680 = vst [vmem:[#allocation7 + $0x108] sm:$0xff] %v3206_v44  ;;  %8008 = vst [vmem:[#allocation7 + $0x118] sm:$0xff] %v6548_v18  ;;  %v11258_v32 = vmul.u32.u64.low %v11209_v27, %v3354_v52  ;;  %v11259_v4 = vmul.u32.u64.high %v11209_v27, %v3354_v52, %v11258_v32  ;;  %v3429_v12 = vand.u32 31, %v3427_v5 }
 0x392   :  { %v3282_v55 = vor.u32 %v3281_v60, %v3280_v48  ;;  %v3296_v20 = vsel %vm11224_vm13, 0, %v3294_v54  ;;  %v11264_v61 = vshll.u32 %v3423_v30, 8  ;;  %v3366_v25 = vmul.u32 %v11209_v27, %v3350_v19 }
 0x393   :  { %v3285_v50 = vshll.u32 %v3284_v26, 23  ;;  %v3430_v22 = vsub.s32 32, %v3429_v12  ;;  %vm3447_vm0 = vcmp.lt.s32.totalorder %v11255_v35, 1  ;;  %vm3368_vm2 = vc.u32 %v11235_v6, %v11258_v32 }
 0x394   :  { %v3289_v33 = vcvt.s32.f32 %v3282_v55  ;;  %v3432_v42 = vshll.u32 %v8832_v28, %v3429_v12  ;;  %v3435_v47 = vshll.u32 %v8833_v34, %v3429_v12  ;;  %v3369_v45 = vadd.s32 1, %v11259_v4 }
 0x395   :  { %v3286_v17 = vor.u32 4788187, %v3285_v50  ;;  %v3433_v54 = vshrl.u32 %v8833_v34, %v3430_v22  ;;  %v3436_v30 = vshrl.u32 %v8834_v38, %v3430_v22  ;;  %v3438_v51 = vshll.u32 %v8834_v38, %v3429_v12 }
 0x396   :  { %v3439_v19 = vshrl.u32 %v8835_v40, %v3430_v22  ;;  %v3441_v49 = vshll.u32 %v8835_v40, %v3429_v12  ;;  %v3442_v2 = vshrl.u32 %v8836_v16, %v3430_v22  ;;  %v3370_v8 = vsel %vm3368_vm2, %v3369_v45, %v11259_v4 }
 0x397   :  { %v3287_v27 = vand.u32 2147483647, %v3286_v17  ;;  %v3434_v52 = vor.u32 %v3433_v54, %v3432_v42  ;;  %v3437_v37 = vor.u32 %v3436_v30, %v3435_v47  ;;  %vm3448_vm1 = vcmp.lt.s32.totalorder %v11255_v35, 2  ;;  %v11306_v42 = vpop.f32.mrb[26].mxu0 }
 0x398   :  { %v3371_v31 = vadd.s32 %v3370_v8, %v3366_v25  ;;  %v3440_v62 = vor.u32 %v3439_v19, %v3438_v51  ;;  %v3443_v9 = vor.u32 %v3442_v2, %v3441_v49  ;;  %v3444_v59 = vshll.u32 %v8836_v16, %v3429_v12  ;;  %v11314_v54 = vpop.f32.mrb[27].mxu0  ;;  %v11323_v2 = vpop.f32.mrb[26].mxu1 }
 0x399   :  { %v3290_v29 = vmul.f32 %v3289_v33, %v3287_v27  ;;  %v3445_v0 = vshrl.u32 %v8837_v53, %v3430_v22  ;;  %vm3450_vm4 = vcmp.lt.s32.totalorder %v11255_v35, 4  ;;  %v3455_v48 = vsel %vm3447_vm0, %v3434_v52, %v3437_v37 }
 0x39a   :  { %v3372_v15 = vadd.s32 536870912, %v3371_v31  ;;  %vm3449_vm5 = vcmp.lt.s32.totalorder %v11255_v35, 3  ;;  %v3456_v7 = vsel %vm3450_vm4, %v3443_v9, 920167782  ;;  %v3431_v56 = vshrl.u32 %v8832_v28, %v3430_v22 }
 0x39b   :  { %v3291_v23 = vxor.u32 2147483648, %v3290_v29  ;;  %v3446_v11 = vor.u32 %v3445_v0, %v3444_v59  ;;  %v3452_v60 = vsel %vm3450_vm4, %v3440_v62, 2102212464  ;;  %v3457_v5 = vsel %vm3449_vm5, %v3440_v62, %v3456_v7 }
 0x39c   :  { %v3373_v18 = vshrl.u32 %v3372_v15, 30  ;;  %v3458_v26 = vsel %vm3448_vm1, %v3455_v48, %v3457_v5  ;;  %v3459_v55 = vsel %vm3447_vm0, %v3437_v37, %v3440_v62  ;;  %v3300_v25 = vadd.s32 3, %v3296_v20 }
 0x39d   :  { %v3292_v44 = vsel %vm3209_vm3, %v3291_v23, %v3290_v29  ;;  %v3460_v12 = vsel %vm3450_vm4, %v3446_v11, 1326507024  ;;  %v11300_v50 = vmul.u32.u64.low %v11264_v61, %v3458_v26  ;;  %v11301_v33 = vmul.u32.u64.high %v11264_v61, %v3458_v26, %v11300_v50 }
 0x39e   :  { %v3295_v4 = vsel %vm11224_vm13, %v10952_v39, %v3292_v44  ;;  %v3374_v22 = vshll.u32 %v3373_v18, 30  ;;  %v3461_v17 = vsel %vm3449_vm5, %v3443_v9, %v3460_v12  ;;  %v3451_v47 = vsel %vm3447_vm0, %v3431_v56, %v3434_v52 }
 0x39f   :  { %8697 = vcosq.f32 %v3295_v4  ;;  %v3453_v41 = vsel %vm3449_vm5, %v3437_v37, %v3452_v60  ;;  %v3462_v45 = vsel %vm3448_vm1, %v3459_v55, %v3461_v17  ;;  %v6642_v19 = vand.u32 3, %v3296_v20 }
 0x3a0   :  { %8699 = vsinq.f32 %v3295_v4  ;;  %v11316_v30 = vsub.s32 %v3371_v31, %v3374_v22  ;;  %v11319_v51 = vmul.u32.u64.low %v11264_v61, %v3462_v45  ;;  %v11320_v27 = vmul.u32.u64.high %v11264_v61, %v3462_v45, %v11319_v51 }
 0x3a1   :  { %v3522_v49 = vand.u32 2139095040, %v11174_v13  ;;  %v3301_v8 = vand.u32 3, %v3300_v25  ;;  %v3397_v37 = vsub.s32 4, %v3373_v18  ;;  %v3454_v29 = vsel %vm3448_vm1, %v3451_v47, %v3453_v41 }
 0x3a2   :  { %v3377_v52 = vsub.s32 0, %v11316_v30  ;;  %v3473_v62 = vadd.s32 1, %v11301_v33  ;;  %v11331_v9 = vadd.f32 %v10840_v46, %v10857_v1  ;;  %v11335_v20 = vadd.f32 %v10846_v43, %v10981_v10 }
 0x3a3   :  { %v3523_v31 = vshrl.u32 %v3522_v49, 23  ;;  %vm11339_vm3 = vcmp.le.f32.partialorder %v3311_v24, 0.7853982  ;;  %vm3313_vm6 = vcmp.lt.s32.totalorder %v10956_v14, 0  ;;  %vm3299_vm7 = vweird.f32 %v10952_v39 }
 0x3a4   :  { %v8118_v35 = vmin.u32 %v3377_v52, %v11316_v30  ;;  %vm6643_vm8 = vcmp.lt.s32.totalorder %v6642_v19, 2  ;;  %vm3472_vm9 = vc.u32 %v11320_v27, %v11300_v50  ;;  %v3519_v46 = vand.u32 2147483647, %v11174_v13 }
 0x3a5   :  { %v8125_v43 = vadd.s32 4294967169, %v3523_v31  ;;  %vm6644_vm10 = vcmp.eq.s32.totalorder %v6642_v19, 0  ;;  %v3398_v10 = vsel %vm3313_vm6, %v3397_v37, %v3373_v18  ;;  %v3470_v24 = vmul.u32 %v11264_v61, %v3454_v29 }
 0x3a6   :  { %v3379_v1 = vclz %v8118_v35  ;;  %vm3302_vm11 = vcmp.lt.s32.totalorder %v3301_v8, 2  ;;  %vm6647_vm12 = vcmp.eq.s32.totalorder %v6642_v19, 2  ;;  %v3474_v0 = vsel %vm3472_vm9, %v3473_v62, %v11301_v33 }
 0x3a7   :  { %v3529_v48 = vadd.s32 1, %v8125_v43  ;;  %vm3303_vm13 = vcmp.eq.s32.totalorder %v3301_v8, 0  ;;  %vm3306_vm14 = vcmp.eq.s32.totalorder %v3301_v8, 2  ;;  %v3475_v7 = vadd.s32 %v3474_v0, %v3470_v24 }
 0x3a8   :  { %v8119_v15 = vadd.s32 4294967294, %v3379_v1  ;;  %v3367_v60 = vadd.s32 %v11258_v32, %v11235_v6  ;;  %v3400_v5 = vsel %vm11339_vm3, 0, %v3398_v10  ;;  %v3526_v18 = vand.u32 8388607, %v3519_v46 }
 0x3a9   :  { %v8698_v23 = vpop.eup %8697  ;;  %vm3530_vm15 = vcmp.gt.s32.totalorder %v3529_v48, 0  ;;  %v3476_v44 = vadd.s32 536870912, %v3475_v7  ;;  %v3404_v32 = vadd.s32 3, %v3400_v5  ;;  %vm3417_vm2 = vcmp.lt.s32.totalorder %v10960_v36, 0 }
 0x3aa   :  { %v8700_v56 = vpop.eup %8699  ;;  %v3307_v11 = vxor.u32 2147483648, %v8698_v23  ;;  %vm8120_vm0 = vcmp.lt.s32.totalorder %v8119_v15, 0  ;;  %v3531_v12 = vsel %vm3530_vm15, %v3529_v48, 0  ;;  %v3527_v8 = vor.u32 8388608, %v3526_v18 }
 0x3ab   :  { %v3304_v61 = vxor.u32 2147483648, %v8700_v56  ;;  %v3382_v4 = vsel %vm8120_vm0, 0, %v8119_v15  ;;  %v3477_v41 = vshrl.u32 %v3476_v44, 30  ;;  %v3533_v52 = vand.u32 31, %v3531_v12 }
 0x3ac   :  { %v3308_v26 = vsel %vm3306_vm14, %v3307_v11, %v8700_v56  ;;  %v6649_v55 = vsel %vm6647_vm12, %v3307_v11, %v8700_v56  ;;  %v3383_v6 = vsub.s32 32, %v3382_v4  ;;  %v3387_v47 = vsub.s32 4294967266, %v3382_v4 }
 0x3ad   :  { %v3305_v33 = vsel %vm3303_vm13, %v8698_v23, %v3304_v61  ;;  %v6646_v25 = vsel %vm6644_vm10, %v8698_v23, %v3304_v61  ;;  %v3384_v37 = vshll.u32 %v11316_v30, %v3382_v4  ;;  %v3478_v62 = vshll.u32 %v3477_v41, 30 }
 0x3ae   :  { %v3309_v22 = vsel %vm3302_vm11, %v3305_v33, %v3308_v26  ;;  %v6650_v17 = vsel %vm6643_vm8, %v6646_v25, %v6649_v55  ;;  %v3385_v49 = vshrl.u32 %v3367_v60, %v3383_v6  ;;  %v3388_v29 = vadd.s32 127, %v3387_v47  ;;  %v11390_v26 = vpop.f32.mrb[27].mxu1 }
 0x3af   :  { %v3310_v45 = vsel %vm3299_vm7, nan, %v3309_v22  ;;  %v6651_v51 = vsel %vm3299_vm7, nan, %v6650_v17  ;;  %v3534_v31 = vsub.s32 32, %v3533_v52  ;;  %v3479_v43 = vsub.s32 %v3475_v7, %v3478_v62 }
 0x3b0   :  { %4681 = vst [vmem:[#allocation7 + $0x120] sm:$0xff] %v3310_v45  ;;  %8009 = vst [vmem:[#allocation7 + $0x130] sm:$0xff] %v6651_v51  ;;  %v3386_v19 = vor.u32 %v3385_v49, %v3384_v37  ;;  %v3389_v35 = vshll.u32 %v3388_v29, 23  ;;  %v11370_v1 = vand.u32 3, %v3404_v32  ;;  %v11372_v10 = vand.u32 3, %v3400_v5 }
 0x3b1   :  { %v3501_v39 = vsub.s32 4, %v3477_v41  ;;  %v11374_v24 = vshrl.u32 %v3531_v12, 5  ;;  %v3471_v30 = vadd.s32 %v11300_v50, %v11320_v27  ;;  %v3481_v48 = vsub.s32 0, %v3479_v43 }
 0x3b2   :  { %v3390_v0 = vor.u32 4788187, %v3389_v35  ;;  %v3537_v23 = vshrl.u32 %v8833_v34, %v3534_v31  ;;  %v3536_v15 = vshll.u32 %v8832_v28, %v3533_v52  ;;  %v3540_v56 = vshrl.u32 %v8834_v38, %v3534_v31 }
 0x3b3   :  { %v11381_v11 = vshll.u32 %v3527_v8, 8  ;;  %v3626_v7 = vand.u32 2139095040, %v11331_v9  ;;  %v3393_v5 = vcvt.s32.f32 %v3386_v19  ;;  %v8122_v61 = vmin.u32 %v3481_v48, %v3479_v43 }
 0x3b4   :  { %v3391_v60 = vand.u32 2147483647, %v3390_v0  ;;  %v3543_v44 = vshrl.u32 %v8835_v40, %v3534_v31  ;;  %v3502_v18 = vsel %vm3417_vm2, %v3501_v39, %v3477_v41  ;;  %v3539_v50 = vshll.u32 %v8833_v34, %v3533_v52 }
 0x3b5   :  { %v3542_v27 = vshll.u32 %v8834_v38, %v3533_v52  ;;  %vm3551_vm1 = vcmp.lt.s32.totalorder %v11374_v24, 1  ;;  %v3483_v4 = vclz %v8122_v61  ;;  %v3538_v12 = vor.u32 %v3537_v23, %v3536_v15 }
 0x3b6   :  { %v3394_v55 = vmul.f32 %v3393_v5, %v3391_v60  ;;  %v3545_v33 = vshll.u32 %v8835_v40, %v3533_v52  ;;  %v3541_v25 = vor.u32 %v3540_v56, %v3539_v50  ;;  %v3546_v6 = vshrl.u32 %v8836_v16, %v3534_v31 }
 0x3b7   :  { %v3548_v32 = vshll.u32 %v8836_v16, %v3533_v52  ;;  %v3549_v22 = vshrl.u32 %v8837_v53, %v3534_v31  ;;  %v8123_v47 = vadd.s32 4294967294, %v3483_v4  ;;  %v3535_v41 = vshrl.u32 %v8832_v28, %v3534_v31  ;;  %v11498_v4 = vpop.f32.mrb[28].mxu1 }
 0x3b8   :  { %v3395_v17 = vxor.u32 2147483648, %v3394_v55  ;;  %v3544_v45 = vor.u32 %v3543_v44, %v3542_v27  ;;  %v3547_v51 = vor.u32 %v3546_v6, %v3545_v33  ;;  %vm3552_vm4 = vcmp.lt.s32.totalorder %v11374_v24, 2 }
 0x3b9   :  { %v3550_v49 = vor.u32 %v3549_v22, %v3548_v32  ;;  %vm3553_vm5 = vcmp.lt.s32.totalorder %v11374_v24, 3  ;;  %vm8124_vm7 = vcmp.lt.s32.totalorder %v8123_v47, 0  ;;  %vm3554_vm8 = vcmp.lt.s32.totalorder %v11374_v24, 4 }
 0x3ba   :  { %v3396_v37 = vsel %vm3313_vm6, %v3395_v17, %v3394_v55  ;;  %v3555_v52 = vsel %vm3551_vm1, %v3535_v41, %v3538_v12  ;;  %v3486_v62 = vsel %vm8124_vm7, 0, %v8123_v47  ;;  %v3559_v8 = vsel %vm3551_vm1, %v3538_v12, %v3541_v25 }
 0x3bb   :  { %v3399_v29 = vsel %vm11339_vm3, %v10956_v14, %v3396_v37  ;;  %v3560_v31 = vsel %vm3554_vm8, %v3547_v51, 920167782  ;;  %v3487_v19 = vsub.s32 32, %v3486_v62  ;;  %v3491_v35 = vsub.s32 4294967266, %v3486_v62 }
 0x3bc   :  { %8701 = vcosq.f32 %v3399_v29  ;;  %v3556_v39 = vsel %vm3554_vm8, %v3544_v45, 2102212464  ;;  %v3488_v0 = vshll.u32 %v3479_v43, %v3486_v62  ;;  %v3561_v48 = vsel %vm3553_vm5, %v3544_v45, %v3560_v31 }
 0x3bd   :  { %8703 = vsinq.f32 %v3399_v29  ;;  %v3563_v59 = vsel %vm3551_vm1, %v3541_v25, %v3544_v45  ;;  %v3489_v23 = vshrl.u32 %v3471_v30, %v3487_v19  ;;  %v3492_v15 = vadd.s32 127, %v3491_v35 }
 0x3be   :  { %v3562_v56 = vsel %vm3552_vm4, %v3559_v8, %v3561_v48  ;;  %v3564_v60 = vsel %vm3554_vm8, %v3550_v49, 1326507024  ;;  %v3557_v5 = vsel %vm3553_vm5, %v3541_v25, %v3556_v39  ;;  %v3627_v55 = vshrl.u32 %v3626_v7, 23 }
 0x3bf   :  { %v3565_v43 = vsel %vm3553_vm5, %v3547_v51, %v3564_v60  ;;  %v11426_v61 = vmul.u32.u64.low %v11381_v11, %v3562_v56  ;;  %v11427_v44 = vmul.u32.u64.high %v11381_v11, %v3562_v56, %v11426_v61  ;;  %v3490_v50 = vor.u32 %v3489_v23, %v3488_v0  ;;  %v11479_v60 = vpop.f32.mrb[28].mxu0 }
 0x3c0   :  { %v3493_v30 = vshll.u32 %v3492_v15, 23  ;;  %v3566_v27 = vsel %vm3552_vm4, %v3563_v59, %v3565_v43  ;;  %vm6747_vm3 = vcmp.eq.s32.totalorder %v11372_v10, 0  ;;  %vm11435_vm6 = vcmp.le.f32.partialorder %v3415_v21, 0.7853982 }
 0x3c1   :  { %v11440_v12 = vmul.u32.u64.low %v11381_v11, %v3566_v27  ;;  %v11441_v33 = vmul.u32.u64.high %v11381_v11, %v3566_v27, %v11440_v12  ;;  %vm6746_vm9 = vcmp.lt.s32.totalorder %v11372_v10, 2  ;;  %v3504_v6 = vsel %vm11435_vm6, 0, %v3502_v18 }
 0x3c2   :  { %v3494_v25 = vor.u32 4788187, %v3493_v30  ;;  %v3558_v7 = vsel %vm3552_vm4, %v3555_v52, %v3557_v5  ;;  %v8129_v32 = vadd.s32 4294967169, %v3627_v55  ;;  %vm3403_vm10 = vweird.f32 %v10956_v14  ;;  %v11490_v30 = vpop.f32.mrb[29].mxu0 }
 0x3c3   :  { %vm3406_vm11 = vcmp.lt.s32.totalorder %v11370_v1, 2  ;;  %vm6750_vm12 = vcmp.eq.s32.totalorder %v11372_v10, 2  ;;  %v3577_v21 = vadd.s32 1, %v11427_v44  ;;  %v3623_v22 = vand.u32 2147483647, %v11331_v9 }
 0x3c4   :  { %vm3407_vm13 = vcmp.eq.s32.totalorder %v11370_v1, 0  ;;  %v3495_v17 = vand.u32 2147483647, %v3494_v25  ;;  %v3497_v47 = vcvt.s32.f32 %v3490_v50  ;;  %v3633_v41 = vadd.s32 1, %v8129_v32 }
 0x3c5   :  { %vm3410_vm14 = vcmp.eq.s32.totalorder %v11370_v1, 2  ;;  %v3508_v24 = vadd.s32 3, %v3504_v6  ;;  %v3574_v18 = vmul.u32 %v11381_v11, %v3558_v7  ;;  %vm3576_vm15 = vc.u32 %v11441_v33, %v11426_v61 }
 0x3c6   :  { %v8702_v45 = vpop.eup %8701  ;;  %v3498_v51 = vmul.f32 %v3497_v47, %v3495_v17  ;;  %v3578_v49 = vsel %vm3576_vm15, %v3577_v21, %v11427_v44  ;;  %vm3634_vm0 = vcmp.gt.s32.totalorder %v3633_v41, 0  ;;  %v11461_v37 = vadd.f32 %v11070_v3, %v11083_v57 }
 0x3c7   :  { %v8704_v52 = vpop.eup %8703  ;;  %v3411_v29 = vxor.u32 2147483648, %v8702_v45  ;;  %v3579_v62 = vadd.s32 %v3578_v49, %v3574_v18  ;;  %v3630_v8 = vand.u32 8388607, %v3623_v22  ;;  %v3635_v31 = vsel %vm3634_vm0, %v3633_v41, 0 }
 0x3c8   :  { %v3408_v11 = vxor.u32 2147483648, %v8704_v52  ;;  %v3499_v19 = vxor.u32 2147483648, %v3498_v51  ;;  %v11465_v35 = vand.u32 3, %v3504_v6  ;;  %v3637_v39 = vand.u32 31, %v3635_v31 }
 0x3c9   :  { %v3412_v0 = vsel %vm3410_vm14, %v3411_v29, %v8704_v52  ;;  %v6752_v48 = vsel %vm6750_vm12, %v3411_v29, %v8704_v52  ;;  %v11471_v3 = vand.u32 3, %v3508_v24  ;;  %v3580_v57 = vadd.s32 536870912, %v3579_v62 }
 0x3ca   :  { %v3409_v59 = vsel %vm3407_vm13, %v8702_v45, %v3408_v11  ;;  %v6749_v23 = vsel %vm6747_vm3, %v8702_v45, %v3408_v11  ;;  %v3500_v15 = vsel %vm3417_vm2, %v3499_v19, %v3498_v51  ;;  %v3638_v56 = vsub.s32 32, %v3637_v39 }
 0x3cb   :  { %v3413_v5 = vsel %vm3406_vm11, %v3409_v59, %v3412_v0  ;;  %v6753_v43 = vsel %vm6746_vm9, %v6749_v23, %v6752_v48  ;;  %v3503_v44 = vsel %vm11435_vm6, %v10960_v36, %v3500_v15  ;;  %v11488_v50 = vshrl.u32 %v3580_v57, 30 }
 0x3cc   :  { %v3414_v27 = vsel %vm3403_vm10, nan, %v3413_v5  ;;  %v6754_v55 = vsel %vm3403_vm10, nan, %v6753_v43  ;;  %8705 = vcosq.f32 %v3503_v44  ;;  %v3730_v1 = vand.u32 2139095040, %v11335_v20 }
 0x3cd   :  { %4682 = vst [vmem:[#allocation7 + $0x128] sm:$0xff] %v3414_v27  ;;  %8010 = vst [vmem:[#allocation7 + $0x138] sm:$0xff] %v6754_v55  ;;  %8707 = vsinq.f32 %v3503_v44  ;;  %v3582_v10 = vshll.u32 %v11488_v50, 30  ;;  %v3631_v12 = vor.u32 8388608, %v3630_v8  ;;  %v3641_v25 = vshrl.u32 %v8833_v34, %v3638_v56 }
 0x3ce   :  { %v3644_v7 = vshrl.u32 %v8834_v38, %v3638_v56  ;;  %vm3514_vm2 = vcmp.eq.s32.totalorder %v11471_v3, 2  ;;  %vm6853_vm1 = vcmp.eq.s32.totalorder %v11465_v35, 2  ;;  %v3640_v14 = vshll.u32 %v8832_v28, %v3637_v39 }
 0x3cf   :  { %v11501_v6 = vsub.s32 %v3579_v62, %v3582_v10  ;;  %v3647_v32 = vshrl.u32 %v8835_v40, %v3638_v56  ;;  %v3650_v21 = vshrl.u32 %v8836_v16, %v3638_v56  ;;  %v3731_v17 = vshrl.u32 %v3730_v1, 23 }
 0x3d0   :  { %vm3511_vm4 = vcmp.eq.s32.totalorder %v11471_v3, 0  ;;  %vm6850_vm5 = vcmp.eq.s32.totalorder %v11465_v35, 0  ;;  %v11512_v41 = vshrl.u32 %v3635_v31, 5  ;;  %v3643_v24 = vshll.u32 %v8833_v34, %v3637_v39 }
 0x3d1   :  { %v3585_v47 = vsub.s32 0, %v11501_v6  ;;  %v3649_v18 = vshll.u32 %v8835_v40, %v3637_v39  ;;  %vm3510_vm7 = vcmp.lt.s32.totalorder %v11471_v3, 2  ;;  %vm6849_vm8 = vcmp.lt.s32.totalorder %v11465_v35, 2 }
 0x3d2   :  { %v3642_v45 = vor.u32 %v3641_v25, %v3640_v14  ;;  %v3646_v51 = vshll.u32 %v8834_v38, %v3637_v39  ;;  %v3653_v49 = vshrl.u32 %v8837_v53, %v3638_v56  ;;  %v11520_v52 = vshll.u32 %v3631_v12, 8 }
 0x3d3   :  { %vm3507_vm3 = vweird.f32 %v10960_v36  ;;  %v8126_v29 = vmin.u32 %v3585_v47, %v11501_v6  ;;  %v3645_v62 = vor.u32 %v3644_v7, %v3643_v24  ;;  %v3651_v8 = vor.u32 %v3650_v21, %v3649_v18 }
 0x3d4   :  { %v3652_v31 = vshll.u32 %v8836_v16, %v3637_v39  ;;  %v3575_v11 = vadd.s32 %v11426_v61, %v11441_v33  ;;  %v3639_v19 = vshrl.u32 %v8832_v28, %v3638_v56  ;;  %v3648_v0 = vor.u32 %v3647_v32, %v3646_v51 }
 0x3d5   :  { %v8133_v48 = vadd.s32 4294967169, %v3731_v17  ;;  %v3587_v57 = vclz %v8126_v29  ;;  %v3605_v59 = vsub.s32 4, %v11488_v50  ;;  %vm3655_vm6 = vcmp.lt.s32.totalorder %v11512_v41, 1 }
 0x3d6   :  { %v3654_v23 = vor.u32 %v3653_v49, %v3652_v31  ;;  %v8706_v15 = vpop.eup %8705  ;;  %vm3656_vm9 = vcmp.lt.s32.totalorder %v11512_v41, 2  ;;  %vm3657_vm10 = vcmp.lt.s32.totalorder %v11512_v41, 3  ;;  %vm3658_vm11 = vcmp.lt.s32.totalorder %v11512_v41, 4 }
 0x3d7   :  { %v3659_v39 = vsel %vm3655_vm6, %v3639_v19, %v3642_v45  ;;  %v8708_v5 = vpop.eup %8707  ;;  %v3515_v61 = vxor.u32 2147483648, %v8706_v15  ;;  %v8127_v33 = vadd.s32 4294967294, %v3587_v57  ;;  %v3663_v56 = vsel %vm3655_vm6, %v3642_v45, %v3645_v62 }
 0x3d8   :  { %v3664_v43 = vsel %vm3658_vm11, %v3651_v8, 920167782  ;;  %v3512_v44 = vxor.u32 2147483648, %v8708_v5  ;;  %v3660_v27 = vsel %vm3658_vm11, %v3648_v0, 2102212464  ;;  %v3667_v1 = vsel %vm3655_vm6, %v3645_v62, %v3648_v0 }
 0x3d9   :  { %v3665_v55 = vsel %vm3657_vm10, %v3648_v0, %v3664_v43  ;;  %v3516_v10 = vsel %vm3514_vm2, %v3515_v61, %v8708_v5  ;;  %v6855_v12 = vsel %vm6853_vm1, %v3515_v61, %v8708_v5  ;;  %vm8128_vm12 = vcmp.lt.s32.totalorder %v8127_v33, 0 }
 0x3da   :  { %v3668_v25 = vsel %vm3658_vm11, %v3654_v23, 1326507024  ;;  %v3513_v7 = vsel %vm3511_vm4, %v8706_v15, %v3512_v44  ;;  %v6852_v14 = vsel %vm6850_vm5, %v8706_v15, %v3512_v44  ;;  %v3590_v32 = vsel %vm8128_vm12, 0, %v8127_v33 }
 0x3db   :  { %v3666_v21 = vsel %vm3656_vm9, %v3663_v56, %v3665_v55  ;;  %v3517_v17 = vsel %vm3510_vm7, %v3513_v7, %v3516_v10  ;;  %v6856_v47 = vsel %vm6849_vm8, %v6852_v14, %v6855_v12  ;;  %v3591_v24 = vsub.s32 32, %v3590_v32 }
 0x3dc   :  { %v3661_v18 = vsel %vm3657_vm10, %v3645_v62, %v3660_v27  ;;  %v3518_v45 = vsel %vm3507_vm3, nan, %v3517_v17  ;;  %v6857_v51 = vsel %vm3507_vm3, nan, %v6856_v47  ;;  %v3595_v49 = vsub.s32 4294967266, %v3590_v32 }
 0x3dd   :  { %v3669_v29 = vsel %vm3657_vm10, %v3651_v8, %v3668_v25  ;;  %4683 = vst [vmem:[#allocation7 + $0x140] sm:$0xff] %v3518_v45  ;;  %8011 = vst [vmem:[#allocation7 + $0x150] sm:$0xff] %v6857_v51  ;;  %v3593_v3 = vshrl.u32 %v3575_v11, %v3591_v24  ;;  %v11560_v31 = vmul.u32.u64.low %v11520_v52, %v3666_v21  ;;  %v11561_v19 = vmul.u32.u64.high %v11520_v52, %v3666_v21, %v11560_v31 }
 0x3de   :  { %v3670_v35 = vsel %vm3656_vm9, %v3667_v1, %v3669_v29  ;;  %v3592_v62 = vshll.u32 %v11501_v6, %v3590_v32  ;;  %v3596_v0 = vadd.s32 127, %v3595_v49  ;;  %vm3521_vm13 = vcmp.lt.s32.totalorder %v11174_v13, 0  ;;  %v11593_v1 = vpop.f32.mrb[29].mxu1 }
 0x3df   :  { %v11566_v36 = vmul.u32.u64.low %v11520_v52, %v3670_v35  ;;  %v11567_v57 = vmul.u32.u64.high %v11520_v52, %v3670_v35, %v11566_v36  ;;  %v3662_v8 = vsel %vm3656_vm9, %v3659_v39, %v3661_v18  ;;  %v3737_v11 = vadd.s32 1, %v8133_v48 }
 0x3e0   :  { %v3594_v23 = vor.u32 %v3593_v3, %v3592_v62  ;;  %v3597_v15 = vshll.u32 %v3596_v0, 23  ;;  %v3606_v5 = vsel %vm3521_vm13, %v3605_v59, %v11488_v50  ;;  %vm11577_vm14 = vcmp.le.f32.partialorder %v3519_v46, 0.7853982 }
 0x3e1   :  { %v3681_v61 = vadd.s32 1, %v11561_v19  ;;  %v3727_v33 = vand.u32 2147483647, %v11335_v20  ;;  %vm3738_vm15 = vcmp.gt.s32.totalorder %v3737_v11, 0  ;;  %v3678_v48 = vmul.u32 %v11520_v52, %v3662_v8 }
 0x3e2   :  { %v3598_v41 = vor.u32 4788187, %v3597_v15  ;;  %vm3680_vm0 = vc.u32 %v11567_v57, %v11560_v31  ;;  %v3739_v39 = vsel %vm3738_vm15, %v3737_v11, 0  ;;  %v3608_v50 = vsel %vm11577_vm14, 0, %v3606_v5 }
 0x3e3   :  { %v3682_v46 = vsel %vm3680_vm0, %v3681_v61, %v11561_v19  ;;  %v3741_v59 = vand.u32 31, %v3739_v39  ;;  %v3601_v43 = vcvt.s32.f32 %v3594_v23  ;;  %v11591_v27 = vadd.f32 %v11072_v63, %v11176_v58 }
 0x3e4   :  { %v3599_v56 = vand.u32 2147483647, %v3598_v41  ;;  %v3683_v44 = vadd.s32 %v3682_v46, %v3678_v48  ;;  %v3612_v10 = vadd.s32 3, %v3608_v50  ;;  %v3734_v25 = vand.u32 8388607, %v3727_v33 }
 0x3e5   :  { %v3742_v55 = vsub.s32 32, %v3741_v59  ;;  %v3740_v7 = vshrl.u32 %v3739_v39, 5  ;;  %v3750_v32 = vshll.u32 %v8834_v38, %v3741_v59  ;;  %v3744_v24 = vshll.u32 %v8832_v28, %v3741_v59 }
 0x3e6   :  { %v3602_v52 = vmul.f32 %v3601_v43, %v3599_v56  ;;  %v3684_v12 = vadd.s32 536870912, %v3683_v44  ;;  %v3753_v45 = vshll.u32 %v8835_v40, %v3741_v59  ;;  %v3747_v3 = vshll.u32 %v8833_v34, %v3741_v59 }
 0x3e7   :  { %v3745_v14 = vshrl.u32 %v8833_v34, %v3742_v55  ;;  %v3751_v21 = vshrl.u32 %v8835_v40, %v3742_v55  ;;  %v3748_v63 = vshrl.u32 %v8834_v38, %v3742_v55  ;;  %v3754_v58 = vshrl.u32 %v8836_v16, %v3742_v55 }
 0x3e8   :  { %v3603_v17 = vxor.u32 2147483648, %v3602_v52  ;;  %v11600_v47 = vshrl.u32 %v3684_v12, 30  ;;  %v3757_v51 = vshrl.u32 %v8837_v53, %v3742_v55  ;;  %v3834_v35 = vand.u32 2139095040, %v11461_v37 }
 0x3e9   :  { %v3752_v18 = vor.u32 %v3751_v21, %v3750_v32  ;;  %v3746_v62 = vor.u32 %v3745_v14, %v3744_v24  ;;  %v3755_v0 = vor.u32 %v3754_v58, %v3753_v45  ;;  %v3756_v36 = vshll.u32 %v8836_v16, %v3741_v59 }
 0x3ea   :  { %v3604_v49 = vsel %vm3521_vm13, %v3603_v17, %v3602_v52  ;;  %v3686_v29 = vshll.u32 %v11600_v47, 30  ;;  %v3749_v11 = vor.u32 %v3748_v63, %v3747_v3  ;;  %vm3762_vm2 = vcmp.lt.s32.totalorder %v3740_v7, 4 }
 0x3eb   :  { %v3607_v19 = vsel %vm11577_vm14, %v11174_v13, %v3604_v49  ;;  %v11618_v23 = vand.u32 3, %v3608_v50  ;;  %v3758_v15 = vor.u32 %v3757_v51, %v3756_v36  ;;  %v3764_v5 = vsel %vm3762_vm2, %v3752_v18, 2102212464 }
 0x3ec   :  { %8709 = vcosq.f32 %v3607_v19  ;;  %v11616_v8 = vsub.s32 %v3683_v44, %v3686_v29  ;;  %v3613_v61 = vand.u32 3, %v3612_v10  ;;  %vm3625_vm1 = vcmp.lt.s32.totalorder %v11331_v9, 0 }
 0x3ed   :  { %8711 = vsinq.f32 %v3607_v19  ;;  %v3735_v41 = vor.u32 8388608, %v3734_v25  ;;  %v3743_v48 = vshrl.u32 %v8832_v28, %v3742_v55  ;;  %vm3759_vm4 = vcmp.lt.s32.totalorder %v3740_v7, 1 }
 0x3ee   :  { %v3689_v6 = vsub.s32 0, %v11616_v8  ;;  %vm3761_vm5 = vcmp.lt.s32.totalorder %v3740_v7, 3  ;;  %v3768_v39 = vsel %vm3762_vm2, %v3755_v0, 920167782  ;;  %v3835_v46 = vshrl.u32 %v3834_v35, 23 }
 0x3ef   :  { %v3763_v50 = vsel %vm3759_vm4, %v3743_v48, %v3746_v62  ;;  %v3765_v56 = vsel %vm3761_vm5, %v3749_v11, %v3764_v5  ;;  %v3767_v43 = vsel %vm3759_vm4, %v3746_v62, %v3749_v11  ;;  %vm6953_vm7 = vcmp.eq.s32.totalorder %v11618_v23, 0 }
 0x3f0   :  { %v8130_v59 = vmin.u32 %v3689_v6, %v11616_v8  ;;  %vm6956_vm8 = vcmp.eq.s32.totalorder %v11618_v23, 2  ;;  %v3769_v44 = vsel %vm3761_vm5, %v3752_v18, %v3768_v39  ;;  %v3771_v52 = vsel %vm3759_vm4, %v3749_v11, %v3752_v18 }
 0x3f1   :  { %v3772_v55 = vsel %vm3762_vm2, %v3758_v15, 1326507024  ;;  %vm3614_vm3 = vcmp.lt.s32.totalorder %v3613_v61, 2  ;;  %vm6952_vm6 = vcmp.lt.s32.totalorder %v11618_v23, 2  ;;  %v3709_v12 = vsub.s32 4, %v11600_v47 }
 0x3f2   :  { %v3691_v10 = vclz %v8130_v59  ;;  %vm3760_vm9 = vcmp.lt.s32.totalorder %v3740_v7, 2  ;;  %v3775_v25 = vshll.u32 %v3735_v41, 8  ;;  %vm3611_vm10 = vweird.f32 %v11174_v13  ;;  %v11678_v13 = vpop.f32.mrb[30].mxu0 }
 0x3f3   :  { %v3766_v14 = vsel %vm3760_vm9, %v3763_v50, %v3765_v56  ;;  %v3770_v32 = vsel %vm3760_vm9, %v3767_v43, %v3769_v44  ;;  %v3773_v21 = vsel %vm3761_vm5, %v3755_v0, %v3772_v55  ;;  %v8137_v17 = vadd.s32 4294967169, %v3835_v46 }
 0x3f4   :  { %vm11637_vm11 = vcmp.le.f32.partialorder %v3623_v22, 0.7853982  ;;  %v8131_v58 = vadd.s32 4294967294, %v3691_v10  ;;  %v3774_v24 = vsel %vm3760_vm9, %v3771_v52, %v3773_v21  ;;  %vm3615_vm12 = vcmp.eq.s32.totalorder %v3613_v61, 0 }
 0x3f5   :  { %v11641_v18 = vmul.u32.u64.low %v3775_v25, %v3770_v32  ;;  %v11642_v45 = vmul.u32.u64.high %v3775_v25, %v3770_v32, %v11641_v18  ;;  %v11645_v51 = vmul.u32.u64.low %v3775_v25, %v3774_v24  ;;  %v11646_v49 = vmul.u32.u64.high %v3775_v25, %v3774_v24, %v11645_v51  ;;  %v11680_v32 = vpop.f32.mrb[31].mxu0 }
 0x3f6   :  { %v3841_v29 = vadd.s32 1, %v8137_v17  ;;  %v8710_v7 = vpop.eup %8709  ;;  %vm3618_vm13 = vcmp.eq.s32.totalorder %v3613_v61, 2  ;;  %v3679_v3 = vadd.s32 %v11560_v31, %v11567_v57  ;;  %vm8132_vm14 = vcmp.lt.s32.totalorder %v8131_v58, 0 }
 0x3f7   :  { %v3831_v22 = vand.u32 2147483647, %v11461_v37  ;;  %v8712_v35 = vpop.eup %8711  ;;  %v3619_v19 = vxor.u32 2147483648, %v8710_v7  ;;  %v3694_v62 = vsel %vm8132_vm14, 0, %v8131_v58  ;;  %v3710_v0 = vsel %vm3625_vm1, %v3709_v12, %v11600_v47 }
 0x3f8   :  { %v3782_v36 = vmul.u32 %v3775_v25, %v3766_v14  ;;  %v3616_v11 = vxor.u32 2147483648, %v8712_v35  ;;  %v3695_v15 = vsub.s32 32, %v3694_v62  ;;  %v3699_v5 = vsub.s32 4294967266, %v3694_v62 }
 0x3f9   :  { %vm3842_vm15 = vcmp.gt.s32.totalorder %v3841_v29, 0  ;;  %v3620_v6 = vsel %vm3618_vm13, %v3619_v19, %v8712_v35  ;;  %v6958_v41 = vsel %vm6956_vm8, %v3619_v19, %v8712_v35  ;;  %v3696_v31 = vshll.u32 %v11616_v8, %v3694_v62 }
 0x3fa   :  { %vm3784_vm0 = vc.u32 %v11646_v49, %v11641_v18  ;;  %v3617_v57 = vsel %vm3615_vm12, %v8710_v7, %v3616_v11  ;;  %v6955_v48 = vsel %vm6953_vm7, %v8710_v7, %v3616_v11  ;;  %v3697_v47 = vshrl.u32 %v3679_v3, %v3695_v15  ;;  %v11685_v3 = vpop.f32.mrb[30].mxu1 }
 0x3fb   :  { %v3700_v39 = vadd.s32 127, %v3699_v5  ;;  %v3621_v46 = vsel %vm3614_vm3, %v3617_v57, %v3620_v6  ;;  %v6959_v59 = vsel %vm6952_vm6, %v6955_v48, %v6958_v41  ;;  %v3785_v50 = vadd.s32 1, %v11642_v45 }
 0x3fc   :  { %v3843_v56 = vsel %vm3842_vm15, %v3841_v29, 0  ;;  %v3622_v8 = vsel %vm3611_vm10, nan, %v3621_v46  ;;  %v6960_v43 = vsel %vm3611_vm10, nan, %v6959_v59  ;;  %v3698_v44 = vor.u32 %v3697_v47, %v3696_v31 }
 0x3fd   :  { %v3701_v52 = vshll.u32 %v3700_v39, 23  ;;  %4684 = vst [vmem:[#allocation7 + $0x148] sm:$0xff] %v3622_v8  ;;  %8012 = vst [vmem:[#allocation7 + $0x158] sm:$0xff] %v6960_v43  ;;  %v3712_v61 = vsel %vm11637_vm11, 0, %v3710_v0  ;;  %v3786_v23 = vsel %vm3784_vm0, %v3785_v50, %v11642_v45  ;;  %v3838_v55 = vand.u32 8388607, %v3831_v22 }
 0x3fe   :  { %v3845_v10 = vand.u32 31, %v3843_v56  ;;  %v3787_v25 = vadd.s32 %v3786_v23, %v3782_v36  ;;  %v3705_v17 = vcvt.s32.f32 %v3698_v44  ;;  %v3716_v58 = vadd.s32 3, %v3712_v61 }
 0x3ff   :  { %v3702_v12 = vor.u32 4788187, %v3701_v52  ;;  %v3839_v51 = vor.u32 8388608, %v3838_v55  ;;  %v3938_v7 = vand.u32 2139095040, %v11591_v27  ;;  %v3844_v36 = vshrl.u32 %v3843_v56, 5 }
 0x400   :  { %v3846_v14 = vsub.s32 32, %v3845_v10  ;;  %v3788_v24 = vadd.s32 536870912, %v3787_v25  ;;  %v3854_v11 = vshll.u32 %v8834_v38, %v3845_v10  ;;  %v3857_v15 = vshll.u32 %v8835_v40, %v3845_v10 }
 0x401   :  { %v3703_v21 = vand.u32 2147483647, %v3702_v12  ;;  %v3848_v31 = vshll.u32 %v8832_v28, %v3845_v10  ;;  %v3851_v57 = vshll.u32 %v8833_v34, %v3845_v10  ;;  %v11697_v48 = vand.u32 3, %v3712_v61 }
 0x402   :  { %v3849_v29 = vshrl.u32 %v8833_v34, %v3846_v14  ;;  %v3855_v45 = vshrl.u32 %v8835_v40, %v3846_v14  ;;  %v11687_v19 = vshrl.u32 %v3788_v24, 30  ;;  %v3852_v62 = vshrl.u32 %v8834_v38, %v3846_v14 }
 0x403   :  { %v3706_v35 = vmul.f32 %v3705_v17, %v3703_v21  ;;  %v3858_v0 = vshrl.u32 %v8836_v16, %v3846_v14  ;;  %v3861_v5 = vshrl.u32 %v8837_v53, %v3846_v14  ;;  %v3860_v46 = vshll.u32 %v8836_v16, %v3845_v10 }
 0x404   :  { %v3790_v41 = vshll.u32 %v11687_v19, 30  ;;  %v3856_v47 = vor.u32 %v3855_v45, %v3854_v11  ;;  %v3850_v56 = vor.u32 %v3849_v29, %v3848_v31  ;;  %v3853_v8 = vor.u32 %v3852_v62, %v3851_v57 }
 0x405   :  { %v3707_v6 = vxor.u32 2147483648, %v3706_v35  ;;  %v3859_v39 = vor.u32 %v3858_v0, %v3857_v15  ;;  %v11707_v44 = vand.u32 3, %v3716_v58  ;;  %v3862_v52 = vor.u32 %v3861_v5, %v3860_v46 }
 0x406   :  { %v11702_v50 = vsub.s32 %v3787_v25, %v3790_v41  ;;  %v11709_v61 = vshll.u32 %v3839_v51, 8  ;;  %vm3729_vm2 = vcmp.lt.s32.totalorder %v11335_v20, 0  ;;  %vm3866_vm4 = vcmp.lt.s32.totalorder %v3844_v36, 4 }
 0x407   :  { %v3708_v59 = vsel %vm3625_vm1, %v3707_v6, %v3706_v35  ;;  %v3939_v55 = vshrl.u32 %v3938_v7, 23  ;;  %vm3863_vm1 = vcmp.lt.s32.totalorder %v3844_v36, 1  ;;  %v3868_v10 = vsel %vm3866_vm4, %v3856_v47, 2102212464 }
 0x408   :  { %v3711_v43 = vsel %vm11637_vm11, %v11331_v9, %v3708_v59  ;;  %v3793_v23 = vsub.s32 0, %v11702_v50  ;;  %v3872_v12 = vsel %vm3866_vm4, %v3859_v39, 920167782  ;;  %v3847_v63 = vshrl.u32 %v8832_v28, %v3846_v14 }
 0x409   :  { %8713 = vcosq.f32 %v3711_v43  ;;  %vm3865_vm5 = vcmp.lt.s32.totalorder %v3844_v36, 3  ;;  %v3871_v21 = vsel %vm3863_vm1, %v3850_v56, %v3853_v8  ;;  %v3783_v17 = vadd.s32 %v11641_v18, %v11646_v49 }
 0x40a   :  { %8715 = vsinq.f32 %v3711_v43  ;;  %v8134_v25 = vmin.u32 %v3793_v23, %v11702_v50  ;;  %v3873_v58 = vsel %vm3865_vm5, %v3856_v47, %v3872_v12  ;;  %v3875_v24 = vsel %vm3863_vm1, %v3853_v8, %v3856_v47 }
 0x40b   :  { %v3876_v51 = vsel %vm3866_vm4, %v3862_v52, 1326507024  ;;  %vm3722_vm7 = vcmp.eq.s32.totalorder %v11707_v44, 2  ;;  %vm7059_vm8 = vcmp.eq.s32.totalorder %v11697_v48, 2  ;;  %vm11724_vm3 = vcmp.le.f32.partialorder %v3727_v33, 0.7853982 }
 0x40c   :  { %v3795_v14 = vclz %v8134_v25  ;;  %vm3864_vm6 = vcmp.lt.s32.totalorder %v3844_v36, 2  ;;  %v3867_v45 = vsel %vm3863_vm1, %v3847_v63, %v3850_v56  ;;  %v3869_v18 = vsel %vm3865_vm5, %v3853_v8, %v3868_v10 }
 0x40d   :  { %vm3719_vm9 = vcmp.eq.s32.totalorder %v11707_v44, 0  ;;  %vm7056_vm10 = vcmp.eq.s32.totalorder %v11697_v48, 0  ;;  %v3813_v49 = vsub.s32 4, %v11687_v19  ;;  %v3874_v7 = vsel %vm3864_vm6, %v3871_v21, %v3873_v58 }
 0x40e   :  { %v3877_v35 = vsel %vm3865_vm5, %v3859_v39, %v3876_v51  ;;  %v8141_v62 = vadd.s32 4294967169, %v3939_v55  ;;  %vm3718_vm11 = vcmp.lt.s32.totalorder %v11707_v44, 2  ;;  %vm7055_vm12 = vcmp.lt.s32.totalorder %v11697_v48, 2 }
 0x40f   :  { %v8135_v33 = vadd.s32 4294967294, %v3795_v14  ;;  %v3878_v0 = vsel %vm3864_vm6, %v3875_v24, %v3877_v35  ;;  %v11737_v11 = vmul.u32.u64.low %v11709_v61, %v3874_v7  ;;  %v11738_v15 = vmul.u32.u64.high %v11709_v61, %v3874_v7, %v11737_v11 }
 0x410   :  { %vm3715_vm13 = vweird.f32 %v11331_v9  ;;  %v3870_v5 = vsel %vm3864_vm6, %v3867_v45, %v3869_v18  ;;  %v11743_v6 = vmul.u32.u64.low %v11709_v61, %v3878_v0  ;;  %v11744_v41 = vmul.u32.u64.high %v11709_v61, %v3878_v0, %v11743_v6 }
 0x411   :  { %v3945_v36 = vadd.s32 1, %v8141_v62  ;;  %vm8136_vm14 = vcmp.lt.s32.totalorder %v8135_v33, 0  ;;  %v11748_v31 = vadd.f32 %v11306_v42, %v11323_v2  ;;  %v11752_v57 = vadd.f32 %v11314_v54, %v11390_v26 }
 0x412   :  { %v11756_v47 = vadd.f32 %v11479_v60, %v11498_v4  ;;  %v3798_v39 = vsel %vm8136_vm14, 0, %v8135_v33  ;;  %v3814_v46 = vsel %vm3729_vm2, %v3813_v49, %v11687_v19  ;;  %v11763_v59 = vadd.f32 %v11490_v30, %v11593_v1 }
 0x413   :  { %vm3946_vm15 = vcmp.gt.s32.totalorder %v3945_v36, 0  ;;  %v8714_v42 = vpop.eup %8713  ;;  %v3799_v2 = vsub.s32 32, %v3798_v39  ;;  %v3803_v56 = vsub.s32 4294967266, %v3798_v39  ;;  %v3886_v54 = vmul.u32 %v11709_v61, %v3870_v5 }
 0x414   :  { %v3889_v26 = vadd.s32 1, %v11738_v15  ;;  %v8716_v8 = vpop.eup %8715  ;;  %v3723_v60 = vxor.u32 2147483648, %v8714_v42  ;;  %v3800_v4 = vshll.u32 %v11702_v50, %v3798_v39  ;;  %vm3888_vm0 = vc.u32 %v11744_v41, %v11737_v11 }
 0x415   :  { %v3947_v19 = vsel %vm3946_vm15, %v3945_v36, 0  ;;  %v3720_v43 = vxor.u32 2147483648, %v8716_v8  ;;  %v3801_v52 = vshrl.u32 %v3783_v17, %v3799_v2  ;;  %v3804_v23 = vadd.s32 127, %v3803_v56 }
 0x416   :  { %v3890_v30 = vsel %vm3888_vm0, %v3889_v26, %v11738_v15  ;;  %v3724_v1 = vsel %vm3722_vm7, %v3723_v60, %v8716_v8  ;;  %v7061_v61 = vsel %vm7059_vm8, %v3723_v60, %v8716_v8  ;;  %v3816_v55 = vsel %vm11724_vm3, 0, %v3814_v46 }
 0x417   :  { %v3891_v10 = vadd.s32 %v3890_v30, %v3886_v54  ;;  %v3721_v50 = vsel %vm3719_vm9, %v8714_v42, %v3720_v43  ;;  %v7058_v12 = vsel %vm7056_vm10, %v8714_v42, %v3720_v43  ;;  %v3802_v25 = vor.u32 %v3801_v52, %v3800_v4 }
 0x418   :  { %v3805_v63 = vshll.u32 %v3804_v23, 23  ;;  %v3725_v21 = vsel %vm3718_vm11, %v3721_v50, %v3724_v1  ;;  %v7062_v17 = vsel %vm7055_vm12, %v7058_v12, %v7061_v61  ;;  %v3949_v24 = vand.u32 31, %v3947_v19  ;;  %v11815_v1 = vpop.f32.mrb[31].mxu1 }
 0x419   :  { %v3892_v58 = vadd.s32 536870912, %v3891_v10  ;;  %v3726_v51 = vsel %vm3715_vm13, nan, %v3725_v21  ;;  %v7063_v14 = vsel %vm3715_vm13, nan, %v7062_v17  ;;  %v3820_v18 = vadd.s32 3, %v3816_v55 }
 0x41a   :  { %v3806_v45 = vor.u32 4788187, %v3805_v63  ;;  %4685 = vst [vmem:[#allocation7 + $0x160] sm:$0xff] %v3726_v51  ;;  %8013 = vst [vmem:[#allocation7 + $0x170] sm:$0xff] %v7063_v14  ;;  %v3935_v44 = vand.u32 2147483647, %v11591_v27  ;;  %v3809_v48 = vcvt.s32.f32 %v3802_v25  ;;  %v3952_v2 = vshll.u32 %v8832_v28, %v3949_v24 }
 0x41b   :  { %v11789_v49 = vshrl.u32 %v3892_v58, 30  ;;  %v3950_v7 = vsub.s32 32, %v3949_v24  ;;  %v11792_v62 = vand.u32 3, %v3816_v55  ;;  %v11795_v15 = vand.u32 3, %v3820_v18 }
 0x41c   :  { %v3807_v35 = vand.u32 2147483647, %v3806_v45  ;;  %v3942_v36 = vand.u32 8388607, %v3935_v44  ;;  %v3955_v56 = vshll.u32 %v8833_v34, %v3949_v24  ;;  %v3948_v8 = vshrl.u32 %v3947_v19, 5 }
 0x41d   :  { %v3894_v33 = vshll.u32 %v11789_v49, 30  ;;  %v3953_v9 = vshrl.u32 %v8833_v34, %v3950_v7  ;;  %v3956_v5 = vshrl.u32 %v8834_v38, %v3950_v7  ;;  %v3959_v39 = vshrl.u32 %v8835_v40, %v3950_v7 }
 0x41e   :  { %v3810_v0 = vmul.f32 %v3809_v48, %v3807_v35  ;;  %v3962_v46 = vshrl.u32 %v8836_v16, %v3950_v7  ;;  %v3965_v54 = vshrl.u32 %v8837_v53, %v3950_v7  ;;  %v3958_v60 = vshll.u32 %v8834_v38, %v3949_v24 }
 0x41f   :  { %v11799_v6 = vsub.s32 %v3891_v10, %v3894_v33  ;;  %v3961_v4 = vshll.u32 %v8835_v40, %v3949_v24  ;;  %vm3833_vm4 = vcmp.lt.s32.totalorder %v11461_v37, 0  ;;  %v3954_v52 = vor.u32 %v3953_v9, %v3952_v2 }
 0x420   :  { %v3811_v42 = vxor.u32 2147483648, %v3810_v0  ;;  %v3957_v23 = vor.u32 %v3956_v5, %v3955_v56  ;;  %v3964_v30 = vshll.u32 %v8836_v16, %v3949_v24  ;;  %v3960_v55 = vor.u32 %v3959_v39, %v3958_v60 }
 0x421   :  { %v3897_v26 = vsub.s32 0, %v11799_v6  ;;  %v3963_v10 = vor.u32 %v3962_v46, %v3961_v4  ;;  %v3917_v50 = vsub.s32 4, %v11789_v49  ;;  %v3943_v12 = vor.u32 8388608, %v3942_v36 }
 0x422   :  { %v3812_v43 = vsel %vm3729_vm2, %v3811_v42, %v3810_v0  ;;  %v3966_v25 = vor.u32 %v3965_v54, %v3964_v30  ;;  %vm11824_vm2 = vcmp.le.f32.partialorder %v3831_v22, 0.7853982  ;;  %v3951_v29 = vshrl.u32 %v8832_v28, %v3950_v7 }
 0x423   :  { %v3815_v61 = vsel %vm11724_vm3, %v11335_v20, %v3812_v43  ;;  %v8138_v19 = vmin.u32 %v3897_v26, %v11799_v6  ;;  %vm3967_vm1 = vcmp.lt.s32.totalorder %v3948_v8, 1  ;;  %vm3968_vm5 = vcmp.lt.s32.totalorder %v3948_v8, 2 }
 0x424   :  { %8717 = vcosq.f32 %v3815_v61  ;;  %vm3969_vm7 = vcmp.lt.s32.totalorder %v3948_v8, 3  ;;  %vm3970_vm8 = vcmp.lt.s32.totalorder %v3948_v8, 4  ;;  %v3975_v17 = vsel %vm3967_vm1, %v3954_v52, %v3957_v23 }
 0x425   :  { %8719 = vsinq.f32 %v3815_v61  ;;  %v3899_v21 = vclz %v8138_v19  ;;  %v3972_v24 = vsel %vm3970_vm8, %v3960_v55, 2102212464  ;;  %v3976_v51 = vsel %vm3970_vm8, %v3963_v10, 920167782 }
 0x426   :  { %v3979_v14 = vsel %vm3967_vm1, %v3957_v23, %v3960_v55  ;;  %vm7162_vm3 = vcmp.eq.s32.totalorder %v11792_v62, 2  ;;  %v3971_v45 = vsel %vm3967_vm1, %v3951_v29, %v3954_v52  ;;  %v3977_v22 = vsel %vm3969_vm7, %v3960_v55, %v3976_v51 }
 0x427   :  { %v8139_v58 = vadd.s32 4294967294, %v3899_v21  ;;  %v3980_v18 = vsel %vm3970_vm8, %v3966_v25, 1326507024  ;;  %v3983_v35 = vshll.u32 %v3943_v12, 8  ;;  %vm7159_vm6 = vcmp.eq.s32.totalorder %v11792_v62, 0 }
 0x428   :  { %v3973_v7 = vsel %vm3969_vm7, %v3957_v23, %v3972_v24  ;;  %v3978_v48 = vsel %vm3968_vm5, %v3975_v17, %v3977_v22  ;;  %v3981_v33 = vsel %vm3969_vm7, %v3963_v10, %v3980_v18  ;;  %vm7158_vm10 = vcmp.lt.s32.totalorder %v11792_v62, 2 }
 0x429   :  { %vm8140_vm9 = vcmp.lt.s32.totalorder %v8139_v58, 0  ;;  %v3982_v9 = vsel %vm3968_vm5, %v3979_v14, %v3981_v33  ;;  %v11837_v5 = vmul.u32.u64.low %v3983_v35, %v3978_v48  ;;  %v11838_v36 = vmul.u32.u64.high %v3983_v35, %v3978_v48, %v11837_v5 }
 0x42a   :  { %v3902_v0 = vsel %vm8140_vm9, 0, %v8139_v58  ;;  %vm3819_vm11 = vweird.f32 %v11335_v20  ;;  %v3887_v39 = vadd.s32 %v11737_v11, %v11744_v41  ;;  %v3918_v2 = vsel %vm3833_vm4, %v3917_v50, %v11789_v49 }
 0x42b   :  { %v3903_v46 = vsub.s32 32, %v3902_v0  ;;  %v3907_v42 = vsub.s32 4294967266, %v3902_v0  ;;  %vm3822_vm12 = vcmp.lt.s32.totalorder %v11795_v15, 2  ;;  %v3974_v56 = vsel %vm3968_vm5, %v3971_v45, %v3973_v7 }
 0x42c   :  { %v11849_v54 = vmul.u32.u64.low %v3983_v35, %v3982_v9  ;;  %v11850_v26 = vmul.u32.u64.high %v3983_v35, %v3982_v9, %v11849_v54  ;;  %v3904_v60 = vshll.u32 %v11799_v6, %v3902_v0  ;;  %v4042_v52 = vand.u32 2139095040, %v11748_v31 }
 0x42d   :  { %v3905_v4 = vshrl.u32 %v3887_v39, %v3903_v46  ;;  %v3908_v43 = vadd.s32 127, %v3907_v42  ;;  %vm3823_vm13 = vcmp.eq.s32.totalorder %v11795_v15, 0  ;;  %vm3826_vm14 = vcmp.eq.s32.totalorder %v11795_v15, 2 }
 0x42e   :  { %v8718_v11 = vpop.eup %8717  ;;  %v3920_v41 = vsel %vm11824_vm2, 0, %v3918_v2  ;;  %v3993_v49 = vadd.s32 1, %v11838_v36  ;;  %v4043_v19 = vshrl.u32 %v4042_v52, 23  ;;  %v3990_v55 = vmul.u32 %v3983_v35, %v3974_v56 }
 0x42f   :  { %v8720_v8 = vpop.eup %8719  ;;  %v3827_v23 = vxor.u32 2147483648, %v8718_v11  ;;  %v3906_v30 = vor.u32 %v3905_v4, %v3904_v60  ;;  %v3909_v61 = vshll.u32 %v3908_v43, 23  ;;  %vm3992_vm15 = vc.u32 %v11850_v26, %v11837_v5 }
 0x430   :  { %v3824_v6 = vxor.u32 2147483648, %v8720_v8  ;;  %v4039_v10 = vand.u32 2147483647, %v11748_v31  ;;  %v3994_v58 = vsel %vm3992_vm15, %v3993_v49, %v11838_v36  ;;  %v8145_v24 = vadd.s32 4294967169, %v4043_v19 }
 0x431   :  { %v3828_v50 = vsel %vm3826_vm14, %v3827_v23, %v8720_v8  ;;  %v7164_v12 = vsel %vm7162_vm3, %v3827_v23, %v8720_v8  ;;  %v3910_v25 = vor.u32 4788187, %v3909_v61  ;;  %v3913_v21 = vcvt.s32.f32 %v3906_v30 }
 0x432   :  { %v3825_v29 = vsel %vm3823_vm13, %v8718_v11, %v3824_v6  ;;  %v7161_v17 = vsel %vm7159_vm6, %v8718_v11, %v3824_v6  ;;  %v3995_v22 = vadd.s32 %v3994_v58, %v3990_v55  ;;  %v4049_v7 = vadd.s32 1, %v8145_v24 }
 0x433   :  { %v3829_v51 = vsel %vm3822_vm12, %v3825_v29, %v3828_v50  ;;  %v7165_v14 = vsel %vm7158_vm10, %v7161_v17, %v7164_v12  ;;  %v3911_v45 = vand.u32 2147483647, %v3910_v25  ;;  %v3924_v0 = vadd.s32 3, %v3920_v41 }
 0x434   :  { %v3830_v18 = vsel %vm3819_vm11, nan, %v3829_v51  ;;  %v7166_v35 = vsel %vm3819_vm11, nan, %v7165_v14  ;;  %v3996_v33 = vadd.s32 536870912, %v3995_v22  ;;  %vm4050_vm0 = vcmp.gt.s32.totalorder %v4049_v7, 0 }
 0x435   :  { %4686 = vst [vmem:[#allocation7 + $0x168] sm:$0xff] %v3830_v18  ;;  %8014 = vst [vmem:[#allocation7 + $0x178] sm:$0xff] %v7166_v35  ;;  %v3914_v48 = vmul.f32 %v3913_v21, %v3911_v45  ;;  %v4046_v62 = vand.u32 8388607, %v4039_v10  ;;  %v4051_v36 = vsel %vm4050_vm0, %v4049_v7, 0  ;;  %v11884_v2 = vand.u32 3, %v3920_v41 }
 0x436   :  { %v3997_v9 = vshrl.u32 %v3996_v33, 30  ;;  %v4053_v39 = vand.u32 31, %v4051_v36  ;;  %vm3937_vm1 = vcmp.lt.s32.totalorder %v11591_v27, 0  ;;  %v11887_v54 = vand.u32 3, %v3924_v0 }
 0x437   :  { %v3915_v15 = vxor.u32 2147483648, %v3914_v48  ;;  %v4047_v4 = vor.u32 8388608, %v4046_v62  ;;  %v4146_v11 = vand.u32 2139095040, %v11752_v57  ;;  %v3991_v6 = vadd.s32 %v11837_v5, %v11850_v26 }
 0x438   :  { %v3998_v42 = vshll.u32 %v3997_v9, 30  ;;  %v4054_v56 = vsub.s32 32, %v4053_v39  ;;  %v4021_v43 = vsub.s32 4, %v3997_v9  ;;  %v4056_v41 = vshll.u32 %v8832_v28, %v4053_v39 }
 0x439   :  { %v3916_v46 = vsel %vm3833_vm4, %v3915_v15, %v3914_v48  ;;  %v4059_v49 = vshll.u32 %v8833_v34, %v4053_v39  ;;  %v4062_v23 = vshll.u32 %v8834_v38, %v4053_v39  ;;  %v4065_v61 = vshll.u32 %v8835_v40, %v4053_v39 }
 0x43a   :  { %v3919_v20 = vsel %vm11824_vm2, %v11461_v37, %v3916_v46  ;;  %v11889_v60 = vsub.s32 %v3995_v22, %v3998_v42  ;;  %v4057_v52 = vshrl.u32 %v8833_v34, %v4054_v56  ;;  %v4060_v8 = vshrl.u32 %v8834_v38, %v4054_v56 }
 0x43b   :  { %8721 = vcosq.f32 %v3919_v20  ;;  %v4063_v30 = vshrl.u32 %v8835_v40, %v4054_v56  ;;  %v4066_v19 = vshrl.u32 %v8836_v16, %v4054_v56  ;;  %vm3930_vm4 = vcmp.eq.s32.totalorder %v11887_v54, 2 }
 0x43c   :  { %8723 = vsinq.f32 %v3919_v20  ;;  %v4001_v63 = vsub.s32 0, %v11889_v60  ;;  %vm7265_vm2 = vcmp.eq.s32.totalorder %v11884_v2, 2  ;;  %v11906_v50 = vshrl.u32 %v4051_v36, 5 }
 0x43d   :  { %vm3927_vm5 = vcmp.eq.s32.totalorder %v11887_v54, 0  ;;  %vm7262_vm7 = vcmp.eq.s32.totalorder %v11884_v2, 0  ;;  %v4058_v12 = vor.u32 %v4057_v52, %v4056_v41  ;;  %v4061_v25 = vor.u32 %v4060_v8, %v4059_v49 }
 0x43e   :  { %v8142_v55 = vmin.u32 %v4001_v63, %v11889_v60  ;;  %v4064_v21 = vor.u32 %v4063_v30, %v4062_v23  ;;  %v4067_v29 = vor.u32 %v4066_v19, %v4065_v61  ;;  %vm3926_vm8 = vcmp.lt.s32.totalorder %v11887_v54, 2 }
 0x43f   :  { %vm7261_vm3 = vcmp.lt.s32.totalorder %v11884_v2, 2  ;;  %v11912_v58 = vshll.u32 %v4047_v4, 8  ;;  %v4143_v5 = vand.u32 2147483647, %v11752_v57  ;;  %v4147_v26 = vshrl.u32 %v4146_v11, 23 }
 0x440   :  { %v4003_v17 = vclz %v8142_v55  ;;  %vm3923_vm6 = vweird.f32 %v11461_v37  ;;  %v4022_v24 = vsel %vm3937_vm1, %v4021_v43, %v3997_v9  ;;  %v4055_v51 = vshrl.u32 %v8832_v28, %v4054_v56 }
 0x441   :  { %v4068_v14 = vshll.u32 %v8836_v16, %v4053_v39  ;;  %v4069_v45 = vshrl.u32 %v8837_v53, %v4054_v56  ;;  %vm11923_vm9 = vcmp.le.f32.partialorder %v3935_v44, 0.7853982  ;;  %vm4071_vm10 = vcmp.lt.s32.totalorder %v11906_v50, 1 }
 0x442   :  { %v8143_v18 = vadd.s32 4294967294, %v4003_v17  ;;  %vm4073_vm11 = vcmp.lt.s32.totalorder %v11906_v50, 3  ;;  %vm4074_vm12 = vcmp.lt.s32.totalorder %v11906_v50, 4  ;;  %v4079_v48 = vsel %vm4071_vm10, %v4058_v12, %v4061_v25 }
 0x443   :  { %v4070_v35 = vor.u32 %v4069_v45, %v4068_v14  ;;  %v4076_v7 = vsel %vm4074_vm12, %v4064_v21, 2102212464  ;;  %v4080_v44 = vsel %vm4074_vm12, %v4067_v29, 920167782  ;;  %vm4072_vm14 = vcmp.lt.s32.totalorder %v11906_v50, 2 }
 0x444   :  { %vm8144_vm13 = vcmp.lt.s32.totalorder %v8143_v18, 0  ;;  %v4075_v0 = vsel %vm4071_vm10, %v4055_v51, %v4058_v12  ;;  %v4081_v15 = vsel %vm4073_vm11, %v4064_v21, %v4080_v44  ;;  %v4077_v39 = vsel %vm4073_vm11, %v4061_v25, %v4076_v7 }
 0x445   :  { %v8722_v33 = vpop.eup %8721  ;;  %v4006_v36 = vsel %vm8144_vm13, 0, %v8143_v18  ;;  %v4083_v46 = vsel %vm4071_vm10, %v4061_v25, %v4064_v21  ;;  %v4082_v4 = vsel %vm4072_vm14, %v4079_v48, %v4081_v15  ;;  %v4084_v63 = vsel %vm4074_vm12, %v4070_v35, 1326507024 }
 0x446   :  { %v8724_v9 = vpop.eup %8723  ;;  %v3931_v62 = vxor.u32 2147483648, %v8722_v33  ;;  %v4007_v20 = vsub.s32 32, %v4006_v36  ;;  %v4011_v56 = vsub.s32 4294967266, %v4006_v36  ;;  %v4008_v11 = vshll.u32 %v11889_v60, %v4006_v36 }
 0x447   :  { %v3928_v42 = vxor.u32 2147483648, %v8724_v9  ;;  %v4085_v60 = vsel %vm4073_vm11, %v4067_v29, %v4084_v63  ;;  %v8149_v19 = vadd.s32 4294967169, %v4147_v26  ;;  %v4024_v54 = vsel %vm11923_vm9, 0, %v4022_v24 }
 0x448   :  { %v3932_v43 = vsel %vm3930_vm4, %v3931_v62, %v8724_v9  ;;  %v7267_v52 = vsel %vm7265_vm2, %v3931_v62, %v8724_v9  ;;  %v4009_v8 = vshrl.u32 %v3991_v6, %v4007_v20  ;;  %v4012_v23 = vadd.s32 127, %v4011_v56 }
 0x449   :  { %v3929_v41 = vsel %vm3927_vm5, %v8722_v33, %v3928_v42  ;;  %v7264_v49 = vsel %vm7262_vm7, %v8722_v33, %v3928_v42  ;;  %v4086_v2 = vsel %vm4072_vm14, %v4083_v46, %v4085_v60  ;;  %v4078_v51 = vsel %vm4072_vm14, %v4075_v0, %v4077_v39 }
 0x44a   :  { %v3933_v30 = vsel %vm3926_vm8, %v3929_v41, %v3932_v43  ;;  %v7268_v61 = vsel %vm7261_vm3, %v7264_v49, %v7267_v52  ;;  %v4010_v25 = vor.u32 %v4009_v8, %v4008_v11  ;;  %v4013_v21 = vshll.u32 %v4012_v23, 23 }
 0x44b   :  { %v3934_v55 = vsel %vm3923_vm6, nan, %v3933_v30  ;;  %v7269_v12 = vsel %vm3923_vm6, nan, %v7268_v61  ;;  %v11973_v6 = vmul.u32.u64.low %v11912_v58, %v4082_v4  ;;  %v11974_v29 = vmul.u32.u64.high %v11912_v58, %v4082_v4, %v11973_v6 }
 0x44c   :  { %4687 = vst [vmem:[#allocation7 + $0x180] sm:$0xff] %v3934_v55  ;;  %8015 = vst [vmem:[#allocation7 + $0x190] sm:$0xff] %v7269_v12  ;;  %v4014_v17 = vor.u32 4788187, %v4013_v21  ;;  %v11978_v26 = vmul.u32.u64.low %v11912_v58, %v4086_v2  ;;  %v11979_v37 = vmul.u32.u64.high %v11912_v58, %v4086_v2, %v11978_v26  ;;  %v4153_v14 = vadd.s32 1, %v8149_v19 }
 0x44d   :  { %v4017_v18 = vcvt.s32.f32 %v4010_v25  ;;  %v4028_v24 = vadd.s32 3, %v4024_v54  ;;  %v4097_v35 = vadd.s32 1, %v11974_v29  ;;  %v4150_v7 = vand.u32 8388607, %v4143_v5 }
 0x44e   :  { %v4015_v45 = vand.u32 2147483647, %v4014_v17  ;;  %vm4154_vm15 = vcmp.gt.s32.totalorder %v4153_v14, 0  ;;  %v4094_v44 = vmul.u32 %v11912_v58, %v4078_v51  ;;  %vm4096_vm0 = vc.u32 %v11979_v37, %v11973_v6 }
 0x44f   :  { %v4155_v33 = vsel %vm4154_vm15, %v4153_v14, 0  ;;  %v4098_v50 = vsel %vm4096_vm0, %v4097_v35, %v11974_v29  ;;  %v11990_v9 = vand.u32 3, %v4028_v24  ;;  %v11992_v62 = vand.u32 3, %v4024_v54 }
 0x450   :  { %v4018_v48 = vmul.f32 %v4017_v18, %v4015_v45  ;;  %v4157_v0 = vand.u32 31, %v4155_v33  ;;  %v4099_v36 = vadd.s32 %v4098_v50, %v4094_v44  ;;  %v4151_v39 = vor.u32 8388608, %v4150_v7 }
 0x451   :  { %v11994_v46 = vshrl.u32 %v4155_v33, 5  ;;  %v4250_v20 = vand.u32 2139095040, %v11756_v47  ;;  %v4247_v54 = vand.u32 2147483647, %v11756_v47  ;;  %vm4041_vm4 = vcmp.lt.s32.totalorder %v11748_v31, 0 }
 0x452   :  { %v4019_v15 = vxor.u32 2147483648, %v4018_v48  ;;  %v4158_v42 = vsub.s32 32, %v4157_v0  ;;  %v4100_v56 = vadd.s32 536870912, %v4099_v36  ;;  %v4160_v4 = vshll.u32 %v8832_v28, %v4157_v0 }
 0x453   :  { %v4163_v43 = vshll.u32 %v8833_v34, %v4157_v0  ;;  %v4169_v41 = vshll.u32 %v8835_v40, %v4157_v0  ;;  %v4166_v30 = vshll.u32 %v8834_v38, %v4157_v0  ;;  %v4172_v61 = vshll.u32 %v8836_v16, %v4157_v0 }
 0x454   :  { %v4020_v58 = vsel %vm3937_vm1, %v4019_v15, %v4018_v48  ;;  %v4161_v11 = vshrl.u32 %v8833_v34, %v4158_v42  ;;  %v4164_v63 = vshrl.u32 %v8834_v38, %v4158_v42  ;;  %v4101_v49 = vshrl.u32 %v4100_v56, 30 }
 0x455   :  { %v4023_v52 = vsel %vm11923_vm9, %v11591_v27, %v4020_v58  ;;  %v4167_v8 = vshrl.u32 %v8835_v40, %v4158_v42  ;;  %v4170_v23 = vshrl.u32 %v8836_v16, %v4158_v42  ;;  %v4173_v22 = vshrl.u32 %v8837_v53, %v4158_v42 }
 0x456   :  { %8725 = vcosq.f32 %v4023_v52  ;;  %v4102_v60 = vshll.u32 %v4101_v49, 30  ;;  %v4162_v19 = vor.u32 %v4161_v11, %v4160_v4  ;;  %v4165_v55 = vor.u32 %v4164_v63, %v4163_v43 }
 0x457   :  { %8727 = vsinq.f32 %v4023_v52  ;;  %v4171_v12 = vor.u32 %v4170_v23, %v4169_v41  ;;  %v4168_v25 = vor.u32 %v4167_v8, %v4166_v30  ;;  %v4174_v21 = vor.u32 %v4173_v22, %v4172_v61 }
 0x458   :  { %vm7368_vm1 = vcmp.eq.s32.totalorder %v11992_v62, 2  ;;  %v12015_v2 = vsub.s32 %v4099_v36, %v4102_v60  ;;  %vm4178_vm2 = vcmp.lt.s32.totalorder %v11994_v46, 4  ;;  %vm4031_vm5 = vcmp.eq.s32.totalorder %v11990_v9, 0 }
 0x459   :  { %vm4034_vm7 = vcmp.eq.s32.totalorder %v11990_v9, 2  ;;  %vm7365_vm8 = vcmp.eq.s32.totalorder %v11992_v62, 0  ;;  %vm4175_vm3 = vcmp.lt.s32.totalorder %v11994_v46, 1  ;;  %v4184_v29 = vsel %vm4178_vm2, %v4171_v12, 920167782 }
 0x45a   :  { %v4251_v17 = vshrl.u32 %v4250_v20, 23  ;;  %vm4030_vm6 = vcmp.lt.s32.totalorder %v11990_v9, 2  ;;  %vm7364_vm9 = vcmp.lt.s32.totalorder %v11992_v62, 2  ;;  %v4105_v26 = vsub.s32 0, %v12015_v2 }
 0x45b   :  { %vm4177_vm10 = vcmp.lt.s32.totalorder %v11994_v46, 3  ;;  %v4183_v51 = vsel %vm4175_vm3, %v4162_v19, %v4165_v55  ;;  %v4191_v14 = vshll.u32 %v4151_v39, 8  ;;  %vm4027_vm11 = vweird.f32 %v11591_v27 }
 0x45c   :  { %vm12033_vm12 = vcmp.le.f32.partialorder %v4039_v10, 0.7853982  ;;  %v4180_v18 = vsel %vm4178_vm2, %v4168_v25, 2102212464  ;;  %v4185_v24 = vsel %vm4177_vm10, %v4168_v25, %v4184_v29  ;;  %v4188_v35 = vsel %vm4178_vm2, %v4174_v21, 1326507024 }
 0x45d   :  { %v4254_v7 = vand.u32 8388607, %v4247_v54  ;;  %v8146_v48 = vmin.u32 %v4105_v26, %v12015_v2  ;;  %v4159_v44 = vshrl.u32 %v8832_v28, %v4158_v42  ;;  %vm4176_vm13 = vcmp.lt.s32.totalorder %v11994_v46, 2 }
 0x45e   :  { %v4187_v10 = vsel %vm4175_vm3, %v4165_v55, %v4168_v25  ;;  %v4125_v33 = vsub.s32 4, %v4101_v49  ;;  %v4186_v50 = vsel %vm4176_vm13, %v4183_v51, %v4185_v24  ;;  %v4189_v0 = vsel %vm4177_vm10, %v4171_v12, %v4188_v35 }
 0x45f   :  { %v8153_v15 = vadd.s32 4294967169, %v4251_v17  ;;  %v4095_v39 = vadd.s32 %v11973_v6, %v11979_v37  ;;  %v4107_v20 = vclz %v8146_v48  ;;  %v4179_v42 = vsel %vm4175_vm3, %v4159_v44, %v4162_v19 }
 0x460   :  { %v8726_v36 = vpop.eup %8725  ;;  %v4181_v58 = vsel %vm4177_vm10, %v4165_v55, %v4180_v18  ;;  %v4190_v43 = vsel %vm4176_vm13, %v4187_v10, %v4189_v0  ;;  %v12062_v52 = vmul.u32.u64.low %v4191_v14, %v4186_v50  ;;  %v12063_v11 = vmul.u32.u64.high %v4191_v14, %v4186_v50, %v12062_v52 }
 0x461   :  { %v8728_v56 = vpop.eup %8727  ;;  %v4035_v4 = vxor.u32 2147483648, %v8726_v36  ;;  %v8147_v41 = vadd.s32 4294967294, %v4107_v20  ;;  %v12066_v8 = vmul.u32.u64.low %v4191_v14, %v4190_v43  ;;  %v12067_v6 = vmul.u32.u64.high %v4191_v14, %v4190_v43, %v12066_v8 }
 0x462   :  { %v4032_v63 = vxor.u32 2147483648, %v8728_v56  ;;  %v4126_v30 = vsel %vm4041_vm4, %v4125_v33, %v4101_v49  ;;  %v4257_v61 = vadd.s32 1, %v8153_v15  ;;  %v4182_v19 = vsel %vm4176_vm13, %v4179_v42, %v4181_v58 }
 0x463   :  { %v4036_v37 = vsel %vm4034_vm7, %v4035_v4, %v8728_v56  ;;  %v7370_v23 = vsel %vm7368_vm1, %v4035_v4, %v8728_v56  ;;  %vm8148_vm14 = vcmp.lt.s32.totalorder %v8147_v41, 0  ;;  %v4201_v49 = vadd.s32 1, %v12063_v11 }
 0x464   :  { %v4033_v22 = vsel %vm4031_vm5, %v8726_v36, %v4032_v63  ;;  %v7367_v60 = vsel %vm7365_vm8, %v8726_v36, %v4032_v63  ;;  %v4110_v25 = vsel %vm8148_vm14, 0, %v8147_v41  ;;  %v4128_v46 = vsel %vm12033_vm12, 0, %v4126_v30 }
 0x465   :  { %v4037_v55 = vsel %vm4030_vm6, %v4033_v22, %v4036_v37  ;;  %v7371_v12 = vsel %vm7364_vm9, %v7367_v60, %v7370_v23  ;;  %v4111_v17 = vsub.s32 32, %v4110_v25  ;;  %v4115_v9 = vsub.s32 4294967266, %v4110_v25 }
 0x466   :  { %v4038_v21 = vsel %vm4027_vm11, nan, %v4037_v55  ;;  %v7372_v29 = vsel %vm4027_vm11, nan, %v7371_v12  ;;  %v4198_v26 = vmul.u32 %v4191_v14, %v4182_v19  ;;  %vm4200_vm15 = vc.u32 %v12067_v6, %v12062_v52 }
 0x467   :  { %4688 = vst [vmem:[#allocation7 + $0x188] sm:$0xff] %v4038_v21  ;;  %8016 = vst [vmem:[#allocation7 + $0x198] sm:$0xff] %v7372_v29  ;;  %vm4258_vm0 = vcmp.gt.s32.totalorder %v4257_v61, 0  ;;  %v4112_v62 = vshll.u32 %v12015_v2, %v4110_v25  ;;  %v4113_v51 = vshrl.u32 %v4095_v39, %v4111_v17  ;;  %v4202_v18 = vsel %vm4200_vm15, %v4201_v49, %v12063_v11 }
 0x468   :  { %v4259_v24 = vsel %vm4258_vm0, %v4257_v61, 0  ;;  %v4116_v27 = vadd.s32 127, %v4115_v9  ;;  %v4203_v35 = vadd.s32 %v4202_v18, %v4198_v26  ;;  %v4255_v48 = vor.u32 8388608, %v4254_v7 }
 0x469   :  { %v4261_v44 = vand.u32 31, %v4259_v24  ;;  %v4114_v10 = vor.u32 %v4113_v51, %v4112_v62  ;;  %v4132_v33 = vadd.s32 3, %v4128_v46  ;;  %v4354_v14 = vand.u32 2139095040, %v11763_v59 }
 0x46a   :  { %v4117_v50 = vshll.u32 %v4116_v27, 23  ;;  %v4204_v0 = vadd.s32 536870912, %v4203_v35  ;;  %v12099_v42 = vshll.u32 %v4255_v48, 8  ;;  %v4351_v2 = vand.u32 2147483647, %v11763_v59 }
 0x46b   :  { %v4262_v15 = vsub.s32 32, %v4261_v44  ;;  %v4121_v39 = vcvt.s32.f32 %v4114_v10  ;;  %v12102_v58 = vand.u32 3, %v4132_v33  ;;  %v12104_v56 = vand.u32 3, %v4128_v46 }
 0x46c   :  { %v4118_v36 = vor.u32 4788187, %v4117_v50  ;;  %v12097_v20 = vshrl.u32 %v4204_v0, 30  ;;  %v4264_v41 = vshll.u32 %v8832_v28, %v4261_v44  ;;  %v4267_v8 = vshll.u32 %v8833_v34, %v4261_v44 }
 0x46d   :  { %v4265_v7 = vshrl.u32 %v8833_v34, %v4262_v15  ;;  %v4268_v11 = vshrl.u32 %v8834_v38, %v4262_v15  ;;  %v4271_v63 = vshrl.u32 %v8835_v40, %v4262_v15  ;;  %v4274_v37 = vshrl.u32 %v8836_v16, %v4262_v15 }
 0x46e   :  { %v4119_v4 = vand.u32 2147483647, %v4118_v36  ;;  %v4206_v43 = vshll.u32 %v12097_v20, 30  ;;  %v4355_v23 = vshrl.u32 %v4354_v14, 23  ;;  %v4270_v22 = vshll.u32 %v8834_v38, %v4261_v44 }
 0x46f   :  { %v4277_v60 = vshrl.u32 %v8837_v53, %v4262_v15  ;;  %v4260_v19 = vshrl.u32 %v4259_v24, 5  ;;  %v4266_v55 = vor.u32 %v4265_v7, %v4264_v41  ;;  %v4273_v12 = vshll.u32 %v8835_v40, %v4261_v44 }
 0x470   :  { %v4122_v30 = vmul.f32 %v4121_v39, %v4119_v4  ;;  %v12113_v61 = vsub.s32 %v4203_v35, %v4206_v43  ;;  %v4276_v25 = vshll.u32 %v8836_v16, %v4261_v44  ;;  %v4269_v29 = vor.u32 %v4268_v11, %v4267_v8 }
 0x471   :  { %v4272_v17 = vor.u32 %v4271_v63, %v4270_v22  ;;  %v4199_v46 = vadd.s32 %v12062_v52, %v12067_v6  ;;  %v4263_v9 = vshrl.u32 %v8832_v28, %v4262_v15  ;;  %v4275_v26 = vor.u32 %v4274_v37, %v4273_v12 }
 0x472   :  { %v4123_v49 = vxor.u32 2147483648, %v4122_v30  ;;  %v4209_v21 = vsub.s32 0, %v12113_v61  ;;  %v8157_v62 = vadd.s32 4294967169, %v4355_v23  ;;  %v4229_v24 = vsub.s32 4, %v12097_v20 }
 0x473   :  { %v4278_v27 = vor.u32 %v4277_v60, %v4276_v25  ;;  %vm4279_vm1 = vcmp.lt.s32.totalorder %v4260_v19, 1  ;;  %vm4280_vm2 = vcmp.lt.s32.totalorder %v4260_v19, 2  ;;  %vm4282_vm5 = vcmp.lt.s32.totalorder %v4260_v19, 4 }
 0x474   :  { %v4124_v51 = vsel %vm4041_vm4, %v4123_v49, %v4122_v30  ;;  %v8150_v18 = vmin.u32 %v4209_v21, %v12113_v61  ;;  %v4284_v6 = vsel %vm4282_vm5, %v4272_v17, 2102212464  ;;  %v4287_v48 = vsel %vm4279_vm1, %v4266_v55, %v4269_v29 }
 0x475   :  { %v4127_v35 = vsel %vm12033_vm12, %v11748_v31, %v4124_v51  ;;  %vm4145_vm7 = vcmp.lt.s32.totalorder %v11752_v57, 0  ;;  %vm4281_vm4 = vcmp.lt.s32.totalorder %v4260_v19, 3  ;;  %v4288_v44 = vsel %vm4282_vm5, %v4275_v26, 920167782 }
 0x476   :  { %8729 = vcosq.f32 %v4127_v35  ;;  %v4211_v52 = vclz %v8150_v18  ;;  %v4291_v10 = vsel %vm4279_vm1, %v4269_v29, %v4272_v17  ;;  %v4283_v50 = vsel %vm4279_vm1, %v4263_v9, %v4266_v55 }
 0x477   :  { %8731 = vsinq.f32 %v4127_v35  ;;  %v4289_v0 = vsel %vm4281_vm4, %v4272_v17, %v4288_v44  ;;  %v4292_v15 = vsel %vm4282_vm5, %v4278_v27, 1326507024  ;;  %v4285_v14 = vsel %vm4281_vm4, %v4269_v29, %v4284_v6 }
 0x478   :  { %v8151_v33 = vadd.s32 4294967294, %v4211_v52  ;;  %v4290_v45 = vsel %vm4280_vm2, %v4287_v48, %v4289_v0  ;;  %v4293_v36 = vsel %vm4281_vm4, %v4275_v26, %v4292_v15  ;;  %v4361_v39 = vadd.s32 1, %v8157_v62 }
 0x479   :  { %vm12134_vm8 = vcmp.le.f32.partialorder %v4143_v5, 0.7853982  ;;  %v4294_v4 = vsel %vm4280_vm2, %v4291_v10, %v4293_v36  ;;  %v12140_v43 = vmul.u32.u64.low %v12099_v42, %v4290_v45  ;;  %v12141_v11 = vmul.u32.u64.high %v12099_v42, %v4290_v45, %v12140_v43 }
 0x47a   :  { %vm8152_vm3 = vcmp.lt.s32.totalorder %v8151_v33, 0  ;;  %v12145_v41 = vmul.u32.u64.low %v12099_v42, %v4294_v4  ;;  %v12146_v8 = vmul.u32.u64.high %v12099_v42, %v4294_v4, %v12145_v41  ;;  %vm4362_vm6 = vcmp.gt.s32.totalorder %v4361_v39, 0 }
 0x47b   :  { %v4214_v63 = vsel %vm8152_vm3, 0, %v8151_v33  ;;  %vm7467_vm9 = vcmp.lt.s32.totalorder %v12104_v56, 2  ;;  %v4286_v23 = vsel %vm4280_vm2, %v4283_v50, %v4285_v14  ;;  %v4363_v30 = vsel %vm4362_vm6, %v4361_v39, 0 }
 0x47c   :  { %v4215_v5 = vsub.s32 32, %v4214_v63  ;;  %v4219_v37 = vsub.s32 4294967266, %v4214_v63  ;;  %vm4131_vm10 = vweird.f32 %v11748_v31  ;;  %vm7468_vm11 = vcmp.eq.s32.totalorder %v12104_v56, 0 }
 0x47d   :  { %v4216_v22 = vshll.u32 %v12113_v61, %v4214_v63  ;;  %v4365_v60 = vand.u32 31, %v4363_v30  ;;  %v12155_v55 = vadd.f32 %v11678_v13, %v11685_v3  ;;  %v4305_v49 = vadd.s32 1, %v12141_v11 }
 0x47e   :  { %v4217_v12 = vshrl.u32 %v4199_v46, %v4215_v5  ;;  %v4220_v25 = vadd.s32 127, %v4219_v37  ;;  %v12160_v19 = vadd.f32 %v11680_v32, %v11815_v1  ;;  %vm4134_vm12 = vcmp.lt.s32.totalorder %v12102_v58, 2 }
 0x47f   :  { %vm7471_vm13 = vcmp.eq.s32.totalorder %v12104_v56, 2  ;;  %v4302_v21 = vmul.u32 %v12099_v42, %v4286_v23  ;;  %vm4304_vm14 = vc.u32 %v12146_v8, %v12140_v43  ;;  %v4230_v29 = vsel %vm4145_vm7, %v4229_v24, %v12097_v20 }
 0x480   :  { %v8730_v61 = vpop.eup %8729  ;;  %v4218_v13 = vor.u32 %v4217_v12, %v4216_v22  ;;  %v4221_v3 = vshll.u32 %v4220_v25, 23  ;;  %v4306_v17 = vsel %vm4304_vm14, %v4305_v49, %v12141_v11  ;;  %vm4135_vm15 = vcmp.eq.s32.totalorder %v12102_v58, 0 }
 0x481   :  { %v8732_v32 = vpop.eup %8731  ;;  %v4139_v1 = vxor.u32 2147483648, %v8730_v61  ;;  %v4307_v46 = vadd.s32 %v4306_v17, %v4302_v21  ;;  %v4358_v42 = vand.u32 8388607, %v4351_v2  ;;  %vm4138_vm0 = vcmp.eq.s32.totalorder %v12102_v58, 2 }
 0x482   :  { %v4136_v9 = vxor.u32 2147483648, %v8732_v32  ;;  %v4222_v26 = vor.u32 4788187, %v4221_v3  ;;  %v4366_v62 = vsub.s32 32, %v4365_v60  ;;  %v4232_v20 = vsel %vm12134_vm8, 0, %v4230_v29 }
 0x483   :  { %v4140_v51 = vsel %vm4138_vm0, %v4139_v1, %v8732_v32  ;;  %v7473_v18 = vsel %vm7471_vm13, %v4139_v1, %v8732_v32  ;;  %v4308_v24 = vadd.s32 536870912, %v4307_v46  ;;  %v4225_v6 = vcvt.s32.f32 %v4218_v13 }
 0x484   :  { %v4137_v27 = vsel %vm4135_vm15, %v8730_v61, %v4136_v9  ;;  %v7470_v35 = vsel %vm7468_vm11, %v8730_v61, %v4136_v9  ;;  %v4223_v52 = vand.u32 2147483647, %v4222_v26  ;;  %v4359_v33 = vor.u32 8388608, %v4358_v42 }
 0x485   :  { %v4141_v48 = vsel %vm4134_vm12, %v4137_v27, %v4140_v51  ;;  %v7474_v44 = vsel %vm7467_vm9, %v7470_v35, %v7473_v18  ;;  %v12185_v10 = vshrl.u32 %v4308_v24, 30  ;;  %v4375_v14 = vshrl.u32 %v8835_v40, %v4366_v62 }
 0x486   :  { %v4142_v50 = vsel %vm4131_vm10, nan, %v4141_v48  ;;  %v7475_v0 = vsel %vm4131_vm10, nan, %v7474_v44  ;;  %v4226_v15 = vmul.f32 %v4225_v6, %v4223_v52  ;;  %v4236_v45 = vadd.s32 3, %v4232_v20 }
 0x487   :  { %4689 = vst [vmem:[#allocation7 + $0x1a0] sm:$0xff] %v4142_v50  ;;  %8017 = vst [vmem:[#allocation7 + $0x1b0] sm:$0xff] %v7475_v0  ;;  %v4310_v58 = vshll.u32 %v12185_v10, 30  ;;  %v4369_v56 = vshrl.u32 %v8833_v34, %v4366_v62  ;;  %v4372_v36 = vshrl.u32 %v8834_v38, %v4366_v62  ;;  %v4374_v4 = vshll.u32 %v8834_v38, %v4365_v60 }
 0x488   :  { %v4227_v39 = vxor.u32 2147483648, %v4226_v15  ;;  %v4378_v11 = vshrl.u32 %v8836_v16, %v4366_v62  ;;  %v4381_v31 = vshrl.u32 %v8837_v53, %v4366_v62  ;;  %v4364_v41 = vshrl.u32 %v4363_v30, 5 }
 0x489   :  { %v12198_v63 = vsub.s32 %v4307_v46, %v4310_v58  ;;  %v4368_v5 = vshll.u32 %v8832_v28, %v4365_v60  ;;  %v4371_v37 = vshll.u32 %v8833_v34, %v4365_v60  ;;  %v4376_v22 = vor.u32 %v4375_v14, %v4374_v4 }
 0x48a   :  { %v4228_v23 = vsel %vm4145_vm7, %v4227_v39, %v4226_v15  ;;  %v4377_v12 = vshll.u32 %v8835_v40, %v4365_v60  ;;  %v4380_v25 = vshll.u32 %v8836_v16, %v4365_v60  ;;  %v12210_v13 = vand.u32 3, %v4232_v20 }
 0x48b   :  { %v4231_v49 = vsel %vm12134_vm8, %v11752_v57, %v4228_v23  ;;  %v4313_v21 = vsub.s32 0, %v12198_v63  ;;  %v4370_v61 = vor.u32 %v4369_v56, %v4368_v5  ;;  %v4373_v30 = vor.u32 %v4372_v36, %v4371_v37 }
 0x48c   :  { %8733 = vcosq.f32 %v4231_v49  ;;  %v4379_v3 = vor.u32 %v4378_v11, %v4377_v12  ;;  %v4382_v29 = vor.u32 %v4381_v31, %v4380_v25  ;;  %vm4249_vm1 = vcmp.lt.s32.totalorder %v11756_v47, 0 }
 0x48d   :  { %8735 = vsinq.f32 %v4231_v49  ;;  %v8154_v17 = vmin.u32 %v4313_v21, %v12198_v63  ;;  %v4367_v60 = vshrl.u32 %v8832_v28, %v4366_v62  ;;  %vm4386_vm2 = vcmp.lt.s32.totalorder %v4364_v41, 4 }
 0x48e   :  { %v4237_v32 = vand.u32 3, %v4236_v45  ;;  %vm4383_vm5 = vcmp.lt.s32.totalorder %v4364_v41, 1  ;;  %v4388_v7 = vsel %vm4386_vm2, %v4376_v22, 2102212464  ;;  %v4399_v1 = vshll.u32 %v4359_v33, 8 }
 0x48f   :  { %v4315_v46 = vclz %v8154_v17  ;;  %vm4385_vm7 = vcmp.lt.s32.totalorder %v4364_v41, 3  ;;  %v4387_v42 = vsel %vm4383_vm5, %v4367_v60, %v4370_v61  ;;  %v4391_v9 = vsel %vm4383_vm5, %v4370_v61, %v4373_v30 }
 0x490   :  { %v4389_v26 = vsel %vm4385_vm7, %v4373_v30, %v4388_v7  ;;  %v4392_v51 = vsel %vm4386_vm2, %v4379_v3, 920167782  ;;  %v4395_v18 = vsel %vm4383_vm5, %v4373_v30, %v4376_v22  ;;  %v4396_v20 = vsel %vm4386_vm2, %v4382_v29, 1326507024 }
 0x491   :  { %vm7571_vm4 = vcmp.eq.s32.totalorder %v12210_v13, 0  ;;  %v8155_v24 = vadd.s32 4294967294, %v4315_v46  ;;  %vm4384_vm8 = vcmp.lt.s32.totalorder %v4364_v41, 2  ;;  %v4393_v27 = vsel %vm4385_vm7, %v4376_v22, %v4392_v51 }
 0x492   :  { %v4397_v35 = vsel %vm4385_vm7, %v4379_v3, %v4396_v20  ;;  %vm7570_vm3 = vcmp.lt.s32.totalorder %v12210_v13, 2  ;;  %vm7574_vm6 = vcmp.eq.s32.totalorder %v12210_v13, 2  ;;  %v4333_v62 = vsub.s32 4, %v12185_v10 }
 0x493   :  { %v4394_v52 = vsel %vm4384_vm8, %v4391_v9, %v4393_v27  ;;  %v4398_v6 = vsel %vm4384_vm8, %v4395_v18, %v4397_v35  ;;  %vm4235_vm9 = vweird.f32 %v11752_v57  ;;  %vm8156_vm10 = vcmp.lt.s32.totalorder %v8155_v24, 0 }
 0x494   :  { %v4390_v48 = vsel %vm4384_vm8, %v4387_v42, %v4389_v26  ;;  %v12220_v44 = vmul.u32.u64.low %v4399_v1, %v4398_v6  ;;  %v12221_v33 = vmul.u32.u64.high %v4399_v1, %v4398_v6, %v12220_v44  ;;  %vm4238_vm11 = vcmp.lt.s32.totalorder %v4237_v32, 2 }
 0x495   :  { %v4318_v50 = vsel %vm8156_vm10, 0, %v8155_v24  ;;  %v12223_v0 = vmul.u32.u64.low %v4399_v1, %v4394_v52  ;;  %v12224_v15 = vmul.u32.u64.high %v4399_v1, %v4394_v52, %v12223_v0  ;;  %v4303_v14 = vadd.s32 %v12140_v43, %v12146_v8 }
 0x496   :  { %v4319_v45 = vsub.s32 32, %v4318_v50  ;;  %v4323_v58 = vsub.s32 4294967266, %v4318_v50  ;;  %v4458_v56 = vand.u32 2139095040, %v12155_v55  ;;  %v8734_v36 = vpop.eup %8733  ;;  %vm4239_vm12 = vcmp.eq.s32.totalorder %v4237_v32, 0 }
 0x497   :  { %vm4242_vm13 = vcmp.eq.s32.totalorder %v4237_v32, 2  ;;  %v4334_v39 = vsel %vm4249_vm1, %v4333_v62, %v12185_v10  ;;  %v4406_v4 = vmul.u32 %v4399_v1, %v4390_v48  ;;  %v8736_v11 = vpop.eup %8735  ;;  %v4243_v31 = vxor.u32 2147483648, %v8734_v36 }
 0x498   :  { %v4320_v41 = vshll.u32 %v12198_v63, %v4318_v50  ;;  %v4321_v5 = vshrl.u32 %v4303_v14, %v4319_v45  ;;  %v4324_v37 = vadd.s32 127, %v4323_v58  ;;  %v4240_v23 = vxor.u32 2147483648, %v8736_v11 }
 0x499   :  { %vm4408_vm14 = vc.u32 %v12221_v33, %v12223_v0  ;;  %v4409_v43 = vadd.s32 1, %v12224_v15  ;;  %v4459_v8 = vshrl.u32 %v4458_v56, 23  ;;  %v4244_v22 = vsel %vm4242_vm13, %v4243_v31, %v8736_v11 }
 0x49a   :  { %v7576_v12 = vsel %vm7574_vm6, %v4243_v31, %v8736_v11  ;;  %v4322_v25 = vor.u32 %v4321_v5, %v4320_v41  ;;  %v4325_v49 = vshll.u32 %v4324_v37, 23  ;;  %v4241_v10 = vsel %vm4239_vm12, %v8734_v36, %v4240_v23 }
 0x49b   :  { %v7573_v21 = vsel %vm7571_vm4, %v8734_v36, %v4240_v23  ;;  %v4410_v63 = vsel %vm4408_vm14, %v4409_v43, %v12224_v15  ;;  %v8161_v61 = vadd.s32 4294967169, %v4459_v8  ;;  %v4245_v30 = vsel %vm4238_vm11, %v4241_v10, %v4244_v22 }
 0x49c   :  { %v7577_v3 = vsel %vm7570_vm3, %v7573_v21, %v7576_v12  ;;  %v4326_v29 = vor.u32 4788187, %v4325_v49  ;;  %v4455_v17 = vand.u32 2147483647, %v12155_v55  ;;  %v4246_v60 = vsel %vm4235_vm9, nan, %v4245_v30 }
 0x49d   :  { %v7578_v7 = vsel %vm4235_vm9, nan, %v7577_v3  ;;  %v4411_v1 = vadd.s32 %v4410_v63, %v4406_v4  ;;  %4690 = vst [vmem:[#allocation7 + $0x1a8] sm:$0xff] %v4246_v60  ;;  %vm12251_vm15 = vcmp.le.f32.partialorder %v4247_v54, 0.7853982  ;;  %v4329_v46 = vcvt.s32.f32 %v4322_v25 }
 0x49e   :  { %8018 = vst [vmem:[#allocation7 + $0x1b8] sm:$0xff] %v7578_v7  ;;  %v4327_v13 = vand.u32 2147483647, %v4326_v29  ;;  %v4465_v42 = vadd.s32 1, %v8161_v61  ;;  %v4336_v9 = vsel %vm12251_vm15, 0, %v4334_v39  ;;  %v4562_v62 = vand.u32 2139095040, %v12160_v19 }
 0x49f   :  { %v4412_v26 = vadd.s32 536870912, %v4411_v1  ;;  %v4462_v57 = vand.u32 8388607, %v4455_v17  ;;  %v4340_v54 = vadd.s32 3, %v4336_v9  ;;  %v12268_v50 = vand.u32 3, %v4336_v9 }
 0x4a0   :  { %v4330_v51 = vmul.f32 %v4329_v46, %v4327_v13  ;;  %vm4466_vm0 = vcmp.gt.s32.totalorder %v4465_v42, 0  ;;  %v4407_v45 = vadd.s32 %v12223_v0, %v12221_v33  ;;  %v4559_v58 = vand.u32 2147483647, %v12160_v19 }
 0x4a1   :  { %v12259_v18 = vshrl.u32 %v4412_v26, 30  ;;  %v4467_v20 = vsel %vm4466_vm0, %v4465_v42, 0  ;;  %v4463_v6 = vor.u32 8388608, %v4462_v57  ;;  %v12272_v14 = vand.u32 3, %v4340_v54 }
 0x4a2   :  { %v4331_v24 = vxor.u32 2147483648, %v4330_v51  ;;  %v4469_v27 = vand.u32 31, %v4467_v20  ;;  %v4563_v39 = vshrl.u32 %v4562_v62, 23  ;;  %v12284_v37 = vshrl.u32 %v4467_v20, 5 }
 0x4a3   :  { %v4414_v35 = vshll.u32 %v12259_v18, 30  ;;  %v12281_v41 = vshll.u32 %v4463_v6, 8  ;;  %vm7677_vm2 = vcmp.eq.s32.totalorder %v12268_v50, 2  ;;  %v12294_v22 = vand.u32 8388607, %v4559_v58 }
 0x4a4   :  { %v4332_v52 = vsel %vm4249_vm1, %v4331_v24, %v4330_v51  ;;  %v4470_v48 = vsub.s32 32, %v4469_v27  ;;  %v4478_v11 = vshll.u32 %v8834_v38, %v4469_v27  ;;  %v4472_v33 = vshll.u32 %v8832_v28, %v4469_v27 }
 0x4a5   :  { %v4335_v44 = vsel %vm12251_vm15, %v11756_v47, %v4332_v52  ;;  %v12270_v15 = vsub.s32 %v4411_v1, %v4414_v35  ;;  %v4475_v0 = vshll.u32 %v8833_v34, %v4469_v27  ;;  %vm4346_vm1 = vcmp.eq.s32.totalorder %v12272_v14, 2 }
 0x4a6   :  { %8737 = vcosq.f32 %v4335_v44  ;;  %v4473_v36 = vshrl.u32 %v8833_v34, %v4470_v48  ;;  %v4476_v4 = vshrl.u32 %v8834_v38, %v4470_v48  ;;  %v4479_v31 = vshrl.u32 %v8835_v40, %v4470_v48 }
 0x4a7   :  { %8739 = vsinq.f32 %v4335_v44  ;;  %v4417_v56 = vsub.s32 0, %v12270_v15  ;;  %v4481_v43 = vshll.u32 %v8835_v40, %v4469_v27  ;;  %v4482_v8 = vshrl.u32 %v8836_v16, %v4470_v48 }
 0x4a8   :  { %v4480_v23 = vor.u32 %v4479_v31, %v4478_v11  ;;  %vm4343_vm5 = vcmp.eq.s32.totalorder %v12272_v14, 0  ;;  %vm7674_vm7 = vcmp.eq.s32.totalorder %v12268_v50, 0  ;;  %v4474_v25 = vor.u32 %v4473_v36, %v4472_v33 }
 0x4a9   :  { %v8158_v5 = vmin.u32 %v4417_v56, %v12270_v15  ;;  %v4477_v49 = vor.u32 %v4476_v4, %v4475_v0  ;;  %v8165_v10 = vadd.s32 4294967169, %v4563_v39  ;;  %vm4342_vm4 = vcmp.lt.s32.totalorder %v12272_v14, 2 }
 0x4aa   :  { %vm7673_vm8 = vcmp.lt.s32.totalorder %v12268_v50, 2  ;;  %v4437_v21 = vsub.s32 4, %v12259_v18  ;;  %v4483_v63 = vor.u32 %v4482_v8, %v4481_v43  ;;  %v4484_v61 = vshll.u32 %v8836_v16, %v4469_v27 }
 0x4ab   :  { %v4419_v12 = vclz %v8158_v5  ;;  %v4485_v30 = vshrl.u32 %v8837_v53, %v4470_v48  ;;  %vm4339_vm3 = vweird.f32 %v11756_v47  ;;  %v4471_v29 = vshrl.u32 %v8832_v28, %v4470_v48 }
 0x4ac   :  { %vm4487_vm6 = vcmp.lt.s32.totalorder %v12284_v37, 1  ;;  %vm4490_vm9 = vcmp.lt.s32.totalorder %v12284_v37, 4  ;;  %vm4488_vm10 = vcmp.lt.s32.totalorder %v12284_v37, 2  ;;  %vm4489_vm11 = vcmp.lt.s32.totalorder %v12284_v37, 3 }
 0x4ad   :  { %v8159_v3 = vadd.s32 4294967294, %v4419_v12  ;;  %v4486_v60 = vor.u32 %v4485_v30, %v4484_v61  ;;  %v4492_v7 = vsel %vm4490_vm9, %v4480_v23, 2102212464  ;;  %v4491_v1 = vsel %vm4487_vm6, %v4471_v29, %v4474_v25 }
 0x4ae   :  { %v4495_v32 = vsel %vm4487_vm6, %v4474_v25, %v4477_v49  ;;  %v4496_v13 = vsel %vm4490_vm9, %v4483_v63, 920167782  ;;  %v4493_v9 = vsel %vm4489_vm11, %v4477_v49, %v4492_v7  ;;  %v4499_v27 = vsel %vm4487_vm6, %v4477_v49, %v4480_v23 }
 0x4af   :  { %vm8160_vm12 = vcmp.lt.s32.totalorder %v8159_v3, 0  ;;  %v4497_v26 = vsel %vm4489_vm11, %v4480_v23, %v4496_v13  ;;  %v4500_v51 = vsel %vm4490_vm9, %v4486_v60, 1326507024  ;;  %v4569_v11 = vadd.s32 1, %v8165_v10 }
 0x4b0   :  { %v8738_v46 = vpop.eup %8737  ;;  %v4422_v42 = vsel %vm8160_vm12, 0, %v8159_v3  ;;  %v4498_v52 = vsel %vm4488_vm10, %v4495_v32, %v4497_v26  ;;  %v4501_v6 = vsel %vm4489_vm11, %v4483_v63, %v4500_v51  ;;  %vm4353_vm13 = vcmp.lt.s32.totalorder %v11763_v59, 0 }
 0x4b1   :  { %v8740_v57 = vpop.eup %8739  ;;  %v4347_v20 = vxor.u32 2147483648, %v8738_v46  ;;  %v4423_v24 = vsub.s32 32, %v4422_v42  ;;  %v4427_v54 = vsub.s32 4294967266, %v4422_v42  ;;  %v4424_v62 = vshll.u32 %v12270_v15, %v4422_v42 }
 0x4b2   :  { %v4344_v35 = vxor.u32 2147483648, %v8740_v57  ;;  %v4502_v4 = vsel %vm4488_vm10, %v4499_v27, %v4501_v6  ;;  %v12348_v50 = vmul.u32.u64.low %v12281_v41, %v4498_v52  ;;  %v12349_v12 = vmul.u32.u64.high %v12281_v41, %v4498_v52, %v12348_v50 }
 0x4b3   :  { %v4348_v48 = vsel %vm4346_vm1, %v4347_v20, %v8740_v57  ;;  %v7679_v44 = vsel %vm7677_vm2, %v4347_v20, %v8740_v57  ;;  %v4425_v56 = vshrl.u32 %v4407_v45, %v4423_v24  ;;  %v4428_v36 = vadd.s32 127, %v4427_v54 }
 0x4b4   :  { %v4345_v39 = vsel %vm4343_vm5, %v8738_v46, %v4344_v35  ;;  %v7676_v15 = vsel %vm7674_vm7, %v8738_v46, %v4344_v35  ;;  %v12343_v43 = vmul.u32.u64.low %v12281_v41, %v4502_v4  ;;  %v12344_v8 = vmul.u32.u64.high %v12281_v41, %v4502_v4, %v12343_v43 }
 0x4b5   :  { %v4349_v31 = vsel %vm4342_vm4, %v4345_v39, %v4348_v48  ;;  %v7680_v5 = vsel %vm7673_vm8, %v7676_v15, %v7679_v44  ;;  %v4426_v33 = vor.u32 %v4425_v56, %v4424_v62  ;;  %v4429_v0 = vshll.u32 %v4428_v36, 23 }
 0x4b6   :  { %v4350_v45 = vsel %vm4339_vm3, nan, %v4349_v31  ;;  %v7681_v23 = vsel %vm4339_vm3, nan, %v7680_v5  ;;  %v4438_v25 = vsel %vm4353_vm13, %v4437_v21, %v12259_v18  ;;  %v4494_v47 = vsel %vm4488_vm10, %v4491_v1, %v4493_v9 }
 0x4b7   :  { %4691 = vst [vmem:[#allocation7 + $0x1c0] sm:$0xff] %v4350_v45  ;;  %8019 = vst [vmem:[#allocation7 + $0x1d0] sm:$0xff] %v7681_v23  ;;  %v4430_v14 = vor.u32 4788187, %v4429_v0  ;;  %vm4570_vm14 = vcmp.gt.s32.totalorder %v4569_v11, 0  ;;  %v4433_v10 = vcvt.s32.f32 %v4426_v33  ;;  %vm4512_vm0 = vc.u32 %v12344_v8, %v12348_v50 }
 0x4b8   :  { %v4571_v63 = vsel %vm4570_vm14, %v4569_v11, 0  ;;  %vm12359_vm15 = vcmp.le.f32.partialorder %v4351_v2, 0.7853982  ;;  %v4567_v30 = vor.u32 8388608, %v12294_v22  ;;  %v4510_v21 = vmul.u32 %v12281_v41, %v4494_v47 }
 0x4b9   :  { %v4431_v49 = vand.u32 2147483647, %v4430_v14  ;;  %v4573_v3 = vand.u32 31, %v4571_v63  ;;  %v4440_v37 = vsel %vm12359_vm15, 0, %v4438_v25  ;;  %v4513_v29 = vadd.s32 1, %v12349_v12 }
 0x4ba   :  { %v4572_v60 = vshrl.u32 %v4571_v63, 5  ;;  %v4444_v48 = vadd.s32 3, %v4440_v37  ;;  %v7775_v11 = vand.u32 3, %v4440_v37  ;;  %vm4443_vm12 = vweird.f32 %v11763_v59 }
 0x4bb   :  { %v4434_v18 = vmul.f32 %v4433_v10, %v4431_v49  ;;  %v4574_v7 = vsub.s32 32, %v4573_v3  ;;  %v4576_v2 = vshll.u32 %v8832_v28, %v4573_v3  ;;  %v4579_v1 = vshll.u32 %v8833_v34, %v4573_v3 }
 0x4bc   :  { %v4514_v13 = vsel %vm4512_vm0, %v4513_v29, %v12349_v12  ;;  %v4582_v22 = vshll.u32 %v8834_v38, %v4573_v3  ;;  %v4585_v46 = vshll.u32 %v8835_v40, %v4573_v3  ;;  %v4588_v26 = vshll.u32 %v8836_v16, %v4573_v3 }
 0x4bd   :  { %v4435_v32 = vxor.u32 2147483648, %v4434_v18  ;;  %v4515_v42 = vadd.s32 %v4514_v13, %v4510_v21  ;;  %v4577_v9 = vshrl.u32 %v8833_v34, %v4574_v7  ;;  %v4580_v41 = vshrl.u32 %v8834_v38, %v4574_v7 }
 0x4be   :  { %v4583_v57 = vshrl.u32 %v8835_v40, %v4574_v7  ;;  %v4586_v20 = vshrl.u32 %v8836_v16, %v4574_v7  ;;  %v4589_v24 = vshrl.u32 %v8837_v53, %v4574_v7  ;;  %vm4591_vm1 = vcmp.lt.s32.totalorder %v4572_v60, 1 }
 0x4bf   :  { %v4436_v51 = vsel %vm4353_vm13, %v4435_v32, %v4434_v18  ;;  %v4516_v27 = vadd.s32 536870912, %v4515_v42  ;;  %v4578_v35 = vor.u32 %v4577_v9, %v4576_v2  ;;  %v4581_v34 = vor.u32 %v4580_v41, %v4579_v1 }
 0x4c0   :  { %v4439_v54 = vsel %vm12359_vm15, %v11763_v59, %v4436_v51  ;;  %v4584_v38 = vor.u32 %v4583_v57, %v4582_v22  ;;  %v4587_v62 = vor.u32 %v4586_v20, %v4585_v46  ;;  %v4590_v52 = vor.u32 %v4589_v24, %v4588_v26 }
 0x4c1   :  { %8741 = vcosq.f32 %v4439_v54  ;;  %v12386_v6 = vshrl.u32 %v4516_v27, 30  ;;  %v4607_v40 = vshll.u32 %v4567_v30, 8  ;;  %v4575_v16 = vshrl.u32 %v8832_v28, %v4574_v7 }
 0x4c2   :  { %8743 = vsinq.f32 %v4439_v54  ;;  %vm4594_vm2 = vcmp.lt.s32.totalorder %v4572_v60, 4  ;;  %v4599_v53 = vsel %vm4591_vm1, %v4578_v35, %v4581_v34  ;;  %vm4593_vm5 = vcmp.lt.s32.totalorder %v4572_v60, 3 }
 0x4c3   :  { %v4518_v44 = vshll.u32 %v12386_v6, 30  ;;  %v4596_v56 = vsel %vm4594_vm2, %v4584_v38, 2102212464  ;;  %v4600_v36 = vsel %vm4594_vm2, %v4587_v62, 920167782  ;;  %vm4592_vm7 = vcmp.lt.s32.totalorder %v4572_v60, 2 }
 0x4c4   :  { %v4601_v39 = vsel %vm4593_vm5, %v4584_v38, %v4600_v36  ;;  %v4603_v15 = vsel %vm4591_vm1, %v4581_v34, %v4584_v38  ;;  %v4604_v4 = vsel %vm4594_vm2, %v4590_v52, 1326507024  ;;  %v4595_v5 = vsel %vm4591_vm1, %v4575_v16, %v4578_v35 }
 0x4c5   :  { %v4519_v31 = vsub.s32 %v4515_v42, %v4518_v44  ;;  %v4602_v33 = vsel %vm4592_vm7, %v4599_v53, %v4601_v39  ;;  %v4597_v28 = vsel %vm4593_vm5, %v4581_v34, %v4596_v56  ;;  %v4605_v0 = vsel %vm4593_vm5, %v4587_v62, %v4604_v4 }
 0x4c6   :  { %v12394_v45 = vmul.u32.u64.low %v4607_v40, %v4602_v33  ;;  %v12395_v23 = vmul.u32.u64.high %v4607_v40, %v4602_v33, %v12394_v45  ;;  %v4445_v43 = vand.u32 3, %v4444_v48  ;;  %v4606_v12 = vsel %vm4592_vm7, %v4603_v15, %v4605_v0 }
 0x4c7   :  { %v4521_v14 = vsub.s32 0, %v4519_v31  ;;  %v12399_v25 = vmul.u32.u64.low %v4607_v40, %v4606_v12  ;;  %v12400_v47 = vmul.u32.u64.high %v4607_v40, %v4606_v12, %v12399_v25  ;;  %v4598_v10 = vsel %vm4592_vm7, %v4595_v5, %v4597_v28 }
 0x4c8   :  { %vm7776_vm4 = vcmp.lt.s32.totalorder %v7775_v11, 2  ;;  %vm7777_vm8 = vcmp.eq.s32.totalorder %v7775_v11, 0  ;;  %v4617_v61 = vadd.s32 1, %v12395_v23  ;;  %vm4447_vm3 = vcmp.eq.s32.totalorder %v4445_v43, 0 }
 0x4c9   :  { %v8162_v49 = vmin.u32 %v4521_v14, %v4519_v31  ;;  %vm7780_vm6 = vcmp.eq.s32.totalorder %v7775_v11, 2  ;;  %vm4450_vm9 = vcmp.eq.s32.totalorder %v4445_v43, 2  ;;  %v4614_v21 = vmul.u32 %v4607_v40, %v4598_v10 }
 0x4ca   :  { %vm4616_vm10 = vc.u32 %v12400_v47, %v12394_v45  ;;  %vm4446_vm11 = vcmp.lt.s32.totalorder %v4445_v43, 2  ;;  %v4511_v51 = vadd.s32 %v12348_v50, %v12344_v8  ;;  %v4541_v53 = vsub.s32 4, %v12386_v6 }
 0x4cb   :  { %v8742_v63 = vpop.eup %8741  ;;  %v4523_v18 = vclz %v8162_v49  ;;  %v4618_v2 = vsel %vm4616_vm10, %v4617_v61, %v12395_v23  ;;  %vm4457_vm14 = vcmp.lt.s32.totalorder %v12155_v55, 0  ;;  %vm4456_vm15 = vcmp.le.f32.partialorder %v4455_v17, 0.7853982 }
 0x4cc   :  { %v8744_v30 = vpop.eup %8743  ;;  %v4451_v3 = vxor.u32 2147483648, %v8742_v63  ;;  %v4619_v13 = vadd.s32 %v4618_v2, %v4614_v21  ;;  %v4542_v36 = vsel %vm4457_vm14, %v4541_v53, %v12386_v6  ;;  %v4615_v5 = vadd.s32 %v12394_v45, %v12400_v47 }
 0x4cd   :  { %v4448_v37 = vxor.u32 2147483648, %v8744_v30  ;;  %v8163_v60 = vadd.s32 4294967294, %v4523_v18  ;;  %v4544_v11 = vsel %vm4456_vm15, 0, %v4542_v36  ;;  %vm4547_vm1 = vweird.f32 %v12155_v55 }
 0x4ce   :  { %v4452_v29 = vsel %vm4450_vm9, %v4451_v3, %v8744_v30  ;;  %v7782_v7 = vsel %vm7780_vm6, %v4451_v3, %v8744_v30  ;;  %v4620_v26 = vadd.s32 536870912, %v4619_v13  ;;  %v4548_v43 = vadd.s32 3, %v4544_v11 }
 0x4cf   :  { %v4449_v1 = vsel %vm4447_vm3, %v8742_v63, %v4448_v37  ;;  %v7779_v32 = vsel %vm7777_vm8, %v8742_v63, %v4448_v37  ;;  %vm8164_vm13 = vcmp.lt.s32.totalorder %v8163_v60, 0  ;;  %v7878_v49 = vand.u32 3, %v4544_v11 }
 0x4d0   :  { %v4453_v22 = vsel %vm4446_vm11, %v4449_v1, %v4452_v29  ;;  %v7783_v46 = vsel %vm7776_vm4, %v7779_v32, %v7782_v7  ;;  %v4526_v41 = vsel %vm8164_vm13, 0, %v8163_v60  ;;  %v12412_v24 = vshrl.u32 %v4620_v26, 30 }
 0x4d1   :  { %v4454_v42 = vsel %vm4443_vm12, nan, %v4453_v22  ;;  %v7784_v9 = vsel %vm4443_vm12, nan, %v7783_v46  ;;  %v4527_v57 = vsub.s32 32, %v4526_v41  ;;  %v4531_v20 = vsub.s32 4294967266, %v4526_v41 }
 0x4d2   :  { %4692 = vst [vmem:[#allocation7 + $0x1c8] sm:$0xff] %v4454_v42  ;;  %8020 = vst [vmem:[#allocation7 + $0x1d8] sm:$0xff] %v7784_v9  ;;  %v4528_v54 = vshll.u32 %v4519_v31, %v4526_v41  ;;  %v4622_v35 = vshll.u32 %v12412_v24, 30  ;;  %v4549_v25 = vand.u32 3, %v4548_v43  ;;  %vm4561_vm2 = vcmp.lt.s32.totalorder %v12160_v19, 0 }
 0x4d3   :  { %v4529_v27 = vshrl.u32 %v4511_v51, %v4527_v57  ;;  %v4532_v59 = vadd.s32 127, %v4531_v20  ;;  %vm12427_vm5 = vcmp.le.f32.partialorder %v4559_v58, 0.7853982  ;;  %v4645_v18 = vsub.s32 4, %v12412_v24 }
 0x4d4   :  { %v4623_v62 = vsub.s32 %v4619_v13, %v4622_v35  ;;  %vm4554_vm7 = vcmp.eq.s32.totalorder %v4549_v25, 2  ;;  %vm7880_vm4 = vcmp.eq.s32.totalorder %v7878_v49, 0  ;;  %vm7883_vm8 = vcmp.eq.s32.totalorder %v7878_v49, 2 }
 0x4d5   :  { %v4530_v34 = vor.u32 %v4529_v27, %v4528_v54  ;;  %v4533_v38 = vshll.u32 %v4532_v59, 23  ;;  %vm4551_vm3 = vcmp.eq.s32.totalorder %v4549_v25, 0  ;;  %vm4550_vm6 = vcmp.lt.s32.totalorder %v4549_v25, 2 }
 0x4d6   :  { %v4625_v40 = vsub.s32 0, %v4623_v62  ;;  %vm7879_vm9 = vcmp.lt.s32.totalorder %v7878_v49, 2  ;;  %v4646_v13 = vsel %vm4561_vm2, %v4645_v18, %v12412_v24 }
 0x4d7   :  { %v4534_v52 = vor.u32 4788187, %v4533_v38  ;;  %v4537_v16 = vcvt.s32.f32 %v4530_v34  ;;  %v4648_v9 = vsel %vm12427_vm5, 0, %v4646_v13 }
 0x4d8   :  { %v8166_v44 = vmin.u32 %v4625_v40, %v4623_v62  ;;  %v4652_v41 = vadd.s32 3, %v4648_v9  ;;  %v7981_v51 = vand.u32 3, %v4648_v9 }
 0x4d9   :  { %v4535_v48 = vand.u32 2147483647, %v4534_v52 }
 0x4da   :  { %v4627_v50 = vclz %v8166_v44  ;;  %v4653_v26 = vand.u32 3, %v4652_v41  ;;  %vm7986_vm11 = vcmp.eq.s32.totalorder %v7981_v51, 2  ;;  %vm7983_vm13 = vcmp.eq.s32.totalorder %v7981_v51, 0 }
 0x4db   :  { %v4538_v8 = vmul.f32 %v4537_v16, %v4535_v48 }
 0x4dc   :  { %v8167_v39 = vadd.s32 4294967294, %v4627_v50  ;;  %vm4658_vm10 = vcmp.eq.s32.totalorder %v4653_v26, 2  ;;  %vm4655_vm12 = vcmp.eq.s32.totalorder %v4653_v26, 0 }
 0x4dd   :  { %v4539_v56 = vxor.u32 2147483648, %v4538_v8 }
 0x4de   :  { %vm8168_vm0 = vcmp.lt.s32.totalorder %v8167_v39, 0 }
 0x4df   :  { %v4540_v15 = vsel %vm4457_vm14, %v4539_v56, %v4538_v8  ;;  %v4630_v31 = vsel %vm8168_vm0, 0, %v8167_v39  ;;  %vm4654_vm14 = vcmp.lt.s32.totalorder %v4653_v26, 2  ;;  %vm4651_vm0 = vweird.f32 %v12160_v19 }
 0x4e0   :  { %v4543_v4 = vsel %vm4456_vm15, %v12155_v55, %v4540_v15  ;;  %v4631_v33 = vsub.s32 32, %v4630_v31  ;;  %v4635_v28 = vsub.s32 4294967266, %v4630_v31  ;;  %v4632_v0 = vshll.u32 %v4623_v62, %v4630_v31 }
 0x4e1   :  { %8745 = vcosq.f32 %v4543_v4  ;;  %vm7982_vm15 = vcmp.lt.s32.totalorder %v7981_v51, 2 }
 0x4e2   :  { %8747 = vsinq.f32 %v4543_v4  ;;  %v4633_v23 = vshrl.u32 %v4615_v5, %v4631_v33  ;;  %v4636_v6 = vadd.s32 127, %v4635_v28 }
 0x4e4   :  { %v4634_v14 = vor.u32 %v4633_v23, %v4632_v0  ;;  %v4637_v12 = vshll.u32 %v4636_v6, 23 }
 0x4e6   :  { %v4638_v17 = vor.u32 4788187, %v4637_v12  ;;  %v4641_v63 = vcvt.s32.f32 %v4634_v14 }
 0x4e8   :  { %v4639_v10 = vand.u32 2147483647, %v4638_v17 }
 0x4ea   :  { %v4642_v3 = vmul.f32 %v4641_v63, %v4639_v10 }
 0x4eb   :  { %v8746_v61 = vpop.eup %8745 }
 0x4ec   :  { %v8748_v30 = vpop.eup %8747  ;;  %v4555_v45 = vxor.u32 2147483648, %v8746_v61  ;;  %v4643_v7 = vxor.u32 2147483648, %v4642_v3 }
 0x4ed   :  { %v4552_v37 = vxor.u32 2147483648, %v8748_v30 }
 0x4ee   :  { %v4556_v21 = vsel %vm4554_vm7, %v4555_v45, %v8748_v30  ;;  %v7885_v29 = vsel %vm7883_vm8, %v4555_v45, %v8748_v30  ;;  %v4644_v32 = vsel %vm4561_vm2, %v4643_v7, %v4642_v3 }
 0x4ef   :  { %v4553_v60 = vsel %vm4551_vm3, %v8746_v61, %v4552_v37  ;;  %v7882_v2 = vsel %vm7880_vm4, %v8746_v61, %v4552_v37  ;;  %v4647_v42 = vsel %vm12427_vm5, %v12160_v19, %v4644_v32 }
 0x4f0   :  { %v4557_v1 = vsel %vm4550_vm6, %v4553_v60, %v4556_v21  ;;  %v7886_v58 = vsel %vm7879_vm9, %v7882_v2, %v7885_v29  ;;  %8749 = vcosq.f32 %v4647_v42 }
 0x4f1   :  { %v4558_v22 = vsel %vm4547_vm1, nan, %v4557_v1  ;;  %v7887_v46 = vsel %vm4547_vm1, nan, %v7886_v58  ;;  %8751 = vsinq.f32 %v4647_v42 }
 0x4f2   :  { %4693 = vst [vmem:[#allocation7 + $0x1e0] sm:$0xff] %v4558_v22  ;;  %8021 = vst [vmem:[#allocation7 + $0x1f0] sm:$0xff] %v7887_v46 }
 0x4fa   :  { %v8750_v57 = vpop.eup %8749 }
 0x4fb   :  { %v8752_v20 = vpop.eup %8751  ;;  %v4659_v24 = vxor.u32 2147483648, %v8750_v57 }
 0x4fc   :  { %v4656_v54 = vxor.u32 2147483648, %v8752_v20 }
 0x4fd   :  { %v4660_v55 = vsel %vm4658_vm10, %v4659_v24, %v8752_v20  ;;  %v7988_v27 = vsel %vm7986_vm11, %v4659_v24, %v8752_v20 }
 0x4fe   :  { %v4657_v59 = vsel %vm4655_vm12, %v8750_v57, %v4656_v54  ;;  %v7985_v35 = vsel %vm7983_vm13, %v8750_v57, %v4656_v54 }
 0x4ff   :  { %v4661_v34 = vsel %vm4654_vm14, %v4657_v59, %v4660_v55  ;;  %v7989_v38 = vsel %vm7982_vm15, %v7985_v35, %v7988_v27 }
 0x500   :  { %v4662_v62 = vsel %vm4651_vm0, nan, %v4661_v34  ;;  %v7990_v52 = vsel %vm4651_vm0, nan, %v7989_v38 }
 0x501   :  { %4694 = vst [vmem:[#allocation7 + $0x1e8] sm:$0xff] %v4662_v62  ;;  %8022 = vst [vmem:[#allocation7 + $0x1f8] sm:$0xff] %v7990_v52 }
 0x502   :  { %8808 = shalt.err (!%p8805_p6)
}
 0x503   :  { %s8809_s12 = scalar_lea.hbm %s12461_s2, 8192 }
 0x504   :  { %p8810_p7 = scmp.ne.s32.totalorder %s12461_s2, %s8809_s12  ;;  %p8813_p8 = scmp.lt.u32.totalorder %s8809_s12, %s12461_s2 }
 0x506   :  { %p8815_p9 = pnand %p8813_p8, %p8810_p7 }
 0x508   :  { %8818 = shalt.err (!%p8815_p9)
}
 0x509   :  { %s8839_s17 = smov 512   ;;  %s8840_s18 = smov 32  }
 0x50a   :  { %8034 = dma.vmem_to_hbm [thread:$0]  %s8029_s8, 8192, %s12461_s2, [#allocation4], %s8839_s17, %s8839_s17, %s8840_s18  }
 0x50b   :  { %8823 = dma.done.wait [#allocation4], 8192  }
 0x50c   :  { %8824 = vsyncadd [#allocation4], 4294959104 }
 0x50d   :  { %8038 = vsyncpa [#allocation3], 1 }
 0x50e   :  { %8039 = vsyncpa [#allocation6], 1 }
 0x50f   :  { %8040 = vsyncpa [#allocation4], 1 }

</bundles_post_ra>
